<compile_context>
chip_gen: v7x
topology: tpu7x:2x2x1
jax: 0.10.0
libtpu: 0.0.40
codegen_flags: <defaults>
</compile_context>

<pallas_src>
import functools

import jax
import jax.numpy as jnp
from jax import lax
from jax.experimental import pallas as pl
from jax.experimental.pallas import tpu as pltpu

BN_EPS = 1e-5
LANE = 128


def _round_up(x, m):
    return (x + m - 1) // m * m


def _vmem_limit_bytes(per_step_bytes):
    """Clamp a generous per-step estimate against the real per-core VMEM."""
    try:
        cap = int(getattr(pltpu.get_tpu_info(), "vmem_capacity_bytes", 64 << 20))
    except Exception:  # pragma: no cover - conservative fallback
        cap = 64 << 20
    want = 3 * per_step_bytes + (8 << 20)   # double-buffered blocks + scratch + slack
    return int(max(32 << 20, min(want, int(cap * 0.7))))


# --------------------------------------------------------------------------
# Kernels
# --------------------------------------------------------------------------
def _conv_stats_kernel(x_ref, w_ref, y_ref, stats_ref, *,
                       hout, wout, cin, cout, stride):
    """Phase 1: in-kernel im2col conv (9 shifted matmuls) + BN partial stats.

    x_ref:     (1, Hpad, Wpad, Cin)  bf16  spatially zero-padded NHWC image
    w_ref:     (9, Cin, C_pad)       bf16  per-tap weights, channel-padded
    y_ref:     (1, Cout, PX)         bf16  conv output, channel-major
    stats_ref: (1, 2, C_pad)         f32   row 0: sum, row 1: centered SSQ
    """
    px = hout * wout
    c_pad = w_ref.shape[-1]

    acc = jnp.zeros((px, c_pad), jnp.float32)
    for kh in range(3):
        for kw in range(3):
            if stride == 1:
                slab = x_ref[0, kh:kh + hout, kw:kw + wout, :]
            else:  # not traced for the stride==1 sandbox run
                slab = x_ref[0, pl.ds(kh, hout, stride),
                             pl.ds(kw, wout, stride), :]
            # (Hout, Wout, Cin) -> (PX, Cin): collapse leading dims only, the
            # lane dim (Cin) is untouched, so no relayout is required.
            patches = slab.reshape(px, cin)
            acc = acc + jnp.dot(patches, w_ref[kh * 3 + kw],
                                preferred_element_type=jnp.float32)

    # BN partial stats from the f32 accumulator (centered per tile; merged with
    # a Chan/Welford update in the wrapper -> no E[y^2]-E[y]^2 cancellation).
    s = jnp.sum(acc, axis=0, keepdims=True)                  # (1, C_pad)
    d = acc - s * (1.0 / px)
    m2 = jnp.sum(d * d, axis=0, keepdims=True)               # (1, C_pad)
    stats_ref[0, 0:1, :] = s
    stats_ref[0, 1:2, :] = m2

    # Store y channel-major (lane-dense over pixels) in bf16; padded channels
    # are dropped here so no trailing crop/transpose pass is needed.
    y_ref[0] = acc.T[:cout, :].astype(y_ref.dtype)


def _bn_relu_kernel(y_ref, ss_ref, o_ref):
    """Phase 2: out = relu(y*scale + shift); f32 epilogue (v5e VPU has no bf16).

    y_ref:  (1, Cout, PX) bf16
    ss_ref: (Cout, 2)     f32   column 0 = scale, column 1 = shift
    o_ref:  (1, Cout, PX) f32
    """
    y = y_ref[0].astype(jnp.float32)                         # (Cout, PX)
    out = y * ss_ref[:, 0:1] + ss_ref[:, 1:2]
    o_ref[0] = jnp.maximum(out, 0.0).astype(o_ref.dtype)


# --------------------------------------------------------------------------
# Wrapper
# --------------------------------------------------------------------------
@functools.partial(jax.jit, static_argnames=("stride",))
def dummy_resnet_layer(x, conv_w, conv_b, bn_gamma, bn_beta, stride=1):
    """x: (N, Cin, H, W) f32 -> (N, Cout, Hout, Wout) f32 (train-mode BN)."""
    del conv_b  # train-mode BN subtracts the batch mean: BN(y + b) == BN(y).

    n, cin, h, w = x.shape
    cout = conv_w.shape[0]
    hout = (h + 2 - 3) // stride + 1
    wout = (w + 2 - 3) // stride + 1
    px = hout * wout
    hpad, wpad = h + 2, w + 2
    c_pad = _round_up(cout, LANE)

    # Single pass over x: NCHW f32 -> padded NHWC bf16 (read ~once by Phase 1).
    xp = jnp.transpose(x.astype(jnp.bfloat16), (0, 2, 3, 1))
    xp = jnp.pad(xp, ((0, 0), (1, 1), (1, 1), (0, 0)))        # (N, Hpad, Wpad, Cin)

    # Weights: (Cout, Cin, 3, 3) -> tap-major (9, Cin, C_pad) bf16.
    w_taps = jnp.transpose(conv_w.astype(jnp.bfloat16), (2, 3, 1, 0))
    w_taps = w_taps.reshape(9, cin, cout)
    w_taps = jnp.pad(w_taps, ((0, 0), (0, 0), (0, c_pad - cout)))

    kern1 = functools.partial(_conv_stats_kernel, hout=hout, wout=wout,
                              cin=cin, cout=cout, stride=stride)

    # Rough per-step VMEM footprint (bytes), incl. layout-padding slack.
    step1 = (hpad * _round_up(wpad, 16) * max(cin, LANE) * 2   # x block (tiled bf16)
             + 9 * max(cin, 16) * c_pad * 2                    # weight block
             + cout * _round_up(px, LANE) * 2                  # y block
             + 2 * c_pad * 4                                   # stats block
             + 2 * px * c_pad * 4)                             # f32 acc + temps

    # ---------------- Phase 1: conv (im2col in kernel) + partial stats -------
    y, stats = pl.pallas_call(
        kern1,
        out_shape=(
            jax.ShapeDtypeStruct((n, cout, px), jnp.bfloat16),
            jax.ShapeDtypeStruct((n, 2, c_pad), jnp.float32),
        ),
        grid=(n,),
        in_specs=[
            pl.BlockSpec((1, hpad, wpad, cin), lambda i: (i, 0, 0, 0)),
            pl.BlockSpec((9, cin, c_pad), lambda i: (0, 0, 0)),
        ],
        out_specs=(
            pl.BlockSpec((1, cout, px), lambda i: (i, 0, 0)),
            pl.BlockSpec((1, 2, c_pad), lambda i: (i, 0, 0)),
        ),
        compiler_params=pltpu.CompilerParams(
            dimension_semantics=("parallel",),
            vmem_limit_bytes=_vmem_limit_bytes(step1)),
        cost_estimate=pl.CostEstimate(
            flops=2 * n * px * 9 * cin * c_pad, transcendentals=0,
            bytes_accessed=(xp.size * 2 + w_taps.size * 2
                            + n * cout * px * 2 + n * 2 * c_pad * 4)),
    )(xp, w_taps)

    # ---- Tiny per-channel Chan/Welford merge -> BN scale/shift (wrapper) ----
    sums = stats[:, 0, :cout]                                  # (N, Cout)
    m2s = stats[:, 1, :cout]
    total = n * px
    mean = jnp.sum(sums, axis=0) / total                       # (Cout,)
    mean_t = sums / px
    m2 = jnp.sum(m2s, axis=0) + px * jnp.sum((mean_t - mean) ** 2, axis=0)
    var = m2 / total                                           # biased (train BN)
    inv_std = lax.rsqrt(var + BN_EPS)
    scale = bn_gamma.astype(jnp.float32) * inv_std
    shift = bn_beta.astype(jnp.float32) - mean * scale
    ss = jnp.stack([scale, shift], axis=1)                     # (Cout, 2)

    # ---------------- Phase 2: normalize + ReLU (channel-major, lane-dense) --
    step2 = cout * _round_up(px, LANE) * (2 + 4) + cout * 2 * 4
    out = pl.pallas_call(
        _bn_relu_kernel,
        out_shape=jax.ShapeDtypeStruct((n, cout, px), jnp.float32),
        grid=(n,),
        in_specs=[
            pl.BlockSpec((1, cout, px), lambda i: (i, 0, 0)),
            pl.BlockSpec((cout, 2), lambda i: (0, 0)),
        ],
        out_specs=pl.BlockSpec((1, cout, px), lambda i: (i, 0, 0)),
        compiler_params=pltpu.CompilerParams(
            dimension_semantics=("parallel",),
            vmem_limit_bytes=_vmem_limit_bytes(step2)),
        cost_estimate=pl.CostEstimate(
            flops=3 * n * cout * px, transcendentals=0,
            bytes_accessed=n * cout * px * (2 + 4) + cout * 2 * 4),
    )(y, ss)

    # (N, Cout, Hout*Wout) -> NCHW is a free reshape: no transpose / crop pass.
    return out.reshape(n, cout, hout, wout)


# --------------------------------------------------------------------------
# Pure-JAX reference (f32) for a correctness sanity check
# --------------------------------------------------------------------------
def _reference_forward(x, conv_w, conv_b, gamma, beta, stride):
    y = lax.conv_general_dilated(
        x, conv_w, window_strides=(stride, stride), padding=((1, 1), (1, 1)),
        dimension_numbers=("NCHW", "OIHW", "NCHW"))
    y = y + conv_b[None, :, None, None]
    mean = jnp.mean(y, axis=(0, 2, 3), keepdims=True)
    var = jnp.var(y, axis=(0, 2, 3), keepdims=True)   # biased, BN train mode
    y = (y - mean) * lax.rsqrt(var + BN_EPS)
    y = y * gamma[None, :, None, None] + beta[None, :, None, None]
    return jnp.maximum(y, 0.0)


if __name__ == "__main__":
    # Small shapes consistent with the module: batch=2, in_channels=4,
    # out_channels=8, spatial=16, stride=1.
    N, CIN, COUT, H, W, STRIDE = 2, 4, 8, 16, 16, 1

    key = jax.random.PRNGKey(0)
    kx, kw, kb = jax.random.split(key, 3)

    x = jax.random.normal(kx, (N, CIN, H, W), dtype=jnp.float32)

    fan_in = CIN * 3 * 3
    bound = 1.0 / (fan_in ** 0.5)
    conv_w = jax.random.uniform(kw, (COUT, CIN, 3, 3), jnp.float32, -bound, bound)
    conv_b = jax.random.uniform(kb, (COUT,), jnp.float32, -bound, bound)
    bn_gamma = jnp.ones((COUT,), jnp.float32)   # BatchNorm2d default weight
    bn_beta = jnp.zeros((COUT,), jnp.float32)   # BatchNorm2d default bias

    out = dummy_resnet_layer(x, conv_w, conv_b, bn_gamma, bn_beta, stride=STRIDE)
    jax.block_until_ready(out)

    assert out.shape == (N, COUT, H // STRIDE, W // STRIDE)
    assert bool(jnp.all(out >= 0.0))            # ReLU sanity

    ref = _reference_forward(x, conv_w, conv_b, bn_gamma, bn_beta, STRIDE)
    max_err = float(jnp.max(jnp.abs(out - ref)))
    assert max_err < 5e-2, f"max abs error vs reference too large: {max_err}"

    print("KERNEL_OK")
</pallas_src>

<mosaic_0001>
module attributes {stable_mosaic.version = 11 : i64} {
  func.func @_conv_stats_kernel(%arg0: i32, %arg1: memref<1x18x18x4xbf16, #tpu.memory_space<vmem>>, %arg2: memref<9x4x128xbf16, #tpu.memory_space<vmem>>, %arg3: memref<1x8x256xbf16, #tpu.memory_space<vmem>>, %arg4: memref<1x2x128xf32, #tpu.memory_space<vmem>>) attributes {dimension_semantics = [#tpu.dimension_semantics<parallel>], iteration_bounds = array<i64: 2>, scalar_prefetch = 0 : i64, scratch_operands = 0 : i64, tpu.core_type = #tpu.core_type<tc>, window_params = [{transform_indices = @transform_0, window_bounds = array<i64: 1, 18, 18, 4>}, {pipeline_mode = #tpu.pipeline_mode<synchronous>, transform_indices = @transform_1, window_bounds = array<i64: 9, 4, 128>}, {transform_indices = @transform_2, window_bounds = array<i64: 1, 8, 256>}, {transform_indices = @transform_3, window_bounds = array<i64: 1, 2, 128>}]} {
    %cst = arith.constant 0.000000e+00 : f32
    %0 = vector.broadcast %cst : f32 to vector<256x128xf32>
    %c0 = arith.constant 0 : index
    %c0_0 = arith.constant 0 : index
    %c0_1 = arith.constant 0 : index
    %c0_2 = arith.constant 0 : index
    %1 = vector.load %arg1[%c0, %c0_0, %c0_1, %c0_2] : memref<1x18x18x4xbf16, #tpu.memory_space<vmem>>, vector<1x16x16x4xbf16>
    %2 = vector.shape_cast %1 : vector<1x16x16x4xbf16> to vector<16x16x4xbf16>
    %3 = vector.shape_cast %2 : vector<16x16x4xbf16> to vector<256x4xbf16>
    %c0_3 = arith.constant 0 : index
    %c0_4 = arith.constant 0 : index
    %c0_5 = arith.constant 0 : index
    %4 = vector.load %arg2[%c0_3, %c0_4, %c0_5] : memref<9x4x128xbf16, #tpu.memory_space<vmem>>, vector<1x4x128xbf16>
    %5 = vector.shape_cast %4 : vector<1x4x128xbf16> to vector<4x128xbf16>
    %cst_6 = arith.constant dense<0.000000e+00> : vector<256x128xf32>
    %6 = tpu.matmul %3, %5, %cst_6 {dimension_numbers = #tpu.dot_dimension_numbers<[1], [0], [0], [1], [0, 0, 1, 1], [], []>} : vector<256x4xbf16>, vector<4x128xbf16>, vector<256x128xf32> -> vector<256x128xf32>
    %7 = arith.addf %0, %6 : vector<256x128xf32>
    %c0_7 = arith.constant 0 : index
    %c0_8 = arith.constant 0 : index
    %c1 = arith.constant 1 : index
    %c0_9 = arith.constant 0 : index
    %8 = vector.load %arg1[%c0_7, %c0_8, %c1, %c0_9] : memref<1x18x18x4xbf16, #tpu.memory_space<vmem>>, vector<1x16x16x4xbf16>
    %9 = vector.shape_cast %8 : vector<1x16x16x4xbf16> to vector<16x16x4xbf16>
    %10 = vector.shape_cast %9 : vector<16x16x4xbf16> to vector<256x4xbf16>
    %c1_10 = arith.constant 1 : index
    %c0_11 = arith.constant 0 : index
    %c0_12 = arith.constant 0 : index
    %11 = vector.load %arg2[%c1_10, %c0_11, %c0_12] : memref<9x4x128xbf16, #tpu.memory_space<vmem>>, vector<1x4x128xbf16>
    %12 = vector.shape_cast %11 : vector<1x4x128xbf16> to vector<4x128xbf16>
    %cst_13 = arith.constant dense<0.000000e+00> : vector<256x128xf32>
    %13 = tpu.matmul %10, %12, %cst_13 {dimension_numbers = #tpu.dot_dimension_numbers<[1], [0], [0], [1], [0, 0, 1, 1], [], []>} : vector<256x4xbf16>, vector<4x128xbf16>, vector<256x128xf32> -> vector<256x128xf32>
    %14 = arith.addf %7, %13 : vector<256x128xf32>
    %c0_14 = arith.constant 0 : index
    %c0_15 = arith.constant 0 : index
    %c2 = arith.constant 2 : index
    %c0_16 = arith.constant 0 : index
    %15 = vector.load %arg1[%c0_14, %c0_15, %c2, %c0_16] : memref<1x18x18x4xbf16, #tpu.memory_space<vmem>>, vector<1x16x16x4xbf16>
    %16 = vector.shape_cast %15 : vector<1x16x16x4xbf16> to vector<16x16x4xbf16>
    %17 = vector.shape_cast %16 : vector<16x16x4xbf16> to vector<256x4xbf16>
    %c2_17 = arith.constant 2 : index
    %c0_18 = arith.constant 0 : index
    %c0_19 = arith.constant 0 : index
    %18 = vector.load %arg2[%c2_17, %c0_18, %c0_19] : memref<9x4x128xbf16, #tpu.memory_space<vmem>>, vector<1x4x128xbf16>
    %19 = vector.shape_cast %18 : vector<1x4x128xbf16> to vector<4x128xbf16>
    %cst_20 = arith.constant dense<0.000000e+00> : vector<256x128xf32>
    %20 = tpu.matmul %17, %19, %cst_20 {dimension_numbers = #tpu.dot_dimension_numbers<[1], [0], [0], [1], [0, 0, 1, 1], [], []>} : vector<256x4xbf16>, vector<4x128xbf16>, vector<256x128xf32> -> vector<256x128xf32>
    %21 = arith.addf %14, %20 : vector<256x128xf32>
    %c0_21 = arith.constant 0 : index
    %c1_22 = arith.constant 1 : index
    %c0_23 = arith.constant 0 : index
    %c0_24 = arith.constant 0 : index
    %22 = vector.load %arg1[%c0_21, %c1_22, %c0_23, %c0_24] : memref<1x18x18x4xbf16, #tpu.memory_space<vmem>>, vector<1x16x16x4xbf16>
    %23 = vector.shape_cast %22 : vector<1x16x16x4xbf16> to vector<16x16x4xbf16>
    %24 = vector.shape_cast %23 : vector<16x16x4xbf16> to vector<256x4xbf16>
    %c3 = arith.constant 3 : index
    %c0_25 = arith.constant 0 : index
    %c0_26 = arith.constant 0 : index
    %25 = vector.load %arg2[%c3, %c0_25, %c0_26] : memref<9x4x128xbf16, #tpu.memory_space<vmem>>, vector<1x4x128xbf16>
    %26 = vector.shape_cast %25 : vector<1x4x128xbf16> to vector<4x128xbf16>
    %cst_27 = arith.constant dense<0.000000e+00> : vector<256x128xf32>
    %27 = tpu.matmul %24, %26, %cst_27 {dimension_numbers = #tpu.dot_dimension_numbers<[1], [0], [0], [1], [0, 0, 1, 1], [], []>} : vector<256x4xbf16>, vector<4x128xbf16>, vector<256x128xf32> -> vector<256x128xf32>
    %28 = arith.addf %21, %27 : vector<256x128xf32>
    %c0_28 = arith.constant 0 : index
    %c1_29 = arith.constant 1 : index
    %c1_30 = arith.constant 1 : index
    %c0_31 = arith.constant 0 : index
    %29 = vector.load %arg1[%c0_28, %c1_29, %c1_30, %c0_31] : memref<1x18x18x4xbf16, #tpu.memory_space<vmem>>, vector<1x16x16x4xbf16>
    %30 = vector.shape_cast %29 : vector<1x16x16x4xbf16> to vector<16x16x4xbf16>
    %31 = vector.shape_cast %30 : vector<16x16x4xbf16> to vector<256x4xbf16>
    %c4 = arith.constant 4 : index
    %c0_32 = arith.constant 0 : index
    %c0_33 = arith.constant 0 : index
    %32 = vector.load %arg2[%c4, %c0_32, %c0_33] : memref<9x4x128xbf16, #tpu.memory_space<vmem>>, vector<1x4x128xbf16>
    %33 = vector.shape_cast %32 : vector<1x4x128xbf16> to vector<4x128xbf16>
    %cst_34 = arith.constant dense<0.000000e+00> : vector<256x128xf32>
    %34 = tpu.matmul %31, %33, %cst_34 {dimension_numbers = #tpu.dot_dimension_numbers<[1], [0], [0], [1], [0, 0, 1, 1], [], []>} : vector<256x4xbf16>, vector<4x128xbf16>, vector<256x128xf32> -> vector<256x128xf32>
    %35 = arith.addf %28, %34 : vector<256x128xf32>
    %c0_35 = arith.constant 0 : index
    %c1_36 = arith.constant 1 : index
    %c2_37 = arith.constant 2 : index
    %c0_38 = arith.constant 0 : index
    %36 = vector.load %arg1[%c0_35, %c1_36, %c2_37, %c0_38] : memref<1x18x18x4xbf16, #tpu.memory_space<vmem>>, vector<1x16x16x4xbf16>
    %37 = vector.shape_cast %36 : vector<1x16x16x4xbf16> to vector<16x16x4xbf16>
    %38 = vector.shape_cast %37 : vector<16x16x4xbf16> to vector<256x4xbf16>
    %c5 = arith.constant 5 : index
    %c0_39 = arith.constant 0 : index
    %c0_40 = arith.constant 0 : index
    %39 = vector.load %arg2[%c5, %c0_39, %c0_40] : memref<9x4x128xbf16, #tpu.memory_space<vmem>>, vector<1x4x128xbf16>
    %40 = vector.shape_cast %39 : vector<1x4x128xbf16> to vector<4x128xbf16>
    %cst_41 = arith.constant dense<0.000000e+00> : vector<256x128xf32>
    %41 = tpu.matmul %38, %40, %cst_41 {dimension_numbers = #tpu.dot_dimension_numbers<[1], [0], [0], [1], [0, 0, 1, 1], [], []>} : vector<256x4xbf16>, vector<4x128xbf16>, vector<256x128xf32> -> vector<256x128xf32>
    %42 = arith.addf %35, %41 : vector<256x128xf32>
    %c0_42 = arith.constant 0 : index
    %c2_43 = arith.constant 2 : index
    %c0_44 = arith.constant 0 : index
    %c0_45 = arith.constant 0 : index
    %43 = vector.load %arg1[%c0_42, %c2_43, %c0_44, %c0_45] : memref<1x18x18x4xbf16, #tpu.memory_space<vmem>>, vector<1x16x16x4xbf16>
    %44 = vector.shape_cast %43 : vector<1x16x16x4xbf16> to vector<16x16x4xbf16>
    %45 = vector.shape_cast %44 : vector<16x16x4xbf16> to vector<256x4xbf16>
    %c6 = arith.constant 6 : index
    %c0_46 = arith.constant 0 : index
    %c0_47 = arith.constant 0 : index
    %46 = vector.load %arg2[%c6, %c0_46, %c0_47] : memref<9x4x128xbf16, #tpu.memory_space<vmem>>, vector<1x4x128xbf16>
    %47 = vector.shape_cast %46 : vector<1x4x128xbf16> to vector<4x128xbf16>
    %cst_48 = arith.constant dense<0.000000e+00> : vector<256x128xf32>
    %48 = tpu.matmul %45, %47, %cst_48 {dimension_numbers = #tpu.dot_dimension_numbers<[1], [0], [0], [1], [0, 0, 1, 1], [], []>} : vector<256x4xbf16>, vector<4x128xbf16>, vector<256x128xf32> -> vector<256x128xf32>
    %49 = arith.addf %42, %48 : vector<256x128xf32>
    %c0_49 = arith.constant 0 : index
    %c2_50 = arith.constant 2 : index
    %c1_51 = arith.constant 1 : index
    %c0_52 = arith.constant 0 : index
    %50 = vector.load %arg1[%c0_49, %c2_50, %c1_51, %c0_52] : memref<1x18x18x4xbf16, #tpu.memory_space<vmem>>, vector<1x16x16x4xbf16>
    %51 = vector.shape_cast %50 : vector<1x16x16x4xbf16> to vector<16x16x4xbf16>
    %52 = vector.shape_cast %51 : vector<16x16x4xbf16> to vector<256x4xbf16>
    %c7 = arith.constant 7 : index
    %c0_53 = arith.constant 0 : index
    %c0_54 = arith.constant 0 : index
    %53 = vector.load %arg2[%c7, %c0_53, %c0_54] : memref<9x4x128xbf16, #tpu.memory_space<vmem>>, vector<1x4x128xbf16>
    %54 = vector.shape_cast %53 : vector<1x4x128xbf16> to vector<4x128xbf16>
    %cst_55 = arith.constant dense<0.000000e+00> : vector<256x128xf32>
    %55 = tpu.matmul %52, %54, %cst_55 {dimension_numbers = #tpu.dot_dimension_numbers<[1], [0], [0], [1], [0, 0, 1, 1], [], []>} : vector<256x4xbf16>, vector<4x128xbf16>, vector<256x128xf32> -> vector<256x128xf32>
    %56 = arith.addf %49, %55 : vector<256x128xf32>
    %c0_56 = arith.constant 0 : index
    %c2_57 = arith.constant 2 : index
    %c2_58 = arith.constant 2 : index
    %c0_59 = arith.constant 0 : index
    %57 = vector.load %arg1[%c0_56, %c2_57, %c2_58, %c0_59] : memref<1x18x18x4xbf16, #tpu.memory_space<vmem>>, vector<1x16x16x4xbf16>
    %58 = vector.shape_cast %57 : vector<1x16x16x4xbf16> to vector<16x16x4xbf16>
    %59 = vector.shape_cast %58 : vector<16x16x4xbf16> to vector<256x4xbf16>
    %c8 = arith.constant 8 : index
    %c0_60 = arith.constant 0 : index
    %c0_61 = arith.constant 0 : index
    %60 = vector.load %arg2[%c8, %c0_60, %c0_61] : memref<9x4x128xbf16, #tpu.memory_space<vmem>>, vector<1x4x128xbf16>
    %61 = vector.shape_cast %60 : vector<1x4x128xbf16> to vector<4x128xbf16>
    %cst_62 = arith.constant dense<0.000000e+00> : vector<256x128xf32>
    %62 = tpu.matmul %59, %61, %cst_62 {dimension_numbers = #tpu.dot_dimension_numbers<[1], [0], [0], [1], [0, 0, 1, 1], [], []>} : vector<256x4xbf16>, vector<4x128xbf16>, vector<256x128xf32> -> vector<256x128xf32>
    %63 = arith.addf %56, %62 : vector<256x128xf32>
    %cst_63 = arith.constant dense<0.000000e+00> : vector<128xf32>
    %64 = vector.multi_reduction <add>, %63, %cst_63 [0] : vector<256x128xf32> to vector<128xf32>
    %65 = vector.shape_cast %64 : vector<128xf32> to vector<1x128xf32>
    %cst_64 = arith.constant 3.906250e-03 : f32
    %66 = vector.broadcast %cst_64 : f32 to vector<1x128xf32>
    %67 = arith.mulf %65, %66 : vector<1x128xf32>
    %68 = vector.broadcast %67 : vector<1x128xf32> to vector<256x128xf32>
    %69 = arith.subf %63, %68 : vector<256x128xf32>
    %70 = arith.mulf %69, %69 : vector<256x128xf32>
    %cst_65 = arith.constant dense<0.000000e+00> : vector<128xf32>
    %71 = vector.multi_reduction <add>, %70, %cst_65 [0] : vector<256x128xf32> to vector<128xf32>
    %72 = vector.shape_cast %71 : vector<128xf32> to vector<1x128xf32>
    %c0_66 = arith.constant 0 : index
    %c0_67 = arith.constant 0 : index
    %c0_68 = arith.constant 0 : index
    %73 = vector.load %arg4[%c0_66, %c0_67, %c0_68] : memref<1x2x128xf32, #tpu.memory_space<vmem>>, vector<1x1x128xf32>
    %74 = vector.shape_cast %73 : vector<1x1x128xf32> to vector<1x128xf32>
    %75 = vector.shape_cast %65 : vector<1x128xf32> to vector<1x1x128xf32>
    tpu.vector_store %arg4[%c0_66, %c0_67, %c0_68], %75 {strides = array<i32>} : memref<1x2x128xf32, #tpu.memory_space<vmem>>, vector<1x1x128xf32>,
    %c0_69 = arith.constant 0 : index
    %c1_70 = arith.constant 1 : index
    %c0_71 = arith.constant 0 : index
    %76 = vector.load %arg4[%c0_69, %c1_70, %c0_71] : memref<1x2x128xf32, #tpu.memory_space<vmem>>, vector<1x1x128xf32>
    %77 = vector.shape_cast %76 : vector<1x1x128xf32> to vector<1x128xf32>
    %78 = vector.shape_cast %72 : vector<1x128xf32> to vector<1x1x128xf32>
    tpu.vector_store %arg4[%c0_69, %c1_70, %c0_71], %78 {strides = array<i32>} : memref<1x2x128xf32, #tpu.memory_space<vmem>>, vector<1x1x128xf32>,
    %79 = tpu.transpose %63, [1, 0] : vector<256x128xf32> -> vector<128x256xf32>
    %80 = vector.extract_strided_slice %79 {offsets = [0, 0], sizes = [8, 256], strides = [1, 1]} : vector<128x256xf32> to vector<8x256xf32>
    %81 = arith.truncf %80 : vector<8x256xf32> to vector<8x256xbf16>
    %c0_72 = arith.constant 0 : index
    %c0_73 = arith.constant 0 : index
    %c0_74 = arith.constant 0 : index
    %82 = vector.load %arg3[%c0_72, %c0_73, %c0_74] : memref<1x8x256xbf16, #tpu.memory_space<vmem>>, vector<1x8x256xbf16>
    %83 = vector.shape_cast %82 : vector<1x8x256xbf16> to vector<8x256xbf16>
    %84 = vector.shape_cast %81 : vector<8x256xbf16> to vector<1x8x256xbf16>
    tpu.vector_store %arg3[%c0_72, %c0_73, %c0_74], %84 {strides = array<i32>} : memref<1x8x256xbf16, #tpu.memory_space<vmem>>, vector<1x8x256xbf16>,
    return
  }
  func.func @transform_0(%arg0: i32) -> (i32, i32, i32, i32) {
    %c0_i32 = arith.constant 0 : i32
    %c0_i32_0 = arith.constant 0 : i32
    %c0_i32_1 = arith.constant 0 : i32
    %c0_i32_2 = arith.constant 0 : i32
    return %arg0, %c0_i32, %c0_i32_0, %c0_i32_1 : i32, i32, i32, i32
  }
  func.func @transform_1(%arg0: i32) -> (i32, i32, i32) {
    %c0_i32 = arith.constant 0 : i32
    %c0_i32_0 = arith.constant 0 : i32
    %c0_i32_1 = arith.constant 0 : i32
    %c0_i32_2 = arith.constant 0 : i32
    return %c0_i32, %c0_i32_0, %c0_i32_1 : i32, i32, i32
  }
  func.func @transform_2(%arg0: i32) -> (i32, i32, i32) {
    %c0_i32 = arith.constant 0 : i32
    %c0_i32_0 = arith.constant 0 : i32
    %c0_i32_1 = arith.constant 0 : i32
    return %arg0, %c0_i32, %c0_i32_0 : i32, i32, i32
  }
  func.func @transform_3(%arg0: i32) -> (i32, i32, i32) {
    %c0_i32 = arith.constant 0 : i32
    %c0_i32_0 = arith.constant 0 : i32
    %c0_i32_1 = arith.constant 0 : i32
    return %arg0, %c0_i32, %c0_i32_0 : i32, i32, i32
  }
}

module attributes {stable_mosaic.version = 11 : i64} {
  func.func @_bn_relu_kernel(%arg0: i32, %arg1: memref<1x8x256xbf16, #tpu.memory_space<vmem>>, %arg2: memref<8x2xf32, #tpu.memory_space<vmem>>, %arg3: memref<1x8x256xf32, #tpu.memory_space<vmem>>) attributes {dimension_semantics = [#tpu.dimension_semantics<parallel>], iteration_bounds = array<i64: 2>, scalar_prefetch = 0 : i64, scratch_operands = 0 : i64, tpu.core_type = #tpu.core_type<tc>, window_params = [{transform_indices = @transform_0, window_bounds = array<i64: 1, 8, 256>}, {pipeline_mode = #tpu.pipeline_mode<synchronous>, transform_indices = @transform_1, window_bounds = array<i64: 8, 2>}, {transform_indices = @transform_2, window_bounds = array<i64: 1, 8, 256>}]} {
    %c0 = arith.constant 0 : index
    %c0_0 = arith.constant 0 : index
    %c0_1 = arith.constant 0 : index
    %0 = vector.load %arg1[%c0, %c0_0, %c0_1] : memref<1x8x256xbf16, #tpu.memory_space<vmem>>, vector<1x8x256xbf16>
    %1 = vector.shape_cast %0 : vector<1x8x256xbf16> to vector<8x256xbf16>
    %2 = arith.extf %1 : vector<8x256xbf16> to vector<8x256xf32>
    %c0_2 = arith.constant 0 : index
    %c0_3 = arith.constant 0 : index
    %3 = vector.load %arg2[%c0_2, %c0_3] : memref<8x2xf32, #tpu.memory_space<vmem>>, vector<8x1xf32>
    %4 = vector.broadcast %3 : vector<8x1xf32> to vector<8x256xf32>
    %5 = arith.mulf %2, %4 : vector<8x256xf32>
    %c0_4 = arith.constant 0 : index
    %c1 = arith.constant 1 : index
    %6 = vector.load %arg2[%c0_4, %c1] : memref<8x2xf32, #tpu.memory_space<vmem>>, vector<8x1xf32>
    %7 = vector.broadcast %6 : vector<8x1xf32> to vector<8x256xf32>
    %8 = arith.addf %5, %7 : vector<8x256xf32>
    %cst = arith.constant 0.000000e+00 : f32
    %9 = vector.broadcast %cst : f32 to vector<8x256xf32>
    %10 = arith.maximumf %8, %9 : vector<8x256xf32>
    %c0_5 = arith.constant 0 : index
    %c0_6 = arith.constant 0 : index
    %c0_7 = arith.constant 0 : index
    %11 = vector.load %arg3[%c0_5, %c0_6, %c0_7] : memref<1x8x256xf32, #tpu.memory_space<vmem>>, vector<1x8x256xf32>
    %12 = vector.shape_cast %11 : vector<1x8x256xf32> to vector<8x256xf32>
    %13 = vector.shape_cast %10 : vector<8x256xf32> to vector<1x8x256xf32>
    tpu.vector_store %arg3[%c0_5, %c0_6, %c0_7], %13 {strides = array<i32>} : memref<1x8x256xf32, #tpu.memory_space<vmem>>, vector<1x8x256xf32>,
    return
  }
  func.func @transform_0(%arg0: i32) -> (i32, i32, i32) {
    %c0_i32 = arith.constant 0 : i32
    %c0_i32_0 = arith.constant 0 : i32
    %c0_i32_1 = arith.constant 0 : i32
    return %arg0, %c0_i32, %c0_i32_0 : i32, i32, i32
  }
  func.func @transform_1(%arg0: i32) -> (i32, i32) {
    %c0_i32 = arith.constant 0 : i32
    %c0_i32_0 = arith.constant 0 : i32
    %c0_i32_1 = arith.constant 0 : i32
    return %c0_i32, %c0_i32_0 : i32, i32
  }
  func.func @transform_2(%arg0: i32) -> (i32, i32, i32) {
    %c0_i32 = arith.constant 0 : i32
    %c0_i32_0 = arith.constant 0 : i32
    %c0_i32_1 = arith.constant 0 : i32
    return %arg0, %c0_i32, %c0_i32_0 : i32, i32, i32
  }
}

</mosaic_0001>

<bundles_post_ra>
// kernel: dummy_resnet_layer.3
= control target key start
LH: loop header
LB: loop body
LE: loop exit
PB: predicated region body
PF: predicated region fallthrough
CT: control target
= control target key end

     0   :  { %s270_s9 = smov 0   ;;  %s290_s0 = inlined_call_operand.vmem [shape: bf16[2,8,256], index: 0, kind: input, shape index: {}]   ;;  %s291_s1 = inlined_call_operand.vmem [shape: f32[8,2], index: 1, kind: input, shape index: {}]   ;;  %s292_s2 = inlined_call_operand.vmem [shape: f32[2,8,256], index: 2, kind: output, shape index: {}]  }
   0x1 LB: > { %s220_s10 = sadd.s32 4294967295, %s251_s9   ;;  %p224_p0 = scmp.ge.s32.totalorder %s251_s9, 1  ;;  %s251_s9 = sphi %s270_s9, %s12_s9  }
   0x2   : > { %p112_p1 = scmp.lt.s32.totalorder %s251_s9, 3 }
   0x4   : > { %p113_p2 = pnand %p224_p0, %p112_p1 }
   0x5   : > { %v147_v0 = vld [vmem:[%s291_s1] sm:$0xff] (!%p113_p2)  ;;  %v253_v1 = vmov (!%p113_p2), 0   ;;  %v254_v2 = vmov (!%p113_p2), 1   ;;  %p134_p3 = scmp.lt.s32.totalorder (!%p113_p2), %s220_s10, 1 }
   0x6   : > { %116 = sbr.rel (%p113_p2) target bundleno = 145 (0x91), region = 28  ;;  %243 = vset.pattern.permute.xlu0 (!%p113_p2), %v253_v1 }
   0x7   : > { %150 = vperm.xlu0 (!%p113_p2), %243, %v147_v0  }
   0xb   : > { %244 = vset.pattern.permute.xlu0 (!%p113_p2), %v254_v2 }
   0xc   : > { %156 = vperm.xlu0 (!%p113_p2), %244, %v147_v0  }
   0xd   : > { %s294_s10 = smov (!%p134_p3, %s220_s10), 1 }
   0xe   : > { %s231_s13 = sshll.u32 %s294_s10, 3  ;;  %s232_s17 = sshll.u32 %s294_s10, 4 }
   0xf   : > { %s138_s16 = scalar_lea.vmem %s290_s0, %s231_s13  ;;  %s143_s20 = scalar_lea.vmem %s292_s2, %s232_s17 }
  0x10   : > { %v144_v3 = vld [vmem:[%s138_s16] sm:$0xff] }
  0x11   : > { %v145_v5 = vunpack.c.l.bf16 %v144_v3  ;;  %v146_v6 = vunpack.c.h.bf16 %v144_v3 }
  0x86   : > { %v151_v4 = vpop.permute.xlu0 %150 }
  0x87   : > { %v153_v7 = vmul.f32 %v151_v4, %v145_v5  ;;  %v154_v8 = vmul.f32 %v151_v4, %v146_v6 }
  0x8b   : > { %v157_v9 = vpop.permute.xlu0 %156 }
  0x8c   : > { %v159_v10 = vadd.f32 %v157_v9, %v153_v7  ;;  %v160_v11 = vadd.f32 %v157_v9, %v154_v8 }
  0x8e   : > { %v161_v12 = vmax.f32 %v159_v10, 0.0  ;;  %v162_v13 = vmax.f32 %v160_v11, 0.0 }
  0x90   : > { %163 = vst [vmem:[%s143_s20] sm:$0xff] %v161_v12  ;;  %164 = vst [vmem:[%s143_s20 + $0x8] sm:$0xff] %v162_v13 }
  0x91 PF: > { %s12_s9 = sadd.s32 1, %s251_s9  }
  0x92   : > { %p9_p4 = scmp.ge.s32.totalorder %s12_s9, 4  }
  0x94   :  { %11 = sbr.rel (!%p9_p4) target bundleno = 1 (0x1), region = 58 }

// kernel: dummy_resnet_layer.2
= control target key start
LH: loop header
LB: loop body
LE: loop exit
PB: predicated region body
PF: predicated region fallthrough
CT: control target
= control target key end

     0   :  { %s6498_s12 = smov 0   ;;  %s8418_s0 = inlined_call_operand.vmem [shape: bf16[2,18,18,4], index: 0, kind: input, shape index: {}]   ;;  %s8419_s1 = inlined_call_operand.vmem [shape: bf16[9,4,128], index: 1, kind: input, shape index: {}]   ;;  %s8420_s2 = inlined_call_operand.vmem [shape: bf16[2,8,256], index: 2, kind: output, shape index: {0}]   ;;  %s8421_s3 = inlined_call_operand.vmem [shape: f32[2,2,128], index: 3, kind: output, shape index: {1}]  }
   0x1 LB: > { %s5042_s13 = sadd.s32 4294967295, %s6476_s12   ;;  %p5046_p0 = scmp.ge.s32.totalorder %s6476_s12, 1  ;;  %s6476_s12 = sphi %s6498_s12, %s14_s12  }
   0x2   : > { %p140_p1 = scmp.lt.s32.totalorder %s6476_s12, 3 }
   0x4   : > { %p141_p2 = pnand %p5046_p0, %p140_p1 }
   0x6   : > { %144 = sbr.rel (%p141_p2) target bundleno = 692 (0x2b4), region = 28 }
   0xd   : > { %v5051_v0 = vld [vmem:[%s8419_s1 + $0x2] sm:$0x3]  ;;  %vm718_vm0 = vcmask 1041408   ;;  %v5278_v1 = vld [vmem:[%s8419_s1 + $0x8] sm:$0x3]  ;;  %p168_p3 = scmp.lt.s32.totalorder %s5042_s13, 1 }
   0xe   : > { %6309 = vmatprep.subr.msk.bf16.mxu1 %vm718_vm0, %v5051_v0  ;;  %6313 = vmatprep.subr.msk.bf16.mxu0 %vm718_vm0, %v5278_v1  ;;  %v720_v2 = vsel %vm718_vm0, %v5051_v0, 0  ;;  %v6516_v3 = vsel %vm718_vm0, %v5278_v1, 0  ;;  %v215_v4 = vld [vmem:[%s8419_s1] sm:$0x3]  ;;  %v5343_v5 = vld [vmem:[%s8419_s1 + $0xa] sm:$0x3] }
   0xf   : > { %8435 = vst [vmem:[#allocation2_spill] sm:$0xff] %v6516_v3  ;;  %5746 = vmatpush3.bf16.msra.mxu1 %v720_v2  ;;  %5882 = vmatpush3.bf16.msra.mxu0 %v6516_v3  ;;  %s8490_s13 = smov (!%p168_p3, %s5042_s13), 1  ;;  %vm232_vm1 = vsmask.f32 3328  ;;  %vm233_vm2 = vsmask.f32 7440 }
  0x10   : > { %6310 = vmatprep.subr.msk.bf16.mxu1 %vm718_vm0, %v215_v4  ;;  %6315 = vmatprep.subr.msk.bf16.mxu0 %vm718_vm0, %v5343_v5  ;;  %s6319_s22 = smul.u32 216, %s8490_s13  ;;  %vm669_vm3 = vcmask 31744   ;;  %v6546_v17 = vsel %vm718_vm0, %v215_v4, 0  ;;  %v6552_v26 = vld [vmem:[%s8419_s1 + $0xc] sm:$0x3]  ;;  %vm6559_vm4 = vmor %vm232_vm1, %vm233_vm2  ;;  %v6565_v37 = vsel %vm718_vm0, %v5343_v5, 0 }
  0x11   : > { %v6569_v41 = vsel %vm718_vm0, %v6552_v26, 0  ;;  %vm1223_vm5 = vcmask 1042432   ;;  %vm1224_vm6 = vcmask 1046532   ;;  %s5050_s15 = sshll.u32 %s8490_s13, 1  ;;  %s5590_s19 = sshll.u32 %s8490_s13, 3 }
  0x12   : > { %s6533_s25 = scalar_lea.vmem %s8418_s0, %s6319_s22  ;;  %vm6785_vm7 = vmor %vm1223_vm5, %vm1224_vm6  ;;  %s8333_s18 = scalar_lea.vmem %s8421_s3, %s5050_s15 }
  0x13   : > { %v183_v6 = vld [vmem:[%s6533_s25] sm:$0xf]  ;;  %v184_v7 = vld [vmem:[%s6533_s25 + $0x4] sm:$0xf]  ;;  %v216_v8 = vld [vmem:[%s6533_s25 + $0x8] sm:$0x1]  ;;  %s177_s22 = scalar_lea.vmem %s8420_s2, %s5590_s19 }
  0x14   : > { %v236_v9 = vshrl.u32 %v183_v6, 16  ;;  %v239_v10 = vshll.u32 %v183_v6, 16  ;;  %v245_v11 = vshll.u32 %v184_v7, 16  ;;  %v249_v12 = vshrl.u32 %v184_v7, 16  ;;  %v5230_v13 = vld [vmem:[%s6533_s25 + $0xc] sm:$0xf] }
  0x15   : > { %v255_v14 = vshll.u32 %v216_v8, 16  ;;  %v6540_v15 = vld [vmem:[%s6533_s25 + $0x10] sm:$0xf]  ;;  %v6543_v16 = vld [vmem:[%s6533_s25 + $0x14] sm:$0x1]  ;;  %v2040_v23 = vshrl.u32 %v5230_v13, 16 }
  0x16   : > { %v238_v18 = vrot.slane %v236_v9, 4  ;;  %v241_v19 = vrot.slane %v239_v10, 5  ;;  %v247_v20 = vrot.slane %v245_v11, 5  ;;  %v251_v21 = vrot.slane %v249_v12, 4  ;;  %v185_v31 = vld [vmem:[%s6533_s25 + $0xc] sm:$0xf] }
  0x17   : > { %v257_v22 = vrot.slane %v255_v14, 5  ;;  %v2043_v24 = vshll.u32 %v5230_v13, 16  ;;  %v2049_v25 = vshll.u32 %v6540_v15, 16  ;;  %v2053_v29 = vshrl.u32 %v6540_v15, 16  ;;  %v186_v36 = vld [vmem:[%s6533_s25 + $0x10] sm:$0xf] }
  0x18   : > { %v242_v27 = vor.u32 %v241_v19, %v238_v18  ;;  %v252_v28 = vor.u32 %v251_v21, %v247_v20  ;;  %v2059_v30 = vshll.u32 %v6543_v16, 16  ;;  %v2042_v33 = vrot.slane %v2040_v23, 4  ;;  %v217_v44 = vld [vmem:[%s6533_s25 + $0x14] sm:$0x1]  ;;  %v5233_v55 = vld [vmem:[%s6533_s25 + $0x18] sm:$0xf] }
  0x19   : > { %v2045_v34 = vrot.slane %v2043_v24, 5  ;;  %v2051_v35 = vrot.slane %v2049_v25, 5  ;;  %v2055_v40 = vrot.slane %v2053_v29, 4  ;;  %v260_v45 = vshrl.u32 %v185_v31, 16  ;;  %v6578_v60 = vld [vmem:[%s6533_s25 + $0x1c] sm:$0xf] }
  0x1a   : > { %v243_v38 = vrot.slane %v242_v27, 4  ;;  %v253_v39 = vrot.slane %v252_v28, 4  ;;  %v2061_v43 = vrot.slane %v2059_v30, 5  ;;  %v263_v46 = vshll.u32 %v185_v31, 16  ;;  %v6586_v1 = vld [vmem:[%s6533_s25 + $0x20] sm:$0x1] }
  0x1b   : > { %v2046_v42 = vor.u32 %v2045_v34, %v2042_v33  ;;  %v2056_v49 = vor.u32 %v2055_v40, %v2051_v35  ;;  %v269_v50 = vshll.u32 %v186_v36, 16  ;;  %v262_v53 = vrot.slane %v260_v45, 4  ;;  %v187_v18 = vld [vmem:[%s6533_s25 + $0x18] sm:$0xf]  ;;  %v188_v23 = vld [vmem:[%s6533_s25 + $0x1c] sm:$0xf] }
  0x1c   : > { %v248_v47 = vsel %vm6559_vm4, %v243_v38, %v247_v20  ;;  %v258_v48 = vsel %vm6559_vm4, %v253_v39, %v257_v22  ;;  %v265_v54 = vrot.slane %v263_v46, 5  ;;  %v273_v58 = vshrl.u32 %v186_v36, 16  ;;  %v218_v31 = vld [vmem:[%s6533_s25 + $0x20] sm:$0x1]  ;;  %v5236_v40 = vld [vmem:[%s6533_s25 + $0x24] sm:$0xf] }
  0x1d   : > { %v5052_v51 = vcombine.low %v248_v47, %v258_v48  ;;  %v2047_v52 = vrot.slane %v2046_v42, 4  ;;  %v2057_v56 = vrot.slane %v2056_v49, 4  ;;  %v271_v57 = vrot.slane %v269_v50, 5  ;;  %v6609_v46 = vld [vmem:[%s6533_s25 + $0x28] sm:$0xf] }
  0x1e   : > { %v279_v59 = vshll.u32 %v217_v44, 16  ;;  %v2783_v62 = vrot.slane %v6540_v15, 5  ;;  %v2786_v63 = vrot.slane %v6543_v16, 5  ;;  %v266_v0 = vor.u32 %v265_v54, %v262_v53  ;;  %v6618_v54 = vld [vmem:[%s6533_s25 + $0x2c] sm:$0x1] }
  0x1f   : > { %5747 = vmatprep.mubr.msk.bf16.mxu1 %vm669_vm3, %v5052_v51  ;;  %v2052_v61 = vsel %vm6559_vm4, %v2047_v52, %v2051_v35  ;;  %v2062_v2 = vsel %vm6559_vm4, %v2057_v56, %v2061_v43  ;;  %v275_v4 = vrot.slane %v273_v58, 4  ;;  %v2064_v6 = vshrl.u32 %v5233_v55, 16  ;;  %v5132_v51 = vld [vmem:[%s8419_s1 + $0x4] sm:$0x3]  ;;  %v6818_v16 = vld [vmem:[%s6533_s25 + $0x7c] sm:$0xf] }
  0x20   : > { %v281_v5 = vrot.slane %v279_v59, 5  ;;  %v5279_v7 = vcombine.low %v2052_v61, %v2062_v2  ;;  %v267_v8 = vrot.slane %v266_v0, 4  ;;  %v2067_v9 = vshll.u32 %v5233_v55, 16  ;;  %v189_v0 = vld [vmem:[%s6533_s25 + $0x24] sm:$0xf] }
  0x21   : > { %v2073_v10 = vshll.u32 %v6578_v60, 16  ;;  %v276_v11 = vor.u32 %v275_v4, %v271_v57  ;;  %v2066_v12 = vrot.slane %v2064_v6, 4  ;;  %v2077_v13 = vshrl.u32 %v6578_v60, 16 }
  0x22   : > { %v2083_v14 = vshll.u32 %v6586_v1, 16  ;;  %5883 = vmatprep.mubr.msk.bf16.mxu0 %vm669_vm3, %v5279_v7  ;;  %v272_v19 = vsel %vm6559_vm4, %v267_v8, %v271_v57  ;;  %v2069_v20 = vrot.slane %v2067_v9, 5  ;;  %v2790_v22 = vrot.slane %v6578_v60, 5  ;;  %v190_v7 = vld [vmem:[%s6533_s25 + $0x28] sm:$0xf] }
  0x23   : > { %v2075_v21 = vrot.slane %v2073_v10, 5  ;;  %v277_v24 = vrot.slane %v276_v11, 4  ;;  %v2079_v25 = vrot.slane %v2077_v13, 4  ;;  %v2793_v28 = vrot.slane %v6586_v1, 5  ;;  %v219_v13 = vld [vmem:[%s6533_s25 + $0x2c] sm:$0x1] }
  0x24   : > { %v2085_v27 = vrot.slane %v2083_v14, 5  ;;  %v2070_v29 = vor.u32 %v2069_v20, %v2066_v12  ;;  %v6602_v30 = vrot.slane %v2790_v22, 4  ;;  %v284_v33 = vshrl.u32 %v187_v18, 16 }
  0x25   : > { %v287_v34 = vshll.u32 %v187_v18, 16  ;;  %v282_v35 = vsel %vm6559_vm4, %v277_v24, %v281_v5  ;;  %v2080_v36 = vor.u32 %v2079_v25, %v2075_v21  ;;  %v293_v38 = vshll.u32 %v188_v23, 16  ;;  %v5239_v24 = vld [vmem:[%s6533_s25 + $0x30] sm:$0xf] }
  0x26   : > { %v297_v39 = vshrl.u32 %v188_v23, 16  ;;  %v5053_v42 = vcombine.low %v272_v19, %v282_v35  ;;  %v2071_v43 = vrot.slane %v2070_v29, 4  ;;  %v286_v44 = vrot.slane %v284_v33, 4  ;;  %v6638_v33 = vld [vmem:[%s6533_s25 + $0x34] sm:$0xf] }
  0x27   : > { %v289_v45 = vrot.slane %v287_v34, 5  ;;  %v2081_v47 = vrot.slane %v2080_v36, 4  ;;  %v295_v48 = vrot.slane %v293_v38, 5  ;;  %v303_v50 = vshll.u32 %v218_v31, 16 }
  0x28   : > { %v299_v49 = vrot.slane %v297_v39, 4  ;;  %5748 = vmatmul.mubr.msk.bf16.vlgmr.msra.gmra.mrb[0].mxu1 %vm669_vm3, %v5053_v42  ;;  %v2076_v52 = vsel %vm6559_vm4, %v2071_v43, %v2075_v21  ;;  %v2088_v55 = vshrl.u32 %v5236_v40, 16  ;;  %v2091_v56 = vshll.u32 %v5236_v40, 16  ;;  %v6646_v40 = vld [vmem:[%s6533_s25 + $0x38] sm:$0x1] }
  0x29   : > { %v290_v53 = vor.u32 %v289_v45, %v286_v44  ;;  %5780 = vmatpush3.bf16.msra.mxu1 %v6546_v17  ;;  %v2086_v57 = vsel %vm6559_vm4, %v2081_v47, %v2085_v27  ;;  %v305_v59 = vrot.slane %v303_v50, 5  ;;  %v2097_v61 = vshll.u32 %v6609_v46, 16 }
  0x2a   : > { %v300_v58 = vor.u32 %v299_v49, %v295_v48  ;;  %v5280_v2 = vcombine.low %v2076_v52, %v2086_v57  ;;  %v2090_v5 = vrot.slane %v2088_v55, 4  ;;  %v2093_v6 = vrot.slane %v2091_v56, 5  ;;  %6311 = vmatprep.subr.msk.bf16.mxu1 %vm718_vm0, %v5132_v51  ;;  %v191_v52 = vld [vmem:[%s6533_s25 + $0x30] sm:$0xf] }
  0x2b   : > { %v291_v4 = vrot.slane %v290_v53, 4  ;;  %v2099_v9 = vrot.slane %v2097_v61, 5  ;;  %v2101_v17 = vshrl.u32 %v6609_v46, 16  ;;  %v2107_v10 = vshll.u32 %v6618_v54, 16 }
  0x2c   : > { %v301_v8 = vrot.slane %v300_v58, 4  ;;  %5884 = vmatmul.mubr.msk.bf16.vlgmr.msra.gmra.mrb[0].mxu0 %vm669_vm3, %v5280_v2  ;;  %v2094_v12 = vor.u32 %v2093_v6, %v2090_v5  ;;  %v308_v14 = vshrl.u32 %v189_v0, 16  ;;  %v311_v18 = vshll.u32 %v189_v0, 16  ;;  %v192_v58 = vld [vmem:[%s6533_s25 + $0x34] sm:$0xf] }
  0x2d   : > { %v296_v11 = vsel %vm6559_vm4, %v291_v4, %v295_v48  ;;  %5916 = vmatpush3.bf16.msra.mxu0 %v6565_v37  ;;  %v2103_v20 = vrot.slane %v2101_v17, 4  ;;  %v2109_v21 = vrot.slane %v2107_v10, 5  ;;  %v317_v23 = vshll.u32 %v190_v7, 16  ;;  %v220_v4 = vld [vmem:[%s6533_s25 + $0x38] sm:$0x1] }
  0x2e   : > { %v306_v19 = vsel %vm6559_vm4, %v301_v8, %v305_v59  ;;  %v2095_v27 = vrot.slane %v2094_v12, 4  ;;  %v310_v29 = vrot.slane %v308_v14, 4  ;;  %v313_v31 = vrot.slane %v311_v18, 5  ;;  %6316 = vmatprep.subr.msk.bf16.mxu0 %vm718_vm0, %v6552_v26  ;;  %v5242_v12 = vld [vmem:[%s6533_s25 + $0x3c] sm:$0xf] }
  0x2f   : > { %v5054_v25 = vcombine.low %v296_v11, %v306_v19  ;;  %v2104_v34 = vor.u32 %v2103_v20, %v2099_v9  ;;  %v319_v35 = vrot.slane %v317_v23, 5  ;;  %v321_v37 = vshrl.u32 %v190_v7, 16  ;;  %v6663_v20 = vld [vmem:[%s6533_s25 + $0x40] sm:$0xf] }
  0x30   : > { %v327_v36 = vshll.u32 %v219_v13, 16  ;;  %v2100_v38 = vsel %vm6559_vm4, %v2095_v27, %v2099_v9  ;;  %v314_v39 = vor.u32 %v313_v31, %v310_v29  ;;  %v2112_v42 = vshrl.u32 %v5239_v24, 16 }
  0x31   : > { %5751 = vmatprep.mubr.msk.bf16.mxu1 %vm669_vm3, %v5054_v25  ;;  %v2115_v43 = vshll.u32 %v5239_v24, 16  ;;  %v2105_v44 = vrot.slane %v2104_v34, 4  ;;  %v323_v45 = vrot.slane %v321_v37, 4  ;;  %v2121_v26 = vshll.u32 %v6638_v33, 16  ;;  %v6668_v34 = vld [vmem:[%s6533_s25 + $0x44] sm:$0x1] }
  0x32   : > { %v329_v47 = vrot.slane %v327_v36, 5  ;;  %v315_v48 = vrot.slane %v314_v39, 4  ;;  %v2114_v49 = vrot.slane %v2112_v42, 4  ;;  %v2125_v51 = vshrl.u32 %v6638_v33, 16  ;;  %v193_v42 = vld [vmem:[%s6533_s25 + $0x3c] sm:$0xf] }
  0x33   : > { %v2117_v50 = vrot.slane %v2115_v43, 5  ;;  %v2110_v53 = vsel %vm6559_vm4, %v2105_v44, %v2109_v21  ;;  %v324_v55 = vor.u32 %v323_v45, %v319_v35  ;;  %v2123_v56 = vrot.slane %v2121_v26, 5  ;;  %v194_v26 = vld [vmem:[%s6533_s25 + $0x40] sm:$0xf] }
  0x34   : > { %v2131_v57 = vshll.u32 %v6646_v40, 16  ;;  %v5281_v59 = vcombine.low %v2100_v38, %v2110_v53  ;;  %v320_v61 = vsel %vm6559_vm4, %v315_v48, %v319_v35  ;;  %v2127_v2 = vrot.slane %v2125_v51, 4 }
  0x35   : > { %v2118_v0 = vor.u32 %v2117_v50, %v2114_v49  ;;  %v325_v5 = vrot.slane %v324_v55, 4  ;;  %v332_v7 = vshrl.u32 %v191_v52, 16  ;;  %v335_v8 = vshll.u32 %v191_v52, 16 }
  0x36   : > { %v2133_v6 = vrot.slane %v2131_v57, 5  ;;  %5887 = vmatprep.mubr.msk.bf16.mxu0 %vm669_vm3, %v5281_v59  ;;  %v2128_v17 = vor.u32 %v2127_v2, %v2123_v56  ;;  %v341_v10 = vshll.u32 %v192_v58, 16  ;;  %v345_v11 = vshrl.u32 %v192_v58, 16  ;;  %v5245_v2 = vld [vmem:[%s6533_s25 + $0x48] sm:$0xf] }
  0x37   : > { %v2119_v9 = vrot.slane %v2118_v0, 4  ;;  %v330_v13 = vsel %vm6559_vm4, %v325_v5, %v329_v47  ;;  %v334_v14 = vrot.slane %v332_v7, 4  ;;  %v337_v18 = vrot.slane %v335_v8, 5  ;;  %v6686_v8 = vld [vmem:[%s6533_s25 + $0x4c] sm:$0xf] }
  0x38   : > { %v351_v19 = vshll.u32 %v220_v4, 16  ;;  %v5055_v21 = vcombine.low %v320_v61, %v330_v13  ;;  %v2129_v24 = vrot.slane %v2128_v17, 4  ;;  %v343_v25 = vrot.slane %v341_v10, 5  ;;  %v221_v61 = vld [vmem:[%s6533_s25 + $0x44] sm:$0x1] }
  0x39   : > { %v2124_v23 = vsel %vm6559_vm4, %v2119_v9, %v2123_v56  ;;  %v338_v27 = vor.u32 %v337_v18, %v334_v14  ;;  %v347_v29 = vrot.slane %v345_v11, 4  ;;  %v2136_v35 = vshrl.u32 %v5242_v12, 16 }
  0x3a   : > { %v353_v31 = vrot.slane %v351_v19, 5  ;;  %5752 = vmatmul.mubr.msk.bf16.gmra.mrb[4].mxu1 %vm669_vm3, %v5055_v21  ;;  %v2134_v37 = vsel %vm6559_vm4, %v2129_v24, %v2133_v6  ;;  %v2139_v36 = vshll.u32 %v5242_v12, 16  ;;  %v2145_v38 = vshll.u32 %v6663_v20, 16 }
  0x3b   : > { %v2149_v39 = vshrl.u32 %v6663_v20, 16  ;;  %v5282_v43 = vcombine.low %v2124_v23, %v2134_v37  ;;  %v339_v44 = vrot.slane %v338_v27, 4  ;;  %v348_v45 = vor.u32 %v347_v29, %v343_v25  ;;  %v6694_v23 = vld [vmem:[%s6533_s25 + $0x50] sm:$0x1]  ;;  %v6698_v27 = vld [vmem:[%s6533_s25 + $0x48] sm:$0xf] }
  0x3c   : > { %v2138_v47 = vrot.slane %v2136_v35, 4  ;;  %v2141_v48 = vrot.slane %v2139_v36, 5  ;;  %v2147_v49 = vrot.slane %v2145_v38, 5  ;;  %v2155_v51 = vshll.u32 %v6668_v34, 16  ;;  %v6701_v36 = vld [vmem:[%s6533_s25 + $0x4c] sm:$0xf] }
  0x3d   : > { %v2151_v50 = vrot.slane %v2149_v39, 4  ;;  %5888 = vmatmul.mubr.msk.bf16.gmra.mrb[4].mxu0 %vm669_vm3, %v5282_v43  ;;  %v344_v52 = vsel %vm6559_vm4, %v339_v44, %v343_v25  ;;  %v349_v53 = vrot.slane %v348_v45, 4  ;;  %v356_v55 = vshrl.u32 %v193_v42, 16 }
  0x3e   : > { %v359_v56 = vshll.u32 %v193_v42, 16  ;;  %v2142_v57 = vor.u32 %v2141_v48, %v2138_v47  ;;  %v2157_v59 = vrot.slane %v2155_v51, 5  ;;  %v365_v0 = vshll.u32 %v194_v26, 16 }
  0x3f   : > { %v2152_v58 = vor.u32 %v2151_v50, %v2147_v49  ;;  %v354_v4 = vsel %vm6559_vm4, %v349_v53, %v353_v31  ;;  %v358_v5 = vrot.slane %v356_v55, 4  ;;  %v369_v7 = vshrl.u32 %v194_v26, 16  ;;  %v222_v26 = vld [vmem:[%s6533_s25 + $0x50] sm:$0x1]  ;;  %v5248_v53 = vld [vmem:[%s6533_s25 + $0x54] sm:$0xf] }
  0x40   : > { %v361_v6 = vrot.slane %v359_v56, 5  ;;  %v5056_v9 = vcombine.low %v344_v52, %v354_v4  ;;  %v2143_v17 = vrot.slane %v2142_v57, 4  ;;  %v367_v11 = vrot.slane %v365_v0, 5  ;;  %v6717_v4 = vld [vmem:[%s6533_s25 + $0x58] sm:$0xf] }
  0x41   : > { %v2153_v10 = vrot.slane %v2152_v58, 4  ;;  %v371_v13 = vrot.slane %v369_v7, 4  ;;  %v375_v14 = vshll.u32 %v221_v61, 16  ;;  %v2160_v18 = vshrl.u32 %v5245_v2, 16 }
  0x42   : > { %v362_v12 = vor.u32 %v361_v6, %v358_v5  ;;  %5755 = vmatprep.mubr.msk.bf16.mxu1 %vm669_vm3, %v5056_v9  ;;  %v2148_v19 = vsel %vm6559_vm4, %v2143_v17, %v2147_v49  ;;  %v2163_v24 = vshll.u32 %v5245_v2, 16  ;;  %v2169_v25 = vshll.u32 %v6686_v8, 16 }
  0x43   : > { %v2158_v21 = vsel %vm6559_vm4, %v2153_v10, %v2157_v59  ;;  %v372_v35 = vor.u32 %v371_v13, %v367_v11  ;;  %v377_v37 = vrot.slane %v375_v14, 5  ;;  %v2162_v38 = vrot.slane %v2160_v18, 4 }
  0x44   : > { %v5283_v29 = vcombine.low %v2148_v19, %v2158_v21  ;;  %v363_v31 = vrot.slane %v362_v12, 4  ;;  %v2165_v39 = vrot.slane %v2163_v24, 5  ;;  %v2171_v42 = vrot.slane %v2169_v25, 5  ;;  %v6723_v12 = vld [vmem:[%s6533_s25 + $0x5c] sm:$0x1] }
  0x45   : > { %v2173_v43 = vshrl.u32 %v6686_v8, 16  ;;  %v373_v45 = vrot.slane %v372_v35, 4  ;;  %v2179_v47 = vshll.u32 %v6694_v23, 16  ;;  %v380_v48 = vshrl.u32 %v6698_v27, 16  ;;  %v6727_v24 = vld [vmem:[%s6533_s25 + $0x54] sm:$0xf] }
  0x46   : > { %5891 = vmatprep.mubr.msk.bf16.mxu0 %vm669_vm3, %v5283_v29  ;;  %v368_v44 = vsel %vm6559_vm4, %v363_v31, %v367_v11  ;;  %v2166_v49 = vor.u32 %v2165_v39, %v2162_v38  ;;  %v383_v51 = vshll.u32 %v6698_v27, 16  ;;  %v389_v52 = vshll.u32 %v6701_v36, 16 }
  0x47   : > { %v2175_v50 = vrot.slane %v2173_v43, 4  ;;  %v378_v55 = vsel %vm6559_vm4, %v373_v45, %v377_v37  ;;  %v2181_v56 = vrot.slane %v2179_v47, 5  ;;  %v382_v57 = vrot.slane %v380_v48, 4  ;;  %v6733_v37 = vld [vmem:[%s6533_s25 + $0x58] sm:$0xf] }
  0x48   : > { %v393_v58 = vshrl.u32 %v6701_v36, 16  ;;  %v5057_v59 = vcombine.low %v368_v44, %v378_v55  ;;  %v2167_v61 = vrot.slane %v2166_v49, 4  ;;  %v385_v2 = vrot.slane %v383_v51, 5 }
  0x49   : > { %v2176_v0 = vor.u32 %v2175_v50, %v2171_v42  ;;  %v391_v5 = vrot.slane %v389_v52, 5  ;;  %v399_v7 = vshll.u32 %v222_v26, 16  ;;  %v2184_v9 = vshrl.u32 %v5248_v53, 16  ;;  %v223_v26 = vld [vmem:[%s6533_s25 + $0x5c] sm:$0x1] }
  0x4a   : > { %v395_v6 = vrot.slane %v393_v58, 4  ;;  %5756 = vmatmul.mubr.msk.bf16.gmra.mrb[8].mxu1 %vm669_vm3, %v5057_v59  ;;  %v2172_v17 = vsel %vm6559_vm4, %v2167_v61, %v2171_v42  ;;  %v386_v11 = vor.u32 %v385_v2, %v382_v57  ;;  %v2187_v13 = vshll.u32 %v5248_v53, 16  ;;  %v5251_v53 = vld [vmem:[%s6533_s25 + $0x60] sm:$0xf]  ;;  %v6747_v59 = vld [vmem:[%s6533_s25 + $0x64] sm:$0xf] }
  0x4b   : > { %v2177_v10 = vrot.slane %v2176_v0, 4  ;;  %v401_v18 = vrot.slane %v399_v7, 5  ;;  %v2186_v19 = vrot.slane %v2184_v9, 4  ;;  %v2193_v21 = vshll.u32 %v6717_v4, 16  ;;  %v6754_v9 = vld [vmem:[%s6533_s25 + $0x68] sm:$0x1] }
  0x4c   : > { %v396_v14 = vor.u32 %v395_v6, %v391_v5  ;;  %v387_v29 = vrot.slane %v386_v11, 4  ;;  %v2189_v31 = vrot.slane %v2187_v13, 5  ;;  %v2197_v35 = vshrl.u32 %v6717_v4, 16 }
  0x4d   : > { %v2182_v25 = vsel %vm6559_vm4, %v2177_v10, %v2181_v56  ;;  %v2195_v42 = vrot.slane %v2193_v21, 5  ;;  %v2203_v43 = vshll.u32 %v6723_v12, 16  ;;  %v404_v48 = vshrl.u32 %v6727_v24, 16 }
  0x4e   : > { %v5284_v38 = vcombine.low %v2172_v17, %v2182_v25  ;;  %v397_v39 = vrot.slane %v396_v14, 4  ;;  %v392_v44 = vsel %vm6559_vm4, %v387_v29, %v391_v5  ;;  %v2190_v45 = vor.u32 %v2189_v31, %v2186_v19  ;;  %v6758_v19 = vld [vmem:[%s6533_s25 + $0x60] sm:$0xf] }
  0x4f   : > { %v2199_v47 = vrot.slane %v2197_v35, 4  ;;  %v2205_v50 = vrot.slane %v2203_v43, 5  ;;  %v407_v51 = vshll.u32 %v6727_v24, 16  ;;  %v413_v52 = vshll.u32 %v6733_v37, 16  ;;  %v6764_v35 = vld [vmem:[%s6533_s25 + $0x64] sm:$0xf] }
  0x50   : > { %5892 = vmatmul.mubr.msk.bf16.gmra.mrb[8].mxu0 %vm669_vm3, %v5284_v38  ;;  %v402_v49 = vsel %vm6559_vm4, %v397_v39, %v401_v18  ;;  %v2191_v56 = vrot.slane %v2190_v45, 4  ;;  %v406_v58 = vrot.slane %v404_v48, 4  ;;  %v417_v2 = vshrl.u32 %v6733_v37, 16 }
  0x51   : > { %v5058_v55 = vcombine.low %v392_v44, %v402_v49  ;;  %v2200_v57 = vor.u32 %v2199_v47, %v2195_v42  ;;  %v409_v61 = vrot.slane %v407_v51, 5  ;;  %v415_v0 = vrot.slane %v413_v52, 5 }
  0x52   : > { %v423_v5 = vshll.u32 %v223_v26, 16  ;;  %v2196_v6 = vsel %vm6559_vm4, %v2191_v56, %v2195_v42  ;;  %v2208_v17 = vshrl.u32 %v5251_v53, 16  ;;  %v2211_v10 = vshll.u32 %v5251_v53, 16 }
  0x53   : > { %5759 = vmatprep.mubr.msk.bf16.mxu1 %vm669_vm3, %v5058_v55  ;;  %v2201_v7 = vrot.slane %v2200_v57, 4  ;;  %v410_v11 = vor.u32 %v409_v61, %v406_v58  ;;  %v419_v13 = vrot.slane %v417_v2, 4  ;;  %v2217_v18 = vshll.u32 %v6747_v59, 16  ;;  %v5311_v58 = vld [vmem:[%s6533_s25 + $0xc] sm:$0xe] }
  0x54   : > { %v425_v14 = vrot.slane %v423_v5, 5  ;;  %v2210_v25 = vrot.slane %v2208_v17, 4  ;;  %v2213_v29 = vrot.slane %v2211_v10, 5  ;;  %v2221_v31 = vshrl.u32 %v6747_v59, 16 }
  0x55   : > { %v2206_v21 = vsel %vm6559_vm4, %v2201_v7, %v2205_v50  ;;  %v411_v39 = vrot.slane %v410_v11, 4  ;;  %v420_v42 = vor.u32 %v419_v13, %v415_v0  ;;  %v2219_v43 = vrot.slane %v2217_v18, 5  ;;  %v224_v50 = vld [vmem:[%s6533_s25 + $0x68] sm:$0x1] }
  0x56   : > { %v5285_v38 = vcombine.low %v2196_v6, %v2206_v21  ;;  %v2214_v44 = vor.u32 %v2213_v29, %v2210_v25  ;;  %v2223_v45 = vrot.slane %v2221_v31, 4  ;;  %v2227_v47 = vshll.u32 %v6754_v9, 16  ;;  %v6792_v29 = vld [vmem:[%s6533_s25 + $0x70] sm:$0xf] }
  0x57   : > { %v428_v26 = vshrl.u32 %v6758_v19, 16  ;;  %v416_v48 = vsel %vm6559_vm4, %v411_v39, %v415_v0  ;;  %v421_v49 = vrot.slane %v420_v42, 4  ;;  %v431_v51 = vshll.u32 %v6758_v19, 16  ;;  %v6779_v0 = vld [vmem:[%s6533_s25 + $0x6c] sm:$0xf] }
  0x58   : > { %5895 = vmatprep.mubr.msk.bf16.mxu0 %vm669_vm3, %v5285_v38  ;;  %v437_v52 = vshll.u32 %v6764_v35, 16  ;;  %v2215_v53 = vrot.slane %v2214_v44, 4  ;;  %v2224_v55 = vor.u32 %v2223_v45, %v2219_v43  ;;  %v2229_v56 = vrot.slane %v2227_v47, 5 }
  0x59   : > { %v430_v57 = vrot.slane %v428_v26, 4  ;;  %v426_v61 = vsel %vm6559_vm4, %v421_v49, %v425_v14  ;;  %v433_v2 = vrot.slane %v431_v51, 5  ;;  %v441_v6 = vshrl.u32 %v6764_v35, 16  ;;  %v225_v26 = vld [vmem:[%s6533_s25 + $0x74] sm:$0x1] }
  0x5a   : > { %v439_v5 = vrot.slane %v437_v52, 5  ;;  %v5059_v7 = vcombine.low %v416_v48, %v426_v61  ;;  %v2220_v17 = vsel %vm6559_vm4, %v2215_v53, %v2219_v43  ;;  %v2225_v10 = vrot.slane %v2224_v55, 4  ;;  %v5312_v48 = vld [vmem:[%s6533_s25 + $0x18] sm:$0xe] }
  0x5b   : > { %v447_v11 = vshll.u32 %v224_v50, 16  ;;  %v434_v14 = vor.u32 %v433_v2, %v430_v57  ;;  %v443_v18 = vrot.slane %v441_v6, 4  ;;  %v5327_v21 = vrot.slane %v5311_v58, 9  ;;  %v6811_v53 = vld [vmem:[%s6533_s25 + $0x78] sm:$0xf] }
  0x5c   : > { %v2785_v25 = vrot.slane %v2783_v62, 4  ;;  %5760 = vmatmul.mubr.msk.bf16.gmra.mrb[12].mxu1 %vm669_vm3, %v5059_v7  ;;  %v2230_v31 = vsel %vm6559_vm4, %v2225_v10, %v2229_v56  ;;  %v452_v39 = vshrl.u32 %v6779_v0, 16  ;;  %v455_v42 = vshll.u32 %v6779_v0, 16  ;;  %v226_v57 = vld [vmem:[%s6533_s25 + $0x80] sm:$0x1] }
  0x5d   : > { %v449_v38 = vrot.slane %v447_v11, 5  ;;  %v5286_v43 = vcombine.low %v2220_v17, %v2230_v31  ;;  %v435_v44 = vrot.slane %v434_v14, 4  ;;  %v444_v45 = vor.u32 %v443_v18, %v439_v5  ;;  %v5313_v10 = vld [vmem:[%s6533_s25 + $0x24] sm:$0xe] }
  0x5e   : > { %v2784_v47 = vsel %vm6785_vm7, %v5327_v21, %v2783_v62  ;;  %v2787_v49 = vsel %vm6785_vm7, %v2785_v25, %v2786_v63  ;;  %v454_v50 = vrot.slane %v452_v39, 4  ;;  %v457_v51 = vrot.slane %v455_v42, 5  ;;  %v6837_v39 = vld [vmem:[%s6533_s25 + $0x84] sm:$0xf] }
  0x5f   : > { %v461_v52 = vshll.u32 %v6792_v29, 16  ;;  %5896 = vmatmul.mubr.msk.bf16.gmra.mrb[12].mxu0 %vm669_vm3, %v5286_v43  ;;  %v440_v15 = vsel %vm6559_vm4, %v435_v44, %v439_v5  ;;  %v445_v62 = vrot.slane %v444_v45, 4  ;;  %v5344_v55 = vcombine.low %v2784_v47, %v2787_v49  ;;  %v6845_v43 = vld [vmem:[%s6533_s25 + $0x88] sm:$0xf] }
  0x60   : > { %v465_v56 = vshrl.u32 %v6792_v29, 16  ;;  %v458_v63 = vor.u32 %v457_v51, %v454_v50  ;;  %v471_v61 = vshll.u32 %v225_v26, 16  ;;  %v5328_v2 = vrot.slane %v5312_v48, 9 }
  0x61   : > { %v463_v58 = vrot.slane %v461_v52, 5  ;;  %v450_v6 = vsel %vm6559_vm4, %v445_v62, %v449_v38  ;;  %5917 = vmatprep.mubr.msk.bf16.mxu0 %vm669_vm3, %v5344_v55  ;;  %v2794_v5 = vsel %vm6785_vm7, %v6602_v30, %v2793_v28  ;;  %v476_v17 = vshrl.u32 %v6811_v53, 16  ;;  %v227_v52 = vld [vmem:[%s6533_s25 + $0x8c] sm:$0x1] }
  0x62   : > { %v467_v7 = vrot.slane %v465_v56, 4  ;;  %v5060_v11 = vcombine.low %v440_v15, %v450_v6  ;;  %v459_v14 = vrot.slane %v458_v63, 4  ;;  %v473_v18 = vrot.slane %v471_v61, 5 }
  0x63   : > { %v2791_v21 = vsel %vm6785_vm7, %v5328_v2, %v2790_v22  ;;  %v478_v38 = vrot.slane %v476_v17, 4  ;;  %v479_v1 = vshll.u32 %v6811_v53, 16  ;;  %v485_v30 = vshll.u32 %v6818_v16, 16  ;;  %v6850_v22 = vld [vmem:[%s8419_s1 + $0xe] sm:$0x3] }
  0x64   : > { %v468_v25 = vor.u32 %v467_v7, %v463_v58  ;;  %v5345_v31 = vcombine.low %v2791_v21, %v2794_v5  ;;  %5763 = vmatprep.mubr.msk.bf16.mxu1 %vm669_vm3, %v5060_v11  ;;  %v464_v28 = vsel %vm6559_vm4, %v459_v14, %v463_v58  ;;  %v489_v60 = vshrl.u32 %v6818_v16, 16  ;;  %v6869_v5 = vld [vmem:[%s6533_s25 + $0x90] sm:$0xf] }
  0x65   : > { %v495_v42 = vshll.u32 %v226_v57, 16  ;;  %v481_v45 = vrot.slane %v479_v1, 5  ;;  %v5329_v47 = vrot.slane %v5313_v10, 9  ;;  %v2797_v26 = vrot.slane %v6609_v46, 5  ;;  %v5314_v57 = vld [vmem:[%s6533_s25 + $0x30] sm:$0xe] }
  0x66   : > { %v469_v44 = vrot.slane %v468_v25, 4  ;;  %v487_v48 = vrot.slane %v485_v30, 5  ;;  %v491_v49 = vrot.slane %v489_v60, 4  ;;  %v2800_v51 = vrot.slane %v6618_v54, 5  ;;  %v6881_v30 = vld [vmem:[%s6533_s25 + $0x94] sm:$0xf] }
  0x67   : > { %v497_v50 = vrot.slane %v495_v42, 5  ;;  %5918 = vmatmul.mubr.msk.bf16.vlgmr.msra.gmra.mrb[0].mxu0 %vm669_vm3, %v5345_v31  ;;  %v482_v62 = vor.u32 %v481_v45, %v478_v38  ;;  %v2798_v55 = vsel %vm6785_vm7, %v5329_v47, %v2797_v26  ;;  %v2799_v56 = vrot.slane %v2797_v26, 4  ;;  %v228_v60 = vld [vmem:[%s6533_s25 + $0x98] sm:$0x1]  ;;  %v5315_v26 = vld [vmem:[%s6533_s25 + $0x3c] sm:$0xe] }
  0x68   : > { %v474_v15 = vsel %vm6559_vm4, %v469_v44, %v473_v18  ;;  %5950 = vmatpush3.bf16.msra.mxu0 %v6569_v41  ;;  %v492_v46 = vor.u32 %v491_v49, %v487_v48  ;;  %v500_v58 = vshrl.u32 %v6837_v39, 16  ;;  %v503_v54 = vshll.u32 %v6837_v39, 16 }
  0x69   : > { %v5061_v63 = vcombine.low %v464_v28, %v474_v15  ;;  %v483_v61 = vrot.slane %v482_v62, 4  ;;  %v2801_v2 = vsel %vm6785_vm7, %v2799_v56, %v2800_v51  ;;  %v509_v6 = vshll.u32 %v6845_v43, 16  ;;  %6317 = vmatprep.subr.msk.bf16.mxu0 %vm718_vm0, %v6850_v22 }
  0x6a   : > { %v513_v7 = vshrl.u32 %v6845_v43, 16  ;;  %v493_v41 = vrot.slane %v492_v46, 4  ;;  %v5346_v17 = vcombine.low %v2798_v55, %v2801_v2  ;;  %v502_v10 = vrot.slane %v500_v58, 4  ;;  %v6901_v46 = vld [vmem:[%s6533_s25 + $0xa0] sm:$0xf] }
  0x6b   : > { %5764 = vmatmul.mubr.msk.bf16.gmra.mrb[16].mxu1 %vm669_vm3, %v5061_v63  ;;  %v505_v11 = vrot.slane %v503_v54, 5  ;;  %v488_v14 = vsel %vm6559_vm4, %v483_v61, %v487_v48  ;;  %v511_v18 = vrot.slane %v509_v6, 5  ;;  %v519_v25 = vshll.u32 %v227_v52, 16  ;;  %v6890_v52 = vld [vmem:[%s6533_s25 + $0x9c] sm:$0xf] }
  0x6c   : > { %v515_v21 = vrot.slane %v513_v7, 4  ;;  %v498_v31 = vsel %vm6559_vm4, %v493_v41, %v497_v50  ;;  %5921 = vmatprep.mubr.msk.bf16.mxu0 %vm669_vm3, %v5346_v17  ;;  %v5330_v1 = vrot.slane %v5314_v57, 9  ;;  %v2804_v28 = vrot.slane %v6638_v33, 5 }
  0x6d   : > { %v506_v38 = vor.u32 %v505_v11, %v502_v10  ;;  %v5062_v42 = vcombine.low %v488_v14, %v498_v31  ;;  %v521_v45 = vrot.slane %v519_v25, 5  ;;  %v2807_v47 = vrot.slane %v6646_v40, 5  ;;  %v229_v10 = vld [vmem:[%s6533_s25 + $0xa4] sm:$0x1]  ;;  %v5316_v11 = vld [vmem:[%s6533_s25 + $0x48] sm:$0xe] }
  0x6e   : > { %v516_v44 = vor.u32 %v515_v21, %v511_v18  ;;  %v2805_v49 = vsel %vm6785_vm7, %v5330_v1, %v2804_v28  ;;  %v2806_v50 = vrot.slane %v2804_v28, 4  ;;  %v524_v51 = vshrl.u32 %v6869_v5, 16 }
  0x6f   : > { %v507_v48 = vrot.slane %v506_v38, 4  ;;  %5767 = vmatprep.mubr.msk.bf16.mxu1 %vm669_vm3, %v5062_v42  ;;  %v527_v15 = vshll.u32 %v6869_v5, 16  ;;  %v533_v62 = vshll.u32 %v6881_v30, 16  ;;  %v537_v40 = vshrl.u32 %v6881_v30, 16 }
  0x70   : > { %v517_v33 = vrot.slane %v516_v44, 4  ;;  %v2808_v56 = vsel %vm6785_vm7, %v2806_v50, %v2807_v47  ;;  %v526_v57 = vrot.slane %v524_v51, 4  ;;  %v543_v63 = vshll.u32 %v228_v60, 16 }
  0x71   : > { %v512_v55 = vsel %vm6559_vm4, %v507_v48, %v511_v18  ;;  %v5347_v54 = vcombine.low %v2805_v49, %v2808_v56  ;;  %v529_v61 = vrot.slane %v527_v15, 5  ;;  %v535_v2 = vrot.slane %v533_v62, 5  ;;  %v6927_v56 = vld [vmem:[%s6533_s25 + $0xac] sm:$0xf] }
  0x72   : > { %v522_v58 = vsel %vm6559_vm4, %v517_v33, %v521_v45  ;;  %v539_v7 = vrot.slane %v537_v40, 4  ;;  %v545_v41 = vrot.slane %v543_v63, 5  ;;  %v5331_v17 = vrot.slane %v5315_v26, 9  ;;  %v6922_v33 = vld [vmem:[%s6533_s25 + $0xa8] sm:$0xf] }
  0x73   : > { %v5063_v6 = vcombine.low %v512_v55, %v522_v58  ;;  %5922 = vmatmul.mubr.msk.bf16.gmra.mrb[4].mxu0 %vm669_vm3, %v5347_v54  ;;  %v530_v14 = vor.u32 %v529_v61, %v526_v57  ;;  %v2811_v18 = vrot.slane %v6663_v20, 5  ;;  %v2814_v21 = vrot.slane %v6668_v34, 5  ;;  %v230_v61 = vld [vmem:[%s6533_s25 + $0xb0] sm:$0x1] }
  0x74   : > { %v548_v25 = vshrl.u32 %v6890_v52, 16  ;;  %v540_v31 = vor.u32 %v539_v7, %v535_v2  ;;  %v551_v38 = vshll.u32 %v6890_v52, 16  ;;  %v557_v1 = vshll.u32 %v6901_v46, 16 }
  0x75   : > { %5768 = vmatmul.mubr.msk.bf16.gmra.mrb[20].mxu1 %vm669_vm3, %v5063_v6  ;;  %v561_v28 = vshrl.u32 %v6901_v46, 16  ;;  %v531_v60 = vrot.slane %v530_v14, 4  ;;  %v2812_v42 = vsel %vm6785_vm7, %v5331_v17, %v2811_v18  ;;  %v2813_v20 = vrot.slane %v2811_v18, 4  ;;  %v6942_v14 = vld [vmem:[%s6533_s25 + $0xb4] sm:$0xf] }
  0x76   : > { %v550_v44 = vrot.slane %v548_v25, 4  ;;  %v541_v34 = vrot.slane %v540_v31, 4  ;;  %v553_v45 = vrot.slane %v551_v38, 5  ;;  %v559_v47 = vrot.slane %v557_v1, 5 }
  0x77   : > { %v563_v26 = vrot.slane %v561_v28, 4  ;;  %v536_v48 = vsel %vm6559_vm4, %v531_v60, %v535_v2  ;;  %v2815_v49 = vsel %vm6785_vm7, %v2813_v20, %v2814_v21  ;;  %v567_v50 = vshll.u32 %v229_v10, 16  ;;  %v5317_v2 = vld [vmem:[%s6533_s25 + $0x54] sm:$0xe] }
  0x78   : > { %v5332_v51 = vrot.slane %v5316_v11, 9  ;;  %v546_v15 = vsel %vm6559_vm4, %v541_v34, %v545_v41  ;;  %v5348_v62 = vcombine.low %v2812_v42, %v2815_v49  ;;  %v554_v40 = vor.u32 %v553_v45, %v550_v44  ;;  %v6951_v42 = vld [vmem:[%s6533_s25 + $0xb8] sm:$0xf]  ;;  %v231_v49 = vld [vmem:[%s6533_s25 + $0xbc] sm:$0x1] }
  0x79   : > { %v564_v55 = vor.u32 %v563_v26, %v559_v47  ;;  %v5064_v57 = vcombine.low %v536_v48, %v546_v15  ;;  %v569_v63 = vrot.slane %v567_v50, 5  ;;  %v2818_v58 = vrot.slane %v6686_v8, 5 }
  0x7a   : > { %v2821_v54 = vrot.slane %v6694_v23, 5  ;;  %5925 = vmatprep.mubr.msk.bf16.mxu0 %vm669_vm3, %v5348_v62  ;;  %v555_v6 = vrot.slane %v554_v40, 4  ;;  %v572_v41 = vshrl.u32 %v6922_v33, 16  ;;  %v575_v17 = vshll.u32 %v6922_v33, 16 }
  0x7b   : > { %v565_v7 = vrot.slane %v564_v55, 4  ;;  %5771 = vmatprep.mubr.msk.bf16.mxu1 %vm669_vm3, %v5064_v57  ;;  %v2819_v10 = vsel %vm6785_vm7, %v5332_v51, %v2818_v58  ;;  %v2820_v11 = vrot.slane %v2818_v58, 4  ;;  %v581_v8 = vshll.u32 %v6927_v56, 16  ;;  %v5318_v55 = vld [vmem:[%s6533_s25 + $0x60] sm:$0xe] }
  0x7c   : > { %v585_v23 = vshrl.u32 %v6927_v56, 16  ;;  %v560_v18 = vsel %vm6559_vm4, %v555_v6, %v559_v47  ;;  %v574_v25 = vrot.slane %v572_v41, 4  ;;  %v577_v31 = vrot.slane %v575_v17, 5  ;;  %v5319_v6 = vld [vmem:[%s6533_s25 + $0x6c] sm:$0xe] }
  0x7d   : > { %v570_v21 = vsel %vm6559_vm4, %v565_v7, %v569_v63  ;;  %v2822_v1 = vsel %vm6785_vm7, %v2820_v11, %v2821_v54  ;;  %v583_v28 = vrot.slane %v581_v8, 5  ;;  %v591_v34 = vshll.u32 %v230_v61, 16  ;;  %v5255_v11 = vld [vmem:[%s6533_s25 + $0x70] sm:$0xf]  ;;  %v5256_v8 = vld [vmem:[%s6533_s25 + $0x74] sm:$0x1] }
  0x7e   : > { %v5065_v38 = vcombine.low %v560_v18, %v570_v21  ;;  %v587_v60 = vrot.slane %v585_v23, 4  ;;  %v5349_v20 = vcombine.low %v2819_v10, %v2822_v1  ;;  %v578_v44 = vor.u32 %v577_v31, %v574_v25 }
  0x7f   : > { %v5333_v45 = vrot.slane %v5317_v2, 9  ;;  %v2825_v26 = vrot.slane %v6717_v4, 5  ;;  %v2828_v48 = vrot.slane %v6723_v12, 5  ;;  %v596_v50 = vshrl.u32 %v6942_v14, 16 }
  0x80   : > { %5772 = vmatmul.mubr.msk.bf16.gmra.mrb[24].mxu1 %vm669_vm3, %v5065_v38  ;;  %v588_v47 = vor.u32 %v587_v60, %v583_v28  ;;  %5926 = vmatmul.mubr.msk.bf16.gmra.mrb[8].mxu0 %vm669_vm3, %v5349_v20  ;;  %v579_v51 = vrot.slane %v578_v44, 4  ;;  %v593_v15 = vrot.slane %v591_v34, 5  ;;  %v599_v62 = vshll.u32 %v6942_v14, 16 }
  0x81   : > { %v605_v40 = vshll.u32 %v6951_v42, 16  ;;  %v2826_v4 = vsel %vm6785_vm7, %v5333_v45, %v2825_v26  ;;  %v2827_v12 = vrot.slane %v2825_v26, 4  ;;  %v598_v63 = vrot.slane %v596_v50, 4 }
  0x82   : > { %v589_v57 = vrot.slane %v588_v47, 4  ;;  %v584_v58 = vsel %vm6559_vm4, %v579_v51, %v583_v28  ;;  %v601_v54 = vrot.slane %v599_v62, 5  ;;  %v609_v2 = vshrl.u32 %v6951_v42, 16  ;;  %v5320_v47 = vld [vmem:[%s6533_s25 + $0x78] sm:$0xe] }
  0x83   : > { %v607_v61 = vrot.slane %v605_v40, 5  ;;  %v2829_v41 = vsel %vm6785_vm7, %v2827_v12, %v2828_v48  ;;  %v615_v17 = vshll.u32 %v231_v49, 16  ;;  %v5334_v10 = vrot.slane %v5318_v55, 9  ;;  %v6413_v51 = vld [vmem:[%s6533_s25] sm:$0xf] }
  0x84   : > { %v594_v7 = vsel %vm6559_vm4, %v589_v57, %v593_v15  ;;  %v5350_v18 = vcombine.low %v2826_v4, %v2829_v41  ;;  %v602_v21 = vor.u32 %v601_v54, %v598_v63  ;;  %v611_v25 = vrot.slane %v609_v2, 4  ;;  %v6989_v15 = vld [vmem:[%s6533_s25 + $0x4] sm:$0xf]  ;;  %v6993_v40 = vld [vmem:[%s6533_s25 + $0x7c] sm:$0xf] }
  0x85   : > { %v5066_v23 = vcombine.low %v584_v58, %v594_v7  ;;  %v617_v31 = vrot.slane %v615_v17, 5  ;;  %v2832_v38 = vrot.slane %v6747_v59, 5  ;;  %v2835_v1 = vrot.slane %v6754_v9, 5  ;;  %v6996_v55 = vld [vmem:[%s6533_s25 + $0x80] sm:$0x1] }
  0x86   : > { %v5335_v28 = vrot.slane %v5319_v6, 9  ;;  %5929 = vmatprep.mubr.msk.bf16.mxu0 %vm669_vm3, %v5350_v18  ;;  %v603_v60 = vrot.slane %v602_v21, 4  ;;  %v612_v20 = vor.u32 %v611_v25, %v607_v61  ;;  %v2839_v44 = vrot.slane %v5255_v11, 5  ;;  %v5261_v57 = vld [vmem:[%s6533_s25 + $0x88] sm:$0xf] }
  0x87   : > { %5775 = vmatprep.mubr.msk.bf16.mxu1 %vm669_vm3, %v5066_v23  ;;  %v2842_v34 = vrot.slane %v5256_v8, 5  ;;  %v2833_v45 = vsel %vm6785_vm7, %v5334_v10, %v2832_v38  ;;  %v2834_v59 = vrot.slane %v2832_v38, 4  ;;  %v5084_v62 = vcombine.low %v6413_v51, %v6989_v15  ;;  %v5262_v54 = vld [vmem:[%s6533_s25 + $0x8c] sm:$0x1]  ;;  %v5264_v17 = vld [vmem:[%s6533_s25 + $0x94] sm:$0xf] }
  0x88   : > { %v608_v9 = vsel %vm6559_vm4, %v603_v60, %v607_v61  ;;  %v613_v26 = vrot.slane %v612_v20, 4  ;;  %v2840_v48 = vsel %vm6785_vm7, %v5335_v28, %v2839_v44  ;;  %v2841_v49 = vrot.slane %v2839_v44, 4  ;;  %v5321_v61 = vld [vmem:[%s6533_s25 + $0x84] sm:$0xe]  ;;  %v5322_v23 = vld [vmem:[%s6533_s25 + $0x90] sm:$0xe] }
  0x89   : > { %v2836_v50 = vsel %vm6785_vm7, %v2834_v59, %v2835_v1  ;;  %v5336_v58 = vrot.slane %v5320_v47, 9  ;;  %v2846_v7 = vrot.slane %v6993_v40, 5  ;;  %v2849_v41 = vrot.slane %v6996_v55, 5  ;;  %v5265_v25 = vld [vmem:[%s6533_s25 + $0x98] sm:$0x1] }
  0x8a   : > { %v618_v4 = vsel %vm6559_vm4, %v613_v26, %v617_v31  ;;  %v5351_v12 = vcombine.low %v2833_v45, %v2836_v50  ;;  %v2843_v63 = vsel %vm6785_vm7, %v2841_v49, %v2842_v34  ;;  %v5337_v10 = vrot.slane %v5321_v61, 9  ;;  %v5267_v31 = vld [vmem:[%s6533_s25 + $0xa0] sm:$0xf]  ;;  %v5268_v60 = vld [vmem:[%s6533_s25 + $0xa4] sm:$0x1] }
  0x8b   : > { %v5067_v2 = vcombine.low %v608_v9, %v618_v4  ;;  %v5352_v6 = vcombine.low %v2840_v48, %v2843_v63  ;;  %v2853_v11 = vrot.slane %v5261_v57, 5  ;;  %v2856_v8 = vrot.slane %v5262_v54, 5  ;;  %v5323_v20 = vld [vmem:[%s6533_s25 + $0x9c] sm:$0xe]  ;;  %v6415_v44 = vld [vmem:[%s6533_s25 + $0xc] sm:$0xf] }
  0x8c   : > { %5930 = vmatmul.mubr.msk.bf16.gmra.mrb[12].mxu0 %vm669_vm3, %v5351_v12  ;;  %v2847_v18 = vsel %vm6785_vm7, %v5336_v58, %v2846_v7  ;;  %v2848_v21 = vrot.slane %v2846_v7, 4  ;;  %v2860_v28 = vrot.slane %v5264_v17, 5  ;;  %v7023_v34 = vld [vmem:[%s6533_s25 + $0x10] sm:$0xf]  ;;  %v6417_v47 = vld [vmem:[%s6533_s25 + $0x18] sm:$0xf] }
  0x8d   : > { %5776 = vmatmul.mubr.msk.bf16.gmra.mrb[28].mxu1 %vm669_vm3, %v5067_v2  ;;  %5933 = vmatprep.mubr.msk.bf16.mxu0 %vm669_vm3, %v5352_v6  ;;  %v2854_v38 = vsel %vm6785_vm7, %v5337_v10, %v2853_v11  ;;  %v2855_v1 = vrot.slane %v2853_v11, 4  ;;  %v5085_v45 = vcombine.low %v6415_v44, %v7023_v34  ;;  %v7030_v9 = vld [vmem:[%s6533_s25 + $0x1c] sm:$0xf]  ;;  %v5338_v48 = vrot.slane %v5322_v23, 9  ;;  %v5270_v57 = vld [vmem:[%s6533_s25 + $0xac] sm:$0xf] }
  0x8e   : > { %5781 = vmatprep.mubr.msk.bf16.mxu1 %vm669_vm3, %v5084_v62  ;;  %v2850_v59 = vsel %vm6785_vm7, %v2848_v21, %v2849_v41  ;;  %v5086_v26 = vcombine.low %v6417_v47, %v7030_v9  ;;  %v2862_v51 = vrot.slane %v2860_v28, 4  ;;  %v2863_v62 = vrot.slane %v5265_v25, 5  ;;  %v6419_v54 = vld [vmem:[%s8419_s1 + $0x4] sm:$0x3]  ;;  %v5273_v2 = vld [vmem:[%s6533_s25 + $0xb8] sm:$0xf] }
  0x8f   : > { %v5353_v49 = vcombine.low %v2847_v18, %v2850_v59  ;;  %v2857_v50 = vsel %vm6785_vm7, %v2855_v1, %v2856_v8  ;;  %v5339_v12 = vrot.slane %v5323_v20, 9  ;;  %v2867_v63 = vrot.slane %v5267_v31, 5  ;;  %v7045_v7 = vld [vmem:[%s8419_s1 + $0x6] sm:$0x3]  ;;  %v5271_v10 = vld [vmem:[%s6533_s25 + $0xb0] sm:$0x1] }
  0x90   : > { %v5354_v4 = vcombine.low %v2854_v38, %v2857_v50  ;;  %v2870_v58 = vrot.slane %v5268_v60, 5  ;;  %v1437_v61 = vsel %vm718_vm0, %v6419_v54, 0  ;;  %v2861_v41 = vsel %vm6785_vm7, %v5338_v48, %v2860_v28  ;;  %v5324_v11 = vld [vmem:[%s6533_s25 + $0xa8] sm:$0xe]  ;;  %v5274_v25 = vld [vmem:[%s6533_s25 + $0xbc] sm:$0x1] }
  0x91   : > { %v2869_v6 = vrot.slane %v2867_v63, 4  ;;  %v2864_v17 = vsel %vm6785_vm7, %v2862_v51, %v2863_v62  ;;  %v2874_v8 = vrot.slane %v5270_v57, 5  ;;  %v2868_v23 = vsel %vm6785_vm7, %v5339_v12, %v2867_v63  ;;  %v5325_v31 = vld [vmem:[%s6533_s25 + $0xb4] sm:$0xe]  ;;  %v6420_v38 = vld [vmem:[%s6533_s25 + $0x24] sm:$0xf] }
  0x92   : > { %v2881_v21 = vrot.slane %v5273_v2, 5  ;;  %v7066_v1 = vld [vmem:[%s6533_s25 + $0x28] sm:$0xf]  ;;  %v5355_v60 = vcombine.low %v2861_v41, %v2864_v17  ;;  %v5340_v44 = vrot.slane %v5324_v11, 9  ;;  %v2877_v59 = vrot.slane %v5271_v10, 5 }
  0x93   : > { %v2871_v18 = vsel %vm6785_vm7, %v2869_v6, %v2870_v58  ;;  %v5087_v28 = vcombine.low %v6420_v38, %v7066_v1  ;;  %v6422_v47 = vld [vmem:[%s6533_s25 + $0x30] sm:$0xf]  ;;  %v2884_v51 = vrot.slane %v5274_v25, 5  ;;  %v5276_v62 = vld [vmem:[%s6533_s25 + $0xc4] sm:$0xf]  ;;  %v2269_v25 = vshrl.u32 %v6993_v40, 16 }
  0x94   : > { %5934 = vmatmul.mubr.msk.bf16.gmra.mrb[16].mxu0 %vm669_vm3, %v5353_v49  ;;  %v5356_v20 = vcombine.low %v2868_v23, %v2871_v18  ;;  %v5341_v49 = vrot.slane %v5325_v31, 9  ;;  %v2883_v50 = vrot.slane %v2881_v21, 4  ;;  %v2875_v57 = vsel %vm6785_vm7, %v5340_v44, %v2874_v8  ;;  %v5326_v12 = vld [vmem:[%s6533_s25 + $0xc0] sm:$0xe]  ;;  %v6424_v41 = vld [vmem:[%s6533_s25 + $0x3c] sm:$0xf] }
  0x95   : > { %5782 = vmatmul.mubr.msk.bf16.vlgmr.msra.gmra.mrb[0].mxu1 %vm669_vm3, %v5085_v45  ;;  %5937 = vmatprep.mubr.msk.bf16.mxu0 %vm669_vm3, %v5354_v4  ;;  %v2876_v45 = vrot.slane %v2874_v8, 4  ;;  %v2888_v63 = vrot.slane %v5276_v62, 5  ;;  %v5342_v6 = vrot.slane %v5326_v12, 9  ;;  %v7091_v17 = vld [vmem:[%s6533_s25 + $0x40] sm:$0xf]  ;;  %v5090_v18 = vcombine.low %v6698_v27, %v6701_v36  ;;  %v6376_v62 = vld [vmem:[%s6533_s25 + $0x24] sm:$0xff]  }
  0x96   : > { %5814 = vmatpush3.bf16.msra.mxu1 %v1437_v61  ;;  %5785 = vmatprep.mubr.msk.bf16.mxu1 %vm669_vm3, %v5086_v26  ;;  %v7071_v26 = vld [vmem:[%s6533_s25 + $0x34] sm:$0xf]  ;;  %v2882_v58 = vsel %vm6785_vm7, %v5341_v49, %v2881_v21  ;;  %v2885_v54 = vsel %vm6785_vm7, %v2883_v50, %v2884_v51  ;;  %v5277_v61 = vld [vmem:[%s6533_s25 + $0xc8] sm:$0x1]  ;;  %v5089_v10 = vcombine.low %v6424_v41, %v7091_v17  ;;  %v2265_v21 = vshll.u32 %v6993_v40, 16 }
  0x97   : > { %6312 = vmatprep.subr.msk.bf16.mxu1 %vm718_vm0, %v7045_v7  ;;  %v5088_v48 = vcombine.low %v6422_v47, %v7071_v26  ;;  %v2878_v4 = vsel %vm6785_vm7, %v2876_v45, %v2877_v59  ;;  %v5358_v11 = vcombine.low %v2882_v58, %v2885_v54  ;;  %v2890_v8 = vrot.slane %v2888_v63, 4  ;;  %v1175_v45 = vld [vmem:[%s6533_s25] sm:$0xe]  ;;  %v1176_v59 = vld [vmem:[%s6533_s25 + $0xc] sm:$0xe] }
  0x98   : > { %v5357_v2 = vcombine.low %v2875_v57, %v2878_v4  ;;  %v2891_v23 = vrot.slane %v5277_v61, 5  ;;  %v2889_v31 = vsel %vm6785_vm7, %v5342_v6, %v2888_v63  ;;  %v7106_v27 = vrot.slane %v2265_v21, 5  ;;  %v1179_v41 = vld [vmem:[%s6533_s25 + $0x30] sm:$0xe] }
  0x99   : > { %v2271_v36 = vrot.slane %v2269_v25, 4  ;;  %v5092_v44 = vcombine.low %v6758_v19, %v6764_v35  ;;  %v2275_v47 = vshll.u32 %v6996_v55, 16  ;;  %v5116_v19 = vrot.slane %v1175_v45, 9 }
  0x9a   : > { %v2892_v38 = vsel %vm6785_vm7, %v2890_v8, %v2891_v23  ;;  %8440 = vst [vmem:[#allocation3_spill] sm:$0xff] %v7106_v27  ;;  %v5117_v35 = vrot.slane %v1176_v59, 9  ;;  %v1242_v4 = vrot.slane %v7030_v9, 5  ;;  %v1249_v12 = vrot.slane %v7066_v1, 5  ;;  %v1180_v8 = vld [vmem:[%s6533_s25 + $0x3c] sm:$0xe] }
  0x9b   : > { %v5359_v40 = vcombine.low %v2889_v31, %v2892_v38  ;;  %v2272_v49 = vor.u32 %v2271_v36, %v7106_v27  ;;  %v7126_v51 = vrot.slane %v2275_v47, 5  ;;  %v5093_v58 = vcombine.low %v6779_v0, %v6792_v29  ;;  %v1181_v31 = vld [vmem:[%s6533_s25 + $0x48] sm:$0xe]  ;;  %v6430_v59 = vld [vmem:[%s6533_s25 + $0x38] sm:$0x1] }
  0x9c   : > { %5938 = vmatmul.mubr.msk.bf16.gmra.mrb[20].mxu0 %vm669_vm3, %v5355_v60  ;;  %v5091_v60 = vcombine.low %v6727_v24, %v6733_v37  ;;  %v6427_v24 = vld [vmem:[%s6533_s25 + $0x14] sm:$0x1]  ;;  %v4077_v54 = vsel %vm718_vm0, %v6850_v22, 0  ;;  %v5094_v61 = vcombine.low %v6811_v53, %v6818_v16  ;;  %v5095_v6 = vcombine.low %v6837_v39, %v6845_v43  ;;  %v6428_v16 = vld [vmem:[%s6533_s25 + $0x20] sm:$0x1] }
  0x9d   : > { %5786 = vmatmul.mubr.msk.bf16.gmra.mrb[4].mxu1 %vm669_vm3, %v5087_v28  ;;  %5941 = vmatprep.mubr.msk.bf16.mxu0 %vm669_vm3, %v5356_v20  ;;  %v1235_v28 = vrot.slane %v7023_v34, 5  ;;  %v6374_v20 = vld [vmem:[%s6533_s25 + $0x18] sm:$0xff]   ;;  %v6426_v34 = vld [vmem:[%s6533_s25 + $0x8] sm:$0x1]  ;;  %v1238_v37 = vrot.slane %v6427_v24, 5  ;;  %8441 = vst [vmem:[#allocation4_spill] sm:$0xff] %v7126_v51  ;;  %v5096_v9 = vcombine.low %v6869_v5, %v6881_v30 }
  0x9e   : > { %5789 = vmatprep.mubr.msk.bf16.mxu1 %vm669_vm3, %v5088_v48  ;;  %v1228_v48 = vrot.slane %v6989_v15, 5  ;;  %v1231_v50 = vrot.slane %v6426_v34, 5  ;;  %v1177_v15 = vld [vmem:[%s6533_s25 + $0x18] sm:$0xe]  ;;  %v7131_v63 = vrot.slane %v2272_v49, 4  ;;  %v1245_v22 = vrot.slane %v6428_v16, 5 }
  0x9f   : > { %v1237_v55 = vrot.slane %v1235_v28, 4  ;;  %v5118_v1 = vrot.slane %v1177_v15, 9  ;;  %v7153_v29 = vsel %vm6785_vm7, %v5117_v35, %v1235_v28  ;;  %v1251_v25 = vrot.slane %v1249_v12, 4  ;;  %v5441_v24 = vld [vmem:[%s6533_s25 + $0x18] sm:$0xf] }
  0xa0   : > { %v1230_v57 = vrot.slane %v1228_v48, 4  ;;  %8442 = vst [vmem:[#allocation5_spill] sm:$0xff] %v7131_v63  ;;  %v7149_v0 = vsel %vm6785_vm7, %v5116_v19, %v1228_v48  ;;  %v1259_v47 = vrot.slane %v6430_v59, 5  ;;  %v7190_v49 = vsel %vm718_vm0, %v7045_v7, 0  ;;  %v5442_v7 = vld [vmem:[%s6533_s25 + $0x1c] sm:$0xf] }
  0xa1   : > { %v7157_v53 = vsel %vm6785_vm7, %v1237_v55, %v1238_v37  ;;  %v7194_v34 = vsel %vm6785_vm7, %v5118_v1, %v1242_v4  ;;  %v6380_v37 = vld [vmem:[%s6533_s25 + $0x3c] sm:$0xff]   ;;  %v5121_v35 = vrot.slane %v1180_v8, 9  ;;  %v6431_v55 = vld [vmem:[%s6533_s25 + $0x44] sm:$0x1]  ;;  %v3598_v8 = vshll.u32 %v5441_v24, 16 }
  0xa2   : > { %v7168_v23 = vsel %vm6785_vm7, %v1230_v57, %v1231_v50  ;;  %v1182_v50 = vld [vmem:[%s6533_s25 + $0x54] sm:$0xe]  ;;  %v1266_v15 = vrot.slane %v6431_v55, 5  ;;  %v5445_v39 = vld [vmem:[%s6533_s25 + $0x28] sm:$0xf] }
  0xa3   : > { %v6438_v5 = vld [vmem:[%s6533_s25 + $0x70] sm:$0xf] }
  0xa4   : > { %5942 = vmatmul.mubr.msk.bf16.gmra.mrb[24].mxu0 %vm669_vm3, %v5357_v2  ;;  %v1178_v2 = vld [vmem:[%s6533_s25 + $0x24] sm:$0xe]  ;;  %v1291_v30 = vrot.slane %v6438_v5, 5 }
  0xa5   : > { %5790 = vmatmul.mubr.msk.bf16.gmra.mrb[8].mxu1 %vm669_vm3, %v5089_v10  ;;  %5945 = vmatprep.mubr.msk.bf16.mxu0 %vm669_vm3, %v5358_v11  ;;  %v1256_v10 = vrot.slane %v7071_v26, 5  ;;  %v6378_v11 = vld [vmem:[%s6533_s25 + $0x30] sm:$0xff]   ;;  %v5119_v21 = vrot.slane %v1178_v2, 9 }
  0xa6   : > { %5793 = vmatprep.mubr.msk.bf16.mxu1 %vm669_vm3, %v5090_v18  ;;  %v7164_v26 = vld [vmem:[%s8419_s1 + $0x10] sm:$0x3]  ;;  %v1244_v18 = vrot.slane %v1242_v4, 4  ;;  %v1293_v48 = vrot.slane %v1291_v30, 4 }
  0xa7   : > { %v1258_v45 = vrot.slane %v1256_v10, 4  ;;  %v7201_v19 = vsel %vm6785_vm7, %v5119_v21, %v1249_v12  ;;  %v3608_v21 = vshrl.u32 %v5442_v7, 16 }
  0xa8   : > { %v7210_v4 = vsel %vm6785_vm7, %v1244_v18, %v1245_v22  ;;  %v3595_v22 = vshrl.u32 %v5441_v24, 16  ;;  %v3604_v18 = vshll.u32 %v5442_v7, 16  ;;  %v5444_v24 = vld [vmem:[%s6533_s25 + $0x24] sm:$0xf] }
  0xa9   : > { %v7223_v1 = vsel %vm6785_vm7, %v1258_v45, %v1259_v47 }
  0xaa   : > { %v3597_v43 = vrot.slane %v3595_v22, 4  ;;  %v7265_v7 = vrot.slane %v3604_v18, 5  ;;  %v3622_v22 = vshll.u32 %v5444_v24, 16  ;;  %v3632_v18 = vshrl.u32 %v5445_v39, 16 }
  0xac   : > { %5946 = vmatmul.mubr.msk.bf16.gmra.mrb[28].mxu0 %vm669_vm3, %v5359_v40  ;;  %v6429_v40 = vld [vmem:[%s6533_s25 + $0x2c] sm:$0x1]  ;;  %v3624_v27 = vrot.slane %v3622_v22, 5 }
  0xad   : > { %5794 = vmatmul.mubr.msk.bf16.gmra.mrb[12].mxu1 %vm669_vm3, %v5091_v60  ;;  %5951 = vmatprep.mubr.msk.bf16.mxu0 %vm669_vm3, %v6374_v20  ;;  %v1252_v28 = vrot.slane %v6429_v40, 5  ;;  %v1263_v60 = vrot.slane %v7091_v17, 5  ;;  %v6434_v40 = vld [vmem:[%s6533_s25 + $0x50] sm:$0x1]  ;;  %v6439_v17 = vld [vmem:[%s6533_s25 + $0x74] sm:$0x1] }
  0xae   : > { %5797 = vmatprep.mubr.msk.bf16.mxu1 %vm669_vm3, %v5092_v44  ;;  %v5120_v44 = vrot.slane %v1179_v41, 9  ;;  %v5123_v41 = vrot.slane %v1182_v50, 9  ;;  %v1183_v50 = vld [vmem:[%s6533_s25 + $0x60] sm:$0xe]  ;;  %v5446_v20 = vld [vmem:[%s6533_s25 + $0x2c] sm:$0x1] }
  0xaf   : > { %v1265_v12 = vrot.slane %v1263_v60, 4  ;;  %v7236_v45 = vsel %vm6785_vm7, %v5121_v35, %v1263_v60  ;;  %v6435_v35 = vld [vmem:[%s6533_s25 + $0x5c] sm:$0x1] }
  0xb0   : > { %v7219_v2 = vsel %vm6785_vm7, %v5120_v44, %v1256_v10  ;;  %v1280_v55 = vrot.slane %v6435_v35, 5  ;;  %v1184_v35 = vld [vmem:[%s6533_s25 + $0x6c] sm:$0xe] }
  0xb1   : > { %v7240_v59 = vsel %vm6785_vm7, %v1265_v12, %v1266_v15  ;;  %v6436_v15 = vld [vmem:[%s6533_s25 + $0x64] sm:$0xf]  ;;  %v3610_v12 = vrot.slane %v3608_v21, 4  ;;  %v5125_v5 = vrot.slane %v1184_v35, 9 }
  0xb2   : > { %v6386_v21 = vld [vmem:[%s6533_s25 + $0x60] sm:$0xff]  }
  0xb4   : > { %5952 = vmatmul.mubr.msk.bf16.vlgmr.msra.gmra.mrb[0].mxu0 %vm669_vm3, %v6376_v62  ;;  %v6432_v62 = vld [vmem:[%s6533_s25 + $0x4c] sm:$0xf] }
  0xb5   : > { %5798 = vmatmul.mubr.msk.bf16.gmra.mrb[16].mxu1 %vm669_vm3, %v5093_v58  ;;  %5984 = vmatpush3.bf16.msra.mxu0 %v4077_v54  ;;  %v1270_v57 = vrot.slane %v6432_v62, 5  ;;  %v7214_v58 = vsel %vm6785_vm7, %v1251_v25, %v1252_v28  ;;  %v5122_v54 = vrot.slane %v1181_v31, 9  ;;  %v1273_v28 = vrot.slane %v6434_v40, 5 }
  0xb6   : > { %5801 = vmatprep.mubr.msk.bf16.mxu1 %vm669_vm3, %v5094_v61  ;;  %5955 = vmatprep.mubr.msk.bf16.mxu0 %vm669_vm3, %v6378_v11  ;;  %v6382_v61 = vld [vmem:[%s6533_s25 + $0x48] sm:$0xff]   ;;  %v6433_v11 = vld [vmem:[%s6533_s25 + $0x58] sm:$0xf]  ;;  %v1284_v62 = vrot.slane %v6436_v15, 5  ;;  %v5448_v15 = vld [vmem:[%s6533_s25 + $0x34] sm:$0xf] }
  0xb7   : > { %6318 = vmatprep.subr.msk.bf16.mxu0 %vm718_vm0, %v7164_v26  ;;  %v1277_v16 = vrot.slane %v6433_v11, 5  ;;  %v1272_v31 = vrot.slane %v1270_v57, 4  ;;  %v7244_v47 = vsel %vm6785_vm7, %v5122_v54, %v1270_v57  ;;  %v5443_v57 = vld [vmem:[%s6533_s25 + $0x20] sm:$0x1]  ;;  %v5447_v54 = vld [vmem:[%s6533_s25 + $0x30] sm:$0xf] }
  0xb8   : > { %v5124_v11 = vrot.slane %v1183_v50, 9  ;;  %v3646_v50 = vshll.u32 %v5447_v54, 16  ;;  %v3614_v25 = vshll.u32 %v5443_v57, 16  ;;  %v3652_v36 = vshll.u32 %v5448_v15, 16 }
  0xb9   : > { %v7255_v60 = vsel %vm6785_vm7, %v5123_v41, %v1277_v16  ;;  %v7271_v41 = vsel %vm6785_vm7, %v1272_v31, %v1273_v28  ;;  %v1286_v31 = vrot.slane %v1284_v62, 4  ;;  %v3643_v28 = vshrl.u32 %v5447_v54, 16 }
  0xba   : > { %v7313_v35 = vrot.slane %v3652_v36, 5 }
  0xbc   : > { %5956 = vmatmul.mubr.msk.bf16.gmra.mrb[4].mxu0 %vm669_vm3, %v6380_v37  ;;  %v1279_v37 = vrot.slane %v1277_v16, 4  ;;  %v6437_v16 = vld [vmem:[%s6533_s25 + $0x68] sm:$0x1] }
  0xbd   : > { %5802 = vmatmul.mubr.msk.bf16.gmra.mrb[20].mxu1 %vm669_vm3, %v5095_v6  ;;  %5959 = vmatprep.mubr.msk.bf16.mxu0 %vm669_vm3, %v6382_v61  ;;  %v3600_v6 = vrot.slane %v3598_v8, 5  ;;  %v6384_v61 = vld [vmem:[%s6533_s25 + $0x54] sm:$0xff]   ;;  %v1287_v40 = vrot.slane %v6437_v16, 5  ;;  %v3628_v8 = vshll.u32 %v5445_v39, 16  ;;  %v3611_v16 = vor.u32 %v3610_v12, %v7265_v7 }
  0xbe   : > { %5805 = vmatprep.mubr.msk.bf16.mxu1 %vm669_vm3, %v5096_v9  ;;  %v3619_v9 = vshrl.u32 %v5444_v24, 16  ;;  %v7280_v44 = vsel %vm6785_vm7, %v1279_v37, %v1280_v55  ;;  %v1294_v24 = vrot.slane %v6439_v17, 5  ;;  %v3656_v39 = vshrl.u32 %v5448_v15, 16 }
  0xbf   : > { %v3601_v10 = vor.u32 %v3600_v6, %v3597_v43  ;;  %v7286_v37 = vrot.slane %v3628_v8, 5  ;;  %v3634_v55 = vrot.slane %v3632_v18, 4  ;;  %v8443_v43 = vcombine.low %v6890_v52, %v6901_v46  ;;  %v6440_v8 = vld [vmem:[%s6533_s25 + $0x7c] sm:$0xf]  ;;  %v7322_v18 = vld [vmem:[%s6533_s25 + $0x38] sm:$0x1] }
  0xc0   : > { %v3621_v38 = vrot.slane %v3619_v9, 4  ;;  %v7295_v17 = vsel %vm6785_vm7, %v5124_v11, %v1284_v62  ;;  %v7299_v57 = vsel %vm6785_vm7, %v1286_v31, %v1287_v40  ;;  %v3645_v6 = vrot.slane %v3643_v28, 4  ;;  %8445 = vst [vmem:[#allocation6_spill] sm:$0xff] %v7322_v18 }
  0xc1   : > { %v3648_v12 = vrot.slane %v3646_v50, 5  ;;  %v8444_v52 = vcombine.low %v6922_v33, %v6927_v56  ;;  %v3602_v46 = vrot.slane %v3601_v10, 4  ;;  %v3612_v54 = vrot.slane %v3611_v16, 4  ;;  %v6388_v33 = vld [vmem:[%s6533_s25 + $0x6c] sm:$0xff]   ;;  %v1186_v16 = vld [vmem:[%s6533_s25 + $0x84] sm:$0xe] }
  0xc2   : > { %v3638_v62 = vshll.u32 %v5446_v20, 16  ;;  %v7307_v11 = vsel %vm6785_vm7, %v5125_v5, %v1291_v30  ;;  %v7311_v40 = vsel %vm6785_vm7, %v1293_v48, %v1294_v24  ;;  %v3658_v9 = vrot.slane %v3656_v39, 4  ;;  %v6389_v48 = vld [vmem:[%s6533_s25 + $0x78] sm:$0xff]  }
  0xc3   : > { %v3625_v10 = vor.u32 %v3624_v27, %v3621_v38  ;;  %v3635_v20 = vor.u32 %v3634_v55, %v7286_v37  ;;  %v1298_v30 = vrot.slane %v6440_v8, 5  ;;  %v3649_v38 = vor.u32 %v3648_v12, %v3645_v6  ;;  %v5450_v5 = vld [vmem:[%s6533_s25 + $0x3c] sm:$0xf] }
  0xc4   : > { %5960 = vmatmul.mubr.msk.bf16.gmra.mrb[8].mxu0 %vm669_vm3, %v6384_v61  ;;  %v3616_v61 = vrot.slane %v3614_v25, 5  ;;  %v1185_v25 = vld [vmem:[%s6533_s25 + $0x78] sm:$0xe]  ;;  %v7338_v50 = vrot.slane %v3638_v62, 5  ;;  %v3659_v39 = vor.u32 %v3658_v9, %v7313_v35  ;;  %v3662_v55 = vshll.u32 %v7322_v18, 16 }
  0xc5   : > { %5806 = vmatmul.mubr.msk.bf16.gmra.mrb[24].mxu1 %vm669_vm3, %v8443_v43  ;;  %5963 = vmatprep.mubr.msk.bf16.mxu0 %vm669_vm3, %v6386_v21  ;;  %v3607_v21 = vsel %vm6559_vm4, %v3602_v46, %v7265_v7  ;;  %v5126_v24 = vrot.slane %v1185_v25, 9  ;;  %v6441_v43 = vld [vmem:[%s6533_s25 + $0x88] sm:$0xf]  ;;  %v7346_v7 = vld [vmem:[%s6533_s25 + $0x40] sm:$0xf]  ;;  %v3626_v12 = vrot.slane %v3625_v10, 4  ;;  %v8447_v62 = vcombine.low %v6942_v14, %v6951_v42 }
  0xc6   : > { %5809 = vmatprep.mubr.msk.bf16.mxu1 %vm669_vm3, %v8444_v52  ;;  %v3617_v31 = vsel %vm6559_vm4, %v3612_v54, %v3616_v61  ;;  %v1305_v6 = vrot.slane %v6441_v43, 5  ;;  %8446 = vst [vmem:[#allocation7_spill] sm:$0xff] %v7346_v7  ;;  %v3636_v52 = vrot.slane %v3635_v20, 4  ;;  %v1300_v46 = vrot.slane %v1298_v30, 4  ;;  %v6442_v54 = vld [vmem:[%s6533_s25 + $0x80] sm:$0x1] }
  0xc7   : > { %v1301_v61 = vrot.slane %v6442_v54, 5  ;;  %v3650_v9 = vrot.slane %v3649_v38, 4  ;;  %v5127_v25 = vrot.slane %v1186_v16, 9  ;;  %v3667_v8 = vshrl.u32 %v5450_v5, 16  ;;  %v6390_v10 = vld [vmem:[%s6533_s25 + $0x84] sm:$0xff]  }
  0xc8   : > { %v3670_v43 = vshll.u32 %v5450_v5, 16  ;;  %v7360_v20 = vcombine.low %v3607_v21, %v3617_v31  ;;  %v7364_v14 = vsel %vm718_vm0, %v7164_v26, 0  ;;  %v3680_v38 = vshrl.u32 %v7346_v7, 16  ;;  %v6391_v21 = vld [vmem:[%s6533_s25 + $0x90] sm:$0xff]   ;;  %v6447_v18 = vld [vmem:[%s6533_s25 + $0xa0] sm:$0xf] }
  0xc9   : > { %v3660_v16 = vrot.slane %v3659_v39, 4  ;;  %v3664_v5 = vrot.slane %v3662_v55, 5  ;;  %v1307_v54 = vrot.slane %v1305_v6, 4  ;;  %v3631_v31 = vsel %vm6559_vm4, %v3626_v12, %v7286_v37 }
  0xca   : > { %v3641_v26 = vsel %vm6559_vm4, %v3636_v52, %v7338_v50  ;;  %v7379_v39 = vsel %vm6785_vm7, %v5126_v24, %v1298_v30  ;;  %v7383_v55 = vsel %vm6785_vm7, %v1300_v46, %v1301_v61  ;;  %v3655_v37 = vsel %vm6559_vm4, %v3650_v9, %v7313_v35  ;;  %v5456_v30 = vld [vmem:[%s6533_s25 + $0x54] sm:$0xf]  ;;  %v7400_v24 = vld [vmem:[%s6533_s25 + $0x58] sm:$0xf]  ;;  %v7405_v61 = vld [vmem:[%s6533_s25 + $0x90] sm:$0xe] }
  0xcb   : > { %v7396_v12 = vsel %vm6785_vm7, %v5127_v25, %v1305_v6  ;;  %v3669_v50 = vrot.slane %v3667_v8, 4  ;;  %v3672_v52 = vrot.slane %v3670_v43, 5  ;;  %v3682_v46 = vrot.slane %v3680_v38, 4 }
  0xcc   : > { %5964 = vmatmul.mubr.msk.bf16.gmra.mrb[12].mxu0 %vm669_vm3, %v6388_v33  ;;  %v8448_v33 = vcombine.low %v7149_v0, %v7168_v23  ;;  %v6443_v0 = vld [vmem:[%s6533_s25 + $0x8c] sm:$0x1]  ;;  %v3665_v36 = vsel %vm6559_vm4, %v3660_v16, %v3664_v5  ;;  %v3715_v25 = vshrl.u32 %v5456_v30, 16  ;;  %v3718_v8 = vshll.u32 %v5456_v30, 16 }
  0xcd   : > { %5810 = vmatmul.mubr.msk.bf16.gmra.mrb[28].mxu1 %vm669_vm3, %v8447_v62  ;;  %5967 = vmatprep.mubr.msk.bf16.mxu0 %vm669_vm3, %v6389_v48  ;;  %v3676_v48 = vshll.u32 %v7346_v7, 16  ;;  %v1308_v23 = vrot.slane %v6443_v0, 5  ;;  %v5453_v62 = vld [vmem:[%s6533_s25 + $0x48] sm:$0xf]  ;;  %v7389_v0 = vld [vmem:[%s6533_s25 + $0x4c] sm:$0xf]  ;;  %v8450_v38 = vcombine.low %v7153_v29, %v7157_v53  ;;  %v7423_v16 = vcombine.low %v3631_v31, %v3641_v26 }
  0xce   : > { %5815 = vmatprep.mubr.msk.bf16.mxu1 %vm669_vm3, %v8448_v33  ;;  %v7386_v33 = vld [vmem:[%s6533_s25 + $0x44] sm:$0x1]  ;;  %v3691_v27 = vshrl.u32 %v5453_v62, 16  ;;  %v3694_v15 = vshll.u32 %v5453_v62, 16  ;;  %v3700_v6 = vshll.u32 %v7389_v0, 16  ;;  %v3704_v9 = vshrl.u32 %v7389_v0, 16 }
  0xcf   : > { %8449 = vst [vmem:[#allocation8_spill] sm:$0xff] %v7386_v33  ;;  %v7402_v28 = vrot.slane %v3676_v48, 5  ;;  %v7411_v35 = vsel %vm6785_vm7, %v1307_v54, %v1308_v23  ;;  %v3724_v43 = vshll.u32 %v7400_v24, 16  ;;  %v3728_v48 = vshrl.u32 %v7400_v24, 16  ;;  %v5459_v31 = vld [vmem:[%s6533_s25 + $0x60] sm:$0xf] }
  0xd0   : > { %v3686_v5 = vshll.u32 %v7386_v33, 16  ;;  %v5128_v54 = vrot.slane %v7405_v61, 9  ;;  %v8451_v23 = vcombine.low %v7194_v34, %v7210_v4  ;;  %v7434_v29 = vcombine.low %v3655_v37, %v3665_v36  ;;  %v6392_v26 = vld [vmem:[%s6533_s25 + $0x9c] sm:$0xff]   ;;  %v6393_v30 = vld [vmem:[%s6533_s25 + $0xa8] sm:$0xff]  }
  0xd1   : > { %v3673_v53 = vor.u32 %v3672_v52, %v3669_v50  ;;  %v3693_v62 = vrot.slane %v3691_v27, 4  ;;  %v7445_v34 = vrot.slane %v3700_v6, 5  ;;  %v3706_v4 = vrot.slane %v3704_v9, 4  ;;  %v6444_v36 = vld [vmem:[%s8419_s1 + $0x8] sm:$0x3] }
  0xd2   : > { %v3717_v27 = vrot.slane %v3715_v25, 4  ;;  %v3720_v37 = vrot.slane %v3718_v8, 5  ;;  %v7454_v50 = vrot.slane %v3724_v43, 5  ;;  %v3730_v52 = vrot.slane %v3728_v48, 4  ;;  %v6445_v6 = vld [vmem:[%s6533_s25 + $0x94] sm:$0xf] }
  0xd3   : > { %v7460_v9 = vld [vmem:[%s6533_s25 + $0x64] sm:$0xf]  ;;  %v3739_v61 = vshrl.u32 %v5459_v31, 16  ;;  %v7462_v22 = vrot.slane %v3673_v53, 4  ;;  %v1319_v25 = vrot.slane %v6447_v18, 5  ;;  %v3707_v43 = vor.u32 %v3706_v4, %v7445_v34 }
  0xd4   : > { %5968 = vmatmul.mubr.msk.bf16.gmra.mrb[16].mxu0 %vm669_vm3, %v6390_v10  ;;  %8452 = vst [vmem:[#allocation9_spill] sm:$0xff] %v7460_v9  ;;  %v3742_v10 = vshll.u32 %v5459_v31, 16  ;;  %v3721_v31 = vor.u32 %v3720_v37, %v3717_v27  ;;  %v3731_v53 = vor.u32 %v3730_v52, %v7454_v50  ;;  %v8453_v18 = vcombine.low %v7201_v19, %v7214_v58  ;;  %v6394_v37 = vld [vmem:[%s6533_s25 + $0xb4] sm:$0xff]  }
  0xd5   : > { %5816 = vmatmul.mubr.msk.bf16.vlgmr.msra.gmra.mrb[0].mxu1 %vm669_vm3, %v8450_v38  ;;  %5971 = vmatprep.mubr.msk.bf16.mxu0 %vm669_vm3, %v6391_v21  ;;  %v3696_v21 = vrot.slane %v3694_v15, 5  ;;  %v7443_v38 = vld [vmem:[%s6533_s25 + $0x50] sm:$0x1]  ;;  %v7452_v15 = vld [vmem:[%s6533_s25 + $0x5c] sm:$0x1]  ;;  %v8454_v27 = vcombine.low %v7219_v2, %v7223_v1  ;;  %v1321_v52 = vrot.slane %v1319_v25, 4 }
  0xd6   : > { %5848 = vmatpush3.bf16.msra.mxu1 %v7190_v49  ;;  %5819 = vmatprep.mubr.msk.bf16.mxu1 %vm669_vm3, %v8451_v23  ;;  %v3683_v49 = vor.u32 %v3682_v46, %v7402_v28  ;;  %v7456_v46 = vrot.slane %v3686_v5, 5  ;;  %v1312_v23 = vrot.slane %v6445_v6, 5  ;;  %v3710_v48 = vshll.u32 %v7443_v38, 16  ;;  %v1188_v5 = vld [vmem:[%s6533_s25 + $0x9c] sm:$0xe] }
  0xd7   : > { %6314 = vmatprep.subr.msk.bf16.mxu1 %vm718_vm0, %v6444_v36  ;;  %v6446_v36 = vld [vmem:[%s6533_s25 + $0x98] sm:$0x1]  ;;  %v3697_v7 = vor.u32 %v3696_v21, %v3693_v62  ;;  %v3734_v6 = vshll.u32 %v7452_v15, 16  ;;  %v3752_v62 = vshrl.u32 %v7460_v9, 16  ;;  %v3744_v4 = vrot.slane %v3742_v10, 5 }
  0xd8   : > { %v1315_v33 = vrot.slane %v6446_v36, 5  ;;  %v3684_v8 = vrot.slane %v3683_v49, 4  ;;  %v3748_v36 = vshll.u32 %v7460_v9, 16  ;;  %v7481_v21 = vsel %vm6785_vm7, %v5128_v54, %v1312_v23  ;;  %v7492_v2 = vld [vmem:[%s6533_s25 + $0x68] sm:$0x1] }
  0xd9   : > { %v3741_v49 = vrot.slane %v3739_v61, 4  ;;  %v3698_v19 = vrot.slane %v3697_v7, 4  ;;  %v5129_v58 = vrot.slane %v1188_v5, 9  ;;  %v3708_v3 = vrot.slane %v3707_v43, 4  ;;  %8455 = vst [vmem:[#allocation10_spill] sm:$0xff] %v7492_v2  ;;  %v6395_v5 = vld [vmem:[%s6533_s25 + $0xc0] sm:$0xff]  }
  0xda   : > { %v3712_v54 = vrot.slane %v3710_v48, 5  ;;  %v3736_v63 = vrot.slane %v3734_v6, 5  ;;  %v1326_v61 = vrot.slane %v6927_v56, 5  ;;  %v3722_v10 = vrot.slane %v3721_v31, 4  ;;  %v1190_v31 = vld [vmem:[%s6533_s25 + $0xb4] sm:$0xe] }
  0xdb   : > { %v3732_v51 = vrot.slane %v3731_v53, 4  ;;  %v7494_v1 = vrot.slane %v3748_v36, 5  ;;  %v3754_v7 = vrot.slane %v3752_v62, 4  ;;  %v3679_v43 = vsel %vm6559_vm4, %v7462_v22, %v7402_v28  ;;  %v6449_v62 = vld [vmem:[%s6533_s25 + $0xb0] sm:$0x1] }
  0xdc   : > { %5972 = vmatmul.mubr.msk.bf16.gmra.mrb[20].mxu0 %vm669_vm3, %v6392_v26  ;;  %v1314_v26 = vrot.slane %v1312_v23, 4  ;;  %v1189_v23 = vld [vmem:[%s6533_s25 + $0xa8] sm:$0xe]  ;;  %v3689_v48 = vsel %vm6559_vm4, %v3684_v8, %v7456_v46  ;;  %v3745_v6 = vor.u32 %v3744_v4, %v3741_v49  ;;  %v3703_v53 = vsel %vm6559_vm4, %v3698_v19, %v7445_v34  ;;  %v5462_v46 = vld [vmem:[%s6533_s25 + $0x6c] sm:$0xf] }
  0xdd   : > { %5820 = vmatmul.mubr.msk.bf16.gmra.mrb[4].mxu1 %vm669_vm3, %v8453_v18  ;;  %5975 = vmatprep.mubr.msk.bf16.mxu0 %vm669_vm3, %v6393_v30  ;;  %v6448_v18 = vld [vmem:[%s6533_s25 + $0xa4] sm:$0x1]  ;;  %v7514_v36 = vsel %vm6785_vm7, %v5129_v58, %v1319_v25  ;;  %v5130_v28 = vrot.slane %v1189_v23, 9  ;;  %v1328_v8 = vrot.slane %v1326_v61, 4  ;;  %v3758_v49 = vshll.u32 %v7492_v2, 16 }
  0xde   : > { %5823 = vmatprep.mubr.msk.bf16.mxu1 %vm669_vm3, %v8454_v27  ;;  %v1322_v30 = vrot.slane %v6448_v18, 5  ;;  %v7506_v56 = vsel %vm6785_vm7, %v1314_v26, %v1315_v33  ;;  %v3713_v33 = vsel %vm6559_vm4, %v3708_v3, %v3712_v54  ;;  %v1329_v26 = vrot.slane %v6449_v62, 5  ;;  %v5465_v18 = vld [vmem:[%s6533_s25 + $0x78] sm:$0xf]  ;;  %v7569_v54 = vld [vmem:[%s6533_s25 + $0xbc] sm:$0x1] }
  0xdf   : > { %v3727_v34 = vsel %vm6559_vm4, %v3722_v10, %v7454_v50  ;;  %v3737_v25 = vsel %vm6559_vm4, %v3732_v51, %v3736_v63  ;;  %v3755_v4 = vor.u32 %v3754_v7, %v7494_v1  ;;  %v5131_v27 = vrot.slane %v1190_v31, 9  ;;  %v7543_v51 = vld [vmem:[%s6533_s25 + $0x70] sm:$0xf]  ;;  %v7573_v10 = vld [vmem:[%s6533_s25 + $0x7c] sm:$0xf] }
  0xe0   : > { %v7518_v22 = vsel %vm6785_vm7, %v1321_v52, %v1322_v30  ;;  %v8457_v3 = vcombine.low %v7236_v45, %v7240_v59  ;;  %v7539_v19 = vrot.slane %v3745_v6, 4  ;;  %v1333_v50 = vrot.slane %v6951_v42, 5  ;;  %8458 = vst [vmem:[#allocation12_spill] sm:$0xff] %v7543_v51  ;;  %8460 = vst [vmem:[#allocation13_spill] sm:$0xff] %v7573_v10  ;;  %v5468_v7 = vld [vmem:[%s6533_s25 + $0x84] sm:$0xf] }
  0xe1   : > { %8456 = vst [vmem:[#allocation11_spill] sm:$0xff] %v7518_v22  ;;  %v3763_v63 = vshrl.u32 %v5462_v46, 16  ;;  %v8459_v45 = vcombine.low %v7244_v47, %v7271_v41  ;;  %v7551_v58 = vcombine.low %v3703_v53, %v3713_v33  ;;  %v7557_v42 = vsel %vm6785_vm7, %v5130_v28, %v1326_v61  ;;  %v6396_v61 = vld [vmem:[%s6533_s25 + $0xcc] sm:$0xff]   ;;  %v7585_v31 = vld [vmem:[%s6533_s25 + $0x88] sm:$0xf] }
  0xe2   : > { %v7560_v30 = vcombine.low %v3727_v34, %v3737_v25  ;;  %v7564_v47 = vsel %vm6785_vm7, %v1328_v8, %v1329_v26  ;;  %v7566_v41 = vrot.slane %v3758_v49, 5  ;;  %v3772_v6 = vshll.u32 %v7543_v51, 16  ;;  %8461 = vst [vmem:[#allocation14_spill] sm:$0xff] %v7585_v31  ;;  %v5471_v62 = vld [vmem:[%s6533_s25 + $0x90] sm:$0xf] }
  0xe3   : > { %v7591_v28 = vrot.slane %v1333_v50, 4  ;;  %v7593_v33 = vrot.slane %v3763_v63, 4  ;;  %v3776_v8 = vshrl.u32 %v7543_v51, 16  ;;  %v3787_v26 = vshrl.u32 %v5465_v18, 16  ;;  %v7600_v25 = vld [vmem:[%s6533_s25 + $0x94] sm:$0xf] }
  0xe4   : > { %5976 = vmatmul.mubr.msk.bf16.gmra.mrb[24].mxu0 %vm669_vm3, %v6394_v37  ;;  %v7537_v37 = vcombine.low %v3679_v43, %v3689_v48  ;;  %v7581_v43 = vsel %vm6785_vm7, %v5131_v27, %v1333_v50  ;;  %v3766_v48 = vshll.u32 %v5462_v46, 16  ;;  %v3790_v49 = vshll.u32 %v5465_v18, 16  ;;  %8462 = vst [vmem:[#allocation15_spill] sm:$0xff] %v7600_v25  ;;  %v7638_v2 = vld [vmem:[%s6533_s25 + $0x8c] sm:$0x1] }
  0xe5   : > { %5824 = vmatmul.mubr.msk.bf16.gmra.mrb[8].mxu1 %vm669_vm3, %v8457_v3  ;;  %5979 = vmatprep.mubr.msk.bf16.mxu0 %vm669_vm3, %v6395_v5  ;;  %v7577_v5 = vrot.slane %v3755_v4, 4  ;;  %v3796_v46 = vshll.u32 %v7573_v10, 16  ;;  %v3800_v34 = vshrl.u32 %v7573_v10, 16  ;;  %v3811_v4 = vshrl.u32 %v5468_v7, 16 }
  0xe6   : > { %5827 = vmatprep.mubr.msk.bf16.mxu1 %vm669_vm3, %v8459_v45  ;;  %v3814_v27 = vshll.u32 %v5468_v7, 16  ;;  %v3820_v3 = vshll.u32 %v7585_v31, 16  ;;  %v3824_v50 = vshrl.u32 %v7585_v31, 16  ;;  %v7610_v45 = vld [vmem:[%s6533_s25 + $0x74] sm:$0x1]  ;;  %v3768_v18 = vrot.slane %v3766_v48, 5 }
  0xe7   : > { %v3835_v52 = vshrl.u32 %v5471_v62, 16  ;;  %v3838_v53 = vshll.u32 %v5471_v62, 16  ;;  %v8463_v7 = vcombine.low %v7255_v60, %v7280_v44  ;;  %v3778_v59 = vrot.slane %v3776_v8, 4  ;;  %v5474_v48 = vld [vmem:[%s6533_s25 + $0x9c] sm:$0xf] }
  0xe8   : > { %v3844_v63 = vshll.u32 %v7600_v25, 16  ;;  %v3848_v23 = vshrl.u32 %v7600_v25, 16  ;;  %v8464_v62 = vcombine.low %v7295_v17, %v7299_v57  ;;  %v7628_v44 = vld [vmem:[%s6533_s25 + $0x80] sm:$0x1]  ;;  %v3789_v60 = vrot.slane %v3787_v26, 4 }
  0xe9   : > { %8465 = vst [vmem:[#allocation16_spill] sm:$0xff] %v7628_v44  ;;  %v3813_v31 = vrot.slane %v3811_v4, 4  ;;  %v3816_v8 = vrot.slane %v3814_v27, 5  ;;  %v7632_v10 = vrot.slane %v3820_v3, 5  ;;  %v3826_v51 = vrot.slane %v3824_v50, 4 }
  0xea   : > { %v7635_v25 = vld [vmem:[%s6533_s25 + $0xa0] sm:$0xf]  ;;  %v3837_v17 = vrot.slane %v3835_v52, 4  ;;  %v3840_v57 = vrot.slane %v3838_v53, 5  ;;  %v3862_v9 = vshll.u32 %v5474_v48, 16  ;;  %v3769_v26 = vor.u32 %v3768_v18, %v7593_v33 }
  0xeb   : > { %v3806_v27 = vshll.u32 %v7628_v44, 16  ;;  %v7647_v3 = vld [vmem:[%s6533_s25 + $0x98] sm:$0x1]  ;;  %v3868_v50 = vshll.u32 %v7635_v25, 16  ;;  %v3872_v52 = vshrl.u32 %v7635_v25, 16  ;;  %v3817_v22 = vor.u32 %v3816_v8, %v3813_v31 }
  0xec   : > { %5980 = vmatmul.mubr.msk.bf16.gmra.mrb[28].mxu0 %vm669_vm3, %v6396_v61  ;;  %v7618_v61 = vrot.slane %v3772_v6, 5  ;;  %v3802_v6 = vrot.slane %v3800_v34, 4  ;;  %v3850_v34 = vrot.slane %v3848_v23, 4  ;;  %v3830_v33 = vshll.u32 %v7638_v2, 16 }
  0xed   : > { %5828 = vmatmul.mubr.msk.bf16.gmra.mrb[12].mxu1 %vm669_vm3, %v8463_v7  ;;  %5985 = vmatprep.mubr.msk.bf16.mxu0 %vm669_vm3, %v7360_v20  ;;  %v3792_v7 = vrot.slane %v3790_v49, 5  ;;  %v7630_v20 = vrot.slane %v3796_v46, 5  ;;  %v3782_v49 = vshll.u32 %v7610_v45, 16  ;;  %v7642_v46 = vrot.slane %v3844_v63, 5 }
  0xee   : > { %5831 = vmatprep.mubr.msk.bf16.mxu1 %vm669_vm3, %v8464_v62  ;;  %v3859_v62 = vshrl.u32 %v5474_v48, 16  ;;  %v3779_v4 = vor.u32 %v3778_v59, %v7618_v61  ;;  %v3827_v23 = vor.u32 %v3826_v51, %v7632_v10  ;;  %v3841_v59 = vor.u32 %v3840_v57, %v3837_v17  ;;  %v7680_v57 = vld [vmem:[%s6533_s25 + $0xa4] sm:$0x1] }
  0xef   : > { %v3793_v53 = vor.u32 %v3792_v7, %v3789_v60  ;;  %v3803_v48 = vor.u32 %v3802_v6, %v7630_v20  ;;  %v3864_v18 = vrot.slane %v3862_v9, 5  ;;  %v8466_v44 = vcombine.low %v7307_v11, %v7311_v40 }
  0xf0   : > { %v3861_v63 = vrot.slane %v3859_v62, 4  ;;  %v8467_v31 = vrot.slane %v7569_v54, 5  ;;  %v3784_v51 = vrot.slane %v3782_v49, 5  ;;  %v3851_v60 = vor.u32 %v3850_v34, %v7642_v46  ;;  %v7683_v34 = vld [vmem:[%s6533_s25 + $0xac] sm:$0xf] }
  0xf1   : > { %v3854_v9 = vshll.u32 %v7647_v3, 16  ;;  %v8468_v11 = vcombine.low %v7379_v39, %v7383_v55  ;;  %v3770_v40 = vrot.slane %v3769_v26, 4  ;;  %v7676_v54 = vrot.slane %v3868_v50, 5 }
  0xf2   : > { %v3794_v7 = vrot.slane %v3793_v53, 4  ;;  %v3804_v6 = vrot.slane %v3803_v48, 4  ;;  %v3808_v8 = vrot.slane %v3806_v27, 5  ;;  %v3832_v17 = vrot.slane %v3830_v33, 5  ;;  %v7693_v48 = vld [vmem:[%s6533_s25 + $0xb0] sm:$0x1] }
  0xf3   : > { %v3818_v39 = vrot.slane %v3817_v22, 4  ;;  %v3828_v55 = vrot.slane %v3827_v23, 4  ;;  %v3842_v62 = vrot.slane %v3841_v59, 4  ;;  %v3865_v49 = vor.u32 %v3864_v18, %v3861_v63 }
  0xf4   : > { %5986 = vmatmul.mubr.msk.bf16.vlgmr.msra.gmra.mrb[0].mxu0 %vm669_vm3, %v7423_v16  ;;  %v7666_v16 = vsel %vm6785_vm7, %v7591_v28, %v8467_v31  ;;  %v3874_v28 = vrot.slane %v3872_v52, 4  ;;  %v3856_v26 = vrot.slane %v3854_v9, 5  ;;  %v3775_v52 = vsel %vm6559_vm4, %v3770_v40, %v7618_v61 }
  0xf5   : > { %5832 = vmatmul.mubr.msk.bf16.gmra.mrb[16].mxu1 %vm669_vm3, %v8466_v44  ;;  %6018 = vmatpush3.bf16.msra.mxu0 %v7364_v14  ;;  %v3780_v14 = vrot.slane %v3779_v4, 4  ;;  %v5477_v44 = vld [vmem:[%s6533_s25 + $0xa8] sm:$0xf]  ;;  %v3878_v22 = vshll.u32 %v7680_v57, 16  ;;  %v3799_v33 = vsel %vm6559_vm4, %v3794_v7, %v7630_v20  ;;  %v3809_v23 = vsel %vm6559_vm4, %v3804_v6, %v3808_v8 }
  0xf6   : > { %5835 = vmatprep.mubr.msk.bf16.mxu1 %vm669_vm3, %v8468_v11  ;;  %5989 = vmatprep.mubr.msk.bf16.mxu0 %vm669_vm3, %v7434_v29  ;;  %v3852_v29 = vrot.slane %v3851_v60, 4  ;;  %v3883_v4 = vshrl.u32 %v5477_v44, 16  ;;  %v3886_v50 = vshll.u32 %v5477_v44, 16  ;;  %v3875_v53 = vor.u32 %v3874_v28, %v7676_v54  ;;  %v5526_v11 = vld [vmem:[%s6533_s25 + $0x48] sm:$0xe] }
  0xf7   : > { %v3785_v27 = vsel %vm6559_vm4, %v3780_v14, %v3784_v51  ;;  %v3892_v59 = vshll.u32 %v7683_v34, 16  ;;  %v3896_v61 = vshrl.u32 %v7683_v34, 16  ;;  %v3823_v63 = vsel %vm6559_vm4, %v3818_v39, %v7632_v10  ;;  %v7758_v39 = vld [vmem:[%s6533_s25 + $0xb8] sm:$0xf] }
  0xf8   : > { %v3833_v18 = vsel %vm6559_vm4, %v3828_v55, %v3832_v17  ;;  %v3847_v20 = vsel %vm6559_vm4, %v3842_v62, %v7642_v46  ;;  %v3866_v31 = vrot.slane %v3865_v49, 4  ;;  %v8469_v51 = vcombine.low %v7396_v12, %v7411_v35 }
  0xf9   : > { %v3885_v10 = vrot.slane %v3883_v4, 4  ;;  %v3888_v60 = vrot.slane %v3886_v50, 5  ;;  %v3902_v9 = vshll.u32 %v7693_v48, 16  ;;  %v8470_v46 = vcombine.low %v7481_v21, %v7506_v56  ;;  %v5480_v21 = vld [vmem:[%s6533_s25 + $0xb4] sm:$0xf] }
  0xfa   : > { %v5147_v12 = vcombine.low %v7557_v42, %v7564_v47  ;;  %v8471_v35 = vsel %vm6559_vm4, %v7577_v5, %v7566_v41  ;;  %v3876_v14 = vrot.slane %v3875_v53, 4  ;;  %v3880_v28 = vrot.slane %v3878_v22, 5  ;;  %v5528_v4 = vld [vmem:[%s6533_s25 + $0x60] sm:$0xe]  ;;  %v5529_v53 = vld [vmem:[%s6533_s25 + $0x6c] sm:$0xe] }
  0xfb   : > { %v5148_v56 = vcombine.low %v7581_v43, %v7666_v16  ;;  %v7741_v44 = vcombine.low %v3775_v52, %v3785_v27  ;;  %v7743_v42 = vrot.slane %v3892_v59, 5  ;;  %v3898_v47 = vrot.slane %v3896_v61, 4  ;;  %v8480_v16 = vld [vmem:[#allocation4_spill] sm:$0xff] }
  0xfc   : > { %5990 = vmatmul.mubr.msk.bf16.gmra.mrb[4].mxu0 %vm669_vm3, %v7537_v37  ;;  %v3857_v37 = vsel %vm6559_vm4, %v3852_v29, %v3856_v26  ;;  %v7745_v41 = vcombine.low %v3799_v33, %v3809_v23  ;;  %v7747_v5 = vcombine.low %v3823_v63, %v3833_v18  ;;  %v3871_v6 = vsel %vm6559_vm4, %v3866_v31, %v7676_v54  ;;  %v8473_v23 = vld [vmem:[#allocation11_spill] sm:$0xff]  ;;  %v5483_v63 = vld [vmem:[%s6533_s25 + $0xc0] sm:$0xf]  ;;  %v8475_v18 = vld [vmem:[#allocation9_spill] sm:$0xff] }
  0xfd   : > { %5836 = vmatmul.mubr.msk.bf16.gmra.mrb[20].mxu1 %vm669_vm3, %v8469_v51  ;;  %5993 = vmatprep.mubr.msk.bf16.mxu0 %vm669_vm3, %v7551_v58  ;;  %v8472_v58 = vsel %vm6559_vm4, %v7539_v19, %v7494_v1  ;;  %v7749_v7 = vcombine.low %v3847_v20, %v3857_v37  ;;  %v5542_v1 = vrot.slane %v5526_v11, 9  ;;  %v5527_v19 = vld [vmem:[%s6533_s25 + $0x54] sm:$0xe]  ;;  %v3889_v8 = vor.u32 %v3888_v60, %v3885_v10  ;;  %v8476_v31 = vld [vmem:[#allocation10_spill] sm:$0xff] }
  0xfe   : > { %5839 = vmatprep.mubr.msk.bf16.mxu1 %vm669_vm3, %v8470_v46  ;;  %v5496_v40 = vcombine.low %v8472_v58, %v8471_v35  ;;  %v7755_v17 = vrot.slane %v3902_v9, 5  ;;  %v3907_v55 = vshrl.u32 %v5480_v21, 16  ;;  %v3881_v62 = vsel %vm6559_vm4, %v3876_v14, %v3880_v28  ;;  %v8477_v9 = vld [vmem:[#allocation12_spill] sm:$0xff]  ;;  %v7807_v35 = vld [vmem:[%s6533_s25 + $0xbc] sm:$0x1] }
  0xff   : > { %v3910_v49 = vshll.u32 %v5480_v21, 16  ;;  %v4366_v29 = vrot.slane %v7389_v0, 5  ;;  %v4369_v26 = vrot.slane %v7443_v38, 5  ;;  %v3899_v50 = vor.u32 %v3898_v47, %v7743_v42  ;;  %v7810_v58 = vld [vmem:[%s6533_s25 + $0xc4] sm:$0xf] }
 0x100   : > { %v5543_v52 = vrot.slane %v5527_v19, 9  ;;  %v4373_v54 = vrot.slane %v7400_v24, 5  ;;  %v4376_v27 = vrot.slane %v7452_v15, 5  ;;  %v3916_v22 = vshll.u32 %v7758_v39, 16  ;;  %v5530_v19 = vld [vmem:[%s6533_s25 + $0x78] sm:$0xe] }
 0x101   : > { %v3920_v33 = vshrl.u32 %v7758_v39, 16  ;;  %v7775_v0 = vsel %vm6785_vm7, %v5542_v1, %v4366_v29  ;;  %v4368_v38 = vrot.slane %v4366_v29, 4  ;;  %v8474_v59 = vcombine.low %v7514_v36, %v8473_v23  ;;  %v8478_v23 = vld [vmem:[#allocation13_spill] sm:$0xff] }
 0x102   : > { %v7782_v24 = vcombine.low %v3871_v6, %v3881_v62  ;;  %v7786_v15 = vsel %vm6785_vm7, %v5543_v52, %v4373_v54  ;;  %v5544_v61 = vrot.slane %v5528_v4, 9  ;;  %v4380_v20 = vrot.slane %v8475_v18, 5  ;;  %v6397_v6 = vld [vmem:[%s6533_s25 + $0xc] sm:$0xff]  }
 0x103   : > { %v7792_v36 = vsel %vm6785_vm7, %v4368_v38, %v4369_v26  ;;  %v4383_v51 = vrot.slane %v8476_v31, 5  ;;  %v5545_v37 = vrot.slane %v5529_v53, 9  ;;  %v4387_v11 = vrot.slane %v8477_v9, 5 }
 0x104   : > { %5994 = vmatmul.mubr.msk.bf16.gmra.mrb[8].mxu0 %vm669_vm3, %v7560_v30  ;;  %v4375_v30 = vrot.slane %v4373_v54, 4  ;;  %v5559_v10 = vcombine.low %v7775_v0, %v7792_v36  ;;  %v4390_v46 = vrot.slane %v7610_v45, 5  ;;  %v7816_v14 = vsel %vm6785_vm7, %v5544_v61, %v4380_v20 }
 0x105   : > { %5840 = vmatmul.mubr.msk.bf16.gmra.mrb[24].mxu1 %vm669_vm3, %v8474_v59  ;;  %5997 = vmatprep.mubr.msk.bf16.mxu0 %vm669_vm3, %v5496_v40  ;;  %v4382_v28 = vrot.slane %v4380_v20, 4  ;;  %v7818_v21 = vrot.slane %v3907_v55, 4  ;;  %v3931_v47 = vshrl.u32 %v5483_v63, 16  ;;  %v7822_v45 = vsel %vm6785_vm7, %v5545_v37, %v4387_v11  ;;  %v5257_v55 = vld [vmem:[%s6533_s25 + $0x78] sm:$0xf]  ;;  %v8479_v59 = vld [vmem:[#allocation16_spill] sm:$0xff] }
 0x106   : > { %5843 = vmatprep.mubr.msk.bf16.mxu1 %vm669_vm3, %v5147_v12  ;;  %v7800_v60 = vsel %vm6785_vm7, %v4375_v30, %v4376_v27  ;;  %v7804_v12 = vrot.slane %v3889_v8, 4  ;;  %v4389_v1 = vrot.slane %v4387_v11, 4  ;;  %v7826_v8 = vrot.slane %v3899_v50, 4 }
 0x107   : > { %v5560_v40 = vcombine.low %v7786_v15, %v7800_v60  ;;  %v7828_v62 = vrot.slane %v3910_v49, 5  ;;  %v3934_v29 = vshll.u32 %v5483_v63, 16  ;;  %v7832_v26 = vsel %vm6785_vm7, %v4382_v28, %v4383_v51  ;;  %v8482_v28 = vld [vmem:[#allocation14_spill] sm:$0xff] }
 0x108   : > { %v7835_v4 = vrot.slane %v3916_v22, 5  ;;  %v7837_v52 = vrot.slane %v3920_v33, 4  ;;  %v5561_v54 = vcombine.low %v7816_v14, %v7832_v26  ;;  %v7843_v27 = vsel %vm6785_vm7, %v4389_v1, %v4390_v46  ;;  %v5531_v33 = vld [vmem:[%s6533_s25 + $0x84] sm:$0xe]  ;;  %v6398_v1 = vld [vmem:[%s6533_s25 + $0x18] sm:$0xff]  }
 0x109   : > { %v3926_v49 = vshll.u32 %v7807_v35, 16  ;;  %v3940_v50 = vshll.u32 %v7810_v58, 16  ;;  %v5562_v53 = vcombine.low %v7822_v45, %v7843_v27  ;;  %v5546_v22 = vrot.slane %v5530_v19, 9  ;;  %v6460_v60 = vld [vmem:[%s6533_s25 + $0xa0] sm:$0xf] }
 0x10a   : > { %v3933_v38 = vrot.slane %v3931_v47, 4  ;;  %v4397_v30 = vrot.slane %v8479_v59, 5  ;;  %v2256_v61 = vshrl.u32 %v5257_v55, 16  ;;  %v3936_v63 = vrot.slane %v3934_v29, 5  ;;  %v5486_v29 = vld [vmem:[%s6533_s25 + $0xcc] sm:$0xf] }
 0x10b   : > { %v3944_v18 = vshrl.u32 %v7810_v58, 16  ;;  %v2259_v43 = vshll.u32 %v5257_v55, 16  ;;  %v5547_v37 = vrot.slane %v5531_v33, 9  ;;  %v3895_v9 = vsel %vm6559_vm4, %v7804_v12, %v7743_v42  ;;  %v7886_v55 = vld [vmem:[%s6533_s25 + $0xd0] sm:$0xf] }
 0x10c   : > { %5998 = vmatmul.mubr.msk.bf16.gmra.mrb[12].mxu0 %vm669_vm3, %v7741_v44  ;;  %v4394_v44 = vrot.slane %v8478_v23, 5  ;;  %v2258_v51 = vrot.slane %v2256_v61, 4  ;;  %v3913_v11 = vor.u32 %v7828_v62, %v7818_v21  ;;  %v4401_v47 = vrot.slane %v8482_v28, 5  ;;  %v6399_v21 = vld [vmem:[%s6533_s25 + $0x24] sm:$0xff]   ;;  %v6464_v27 = vld [vmem:[%s6533_s25 + $0xac] sm:$0xf] }
 0x10d   : > { %5844 = vmatmul.mubr.msk.bf16.gmra.mrb[28].mxu1 %vm669_vm3, %v5148_v56  ;;  %6001 = vmatprep.mubr.msk.bf16.mxu0 %vm669_vm3, %v7745_v41  ;;  %v8481_v56 = vld [vmem:[#allocation5_spill] sm:$0xff]  ;;  %v2261_v46 = vrot.slane %v2259_v43, 5  ;;  %v3905_v19 = vsel %vm6559_vm4, %v7826_v8, %v7755_v17  ;;  %v4404_v12 = vrot.slane %v7638_v2, 5  ;;  %v7894_v62 = vrot.slane %v3940_v50, 5  ;;  %v5532_v8 = vld [vmem:[%s6533_s25 + $0x90] sm:$0xe] }
 0x10e   : > { %5849 = vmatprep.mubr.msk.bf16.mxu1 %vm669_vm3, %v6397_v6  ;;  %v2278_v41 = vsel %vm6559_vm4, %v8481_v56, %v8480_v16  ;;  %v7868_v20 = vsel %vm6785_vm7, %v5546_v22, %v4394_v44  ;;  %v4396_v31 = vrot.slane %v4394_v44, 4  ;;  %v3923_v6 = vor.u32 %v7837_v52, %v7835_v4  ;;  %v7900_v52 = vld [vmem:[%s6533_s25 + $0xc8] sm:$0x1]  ;;  %v8484_v16 = vld [vmem:[#allocation2_spill] sm:$0xff] }
 0x10f   : > { %v3946_v22 = vrot.slane %v3944_v18, 4  ;;  %v2262_v17 = vor.u32 %v2261_v46, %v2258_v51  ;;  %v3928_v23 = vrot.slane %v3926_v49, 5  ;;  %v3937_v44 = vor.u32 %v3936_v63, %v3933_v38  ;;  %v8485_v51 = vld [vmem:[#allocation3_spill] sm:$0xff] }
 0x110   : > { %v7890_v42 = vsel %vm6785_vm7, %v4396_v31, %v4397_v30  ;;  %v7904_v59 = vsel %vm6785_vm7, %v5547_v37, %v4401_v47  ;;  %v4403_v30 = vrot.slane %v4401_v47, 4  ;;  %v3955_v2 = vshrl.u32 %v5486_v29, 16 }
 0x111   : > { %v5563_v33 = vcombine.low %v7868_v20, %v7890_v42  ;;  %v3958_v50 = vshll.u32 %v5486_v29, 16  ;;  %v3964_v61 = vshll.u32 %v7886_v55, 16  ;;  %v2263_v18 = vrot.slane %v2262_v17, 4  ;;  %v6400_v29 = vld [vmem:[%s6533_s25 + $0x30] sm:$0xff]  }
 0x112   : > { %v3968_v49 = vshrl.u32 %v7886_v55, 16  ;;  %v7915_v38 = vsel %vm6785_vm7, %v4403_v30, %v4404_v12  ;;  %v5548_v63 = vrot.slane %v5532_v8, 9  ;;  %v3947_v56 = vor.u32 %v3946_v22, %v7894_v62 }
 0x113   : > { %v3950_v31 = vshll.u32 %v7900_v52, 16  ;;  %v5564_v37 = vcombine.low %v7904_v59, %v7915_v38  ;;  %v5502_v46 = vcombine.low %v3895_v9, %v3905_v19  ;;  %v3914_v28 = vrot.slane %v3913_v11, 4  ;;  %v5533_v11 = vld [vmem:[%s6533_s25 + $0x9c] sm:$0xe] }
 0x114   : > { %6002 = vmatmul.mubr.msk.bf16.gmra.mrb[16].mxu0 %vm669_vm3, %v7747_v5  ;;  %v8483_v5 = vld [vmem:[#allocation15_spill] sm:$0xff]  ;;  %v3924_v47 = vrot.slane %v3923_v6, 4  ;;  %v3938_v12 = vrot.slane %v3937_v44, 4  ;;  %v4411_v8 = vrot.slane %v7647_v3, 5  ;;  %v3957_v30 = vrot.slane %v3955_v2, 4  ;;  %v6401_v19 = vld [vmem:[%s6533_s25 + $0x3c] sm:$0xff]  }
 0x115   : > { %5850 = vmatmul.mubr.msk.bf16.vlgmr.msra.gmra.mrb[0].mxu1 %vm669_vm3, %v6398_v1  ;;  %6005 = vmatprep.mubr.msk.bf16.mxu0 %vm669_vm3, %v7749_v7  ;;  %v4408_v43 = vrot.slane %v8483_v5, 5  ;;  %v2268_v7 = vsel %vm6559_vm4, %v2263_v18, %v8485_v51  ;;  %v3960_v18 = vrot.slane %v3958_v50, 5  ;;  %v7938_v5 = vrot.slane %v3964_v61, 5 }
 0x116   : > { %6052 = vmatpush3.bf16.msra.mxu1 %v8484_v16  ;;  %5853 = vmatprep.mubr.msk.bf16.mxu1 %vm669_vm3, %v6399_v21  ;;  %v7927_v1 = vcombine.low %v2268_v7, %v2278_v41  ;;  %v7931_v21 = vld [vmem:[%s6533_s25 + $0xd4] sm:$0x1]  ;;  %v3970_v9 = vrot.slane %v3968_v49, 4  ;;  %v3948_v41 = vrot.slane %v3947_v56, 4  ;;  %v3952_v6 = vrot.slane %v3950_v31, 5 }
 0x117   : > { %v7935_v22 = vsel %vm6785_vm7, %v5548_v63, %v4408_v43  ;;  %v4410_v17 = vrot.slane %v4408_v43, 4  ;;  %v3919_v63 = vsel %vm6559_vm4, %v3914_v28, %v7835_v4  ;;  %v3929_v2 = vsel %vm6559_vm4, %v3924_v47, %v3928_v23  ;;  %v6451_v16 = vld [vmem:[%s6533_s25 + $0x1c] sm:$0xf]  ;;  %v5534_v28 = vld [vmem:[%s6533_s25 + $0xa8] sm:$0xe] }
 0x118   : > { %v3974_v50 = vshll.u32 %v7931_v21, 16  ;;  %v5549_v61 = vrot.slane %v5533_v11, 9  ;;  %v4415_v49 = vrot.slane %v7635_v25, 5  ;;  %v3943_v4 = vsel %vm6559_vm4, %v3938_v12, %v7894_v62  ;;  %v5522_v62 = vld [vmem:[%s6533_s25 + $0x18] sm:$0xe]  ;;  %v6402_v47 = vld [vmem:[%s6533_s25 + $0x48] sm:$0xff]  }
 0x119   : > { %v7944_v44 = vsel %vm6785_vm7, %v4410_v17, %v4411_v8  ;;  %v3971_v43 = vor.u32 %v3970_v9, %v7938_v5  ;;  %v4418_v23 = vrot.slane %v7680_v57, 5  ;;  %v3953_v25 = vsel %vm6559_vm4, %v3948_v41, %v3952_v6  ;;  %v6452_v11 = vld [vmem:[%s6533_s25 + $0x20] sm:$0x1] }
 0x11a   : > { %v5565_v3 = vcombine.low %v7935_v22, %v7944_v44  ;;  %v4338_v56 = vrot.slane %v6451_v16, 5  ;;  %v7970_v31 = vsel %vm6785_vm7, %v5549_v61, %v4415_v49  ;;  %v4417_v51 = vrot.slane %v4415_v49, 4  ;;  %v5535_v49 = vld [vmem:[%s6533_s25 + $0xb4] sm:$0xe] }
 0x11b   : > { %v5503_v7 = vcombine.low %v3919_v63, %v3929_v2  ;;  %v3972_v17 = vrot.slane %v3971_v43, 4  ;;  %v5550_v41 = vrot.slane %v5534_v28, 9  ;;  %v4422_v6 = vrot.slane %v7683_v34, 5  ;;  %v5523_v2 = vld [vmem:[%s6533_s25 + $0x24] sm:$0xe] }
 0x11c   : > { %6006 = vmatmul.mubr.msk.bf16.gmra.mrb[20].mxu0 %vm669_vm3, %v7782_v24  ;;  %v3961_v24 = vor.u32 %v3960_v18, %v3957_v30  ;;  %v7975_v57 = vsel %vm6785_vm7, %v4417_v51, %v4418_v23  ;;  %v6403_v30 = vld [vmem:[%s6533_s25 + $0x54] sm:$0xff]   ;;  %v5538_v18 = vrot.slane %v5522_v62, 9  ;;  %v4340_v9 = vrot.slane %v4338_v56, 4  ;;  %v6455_v28 = vld [vmem:[%s6533_s25 + $0x2c] sm:$0x1] }
 0x11d   : > { %5854 = vmatmul.mubr.msk.bf16.gmra.mrb[4].mxu1 %vm669_vm3, %v6400_v29  ;;  %6009 = vmatprep.mubr.msk.bf16.mxu0 %vm669_vm3, %v5502_v46  ;;  %v3976_v46 = vrot.slane %v3974_v50, 5  ;;  %v5504_v29 = vcombine.low %v3943_v4, %v3953_v25  ;;  %v5566_v8 = vcombine.low %v7970_v31, %v7975_v57  ;;  %v4425_v63 = vrot.slane %v7693_v48, 5  ;;  %v6453_v50 = vld [vmem:[%s6533_s25 + $0x28] sm:$0xf]  ;;  %v5524_v25 = vld [vmem:[%s6533_s25 + $0x30] sm:$0xe] }
 0x11e   : > { %5857 = vmatprep.mubr.msk.bf16.mxu1 %vm669_vm3, %v6401_v19  ;;  %v3962_v12 = vrot.slane %v3961_v24, 4  ;;  %v4341_v19 = vrot.slane %v6452_v11, 5  ;;  %v4345_v61 = vrot.slane %v6453_v50, 5  ;;  %v7998_v48 = vsel %vm6785_vm7, %v5550_v41, %v4422_v6  ;;  %v6405_v11 = vld [vmem:[%s6533_s25 + $0x6c] sm:$0xff]   ;;  %v8486_v41 = vld [vmem:[#allocation6_spill] sm:$0xff] }
 0x11f   : > { %v3977_v34 = vsel %vm6559_vm4, %v3972_v17, %v3976_v46  ;;  %v4424_v24 = vrot.slane %v4422_v6, 4  ;;  %v4339_v43 = vsel %vm6785_vm7, %v5538_v18, %v4338_v56  ;;  %v5539_v51 = vrot.slane %v5523_v2, 9  ;;  %v5536_v50 = vld [vmem:[%s6533_s25 + $0xc0] sm:$0xe]  ;;  %v6469_v31 = vld [vmem:[%s6533_s25 + $0xc8] sm:$0x1] }
 0x120   : > { %v3967_v4 = vsel %vm6559_vm4, %v3962_v12, %v7938_v5  ;;  %v4342_v23 = vsel %vm6785_vm7, %v4340_v9, %v4341_v19  ;;  %v6454_v5 = vld [vmem:[%s6533_s25 + $0x34] sm:$0xf]  ;;  %v6404_v12 = vld [vmem:[%s6533_s25 + $0x60] sm:$0xff]   ;;  %v5540_v18 = vrot.slane %v5524_v25, 9  ;;  %v4432_v9 = vrot.slane %v7807_v35, 5 }
 0x121   : > { %v4352_v16 = vrot.slane %v6454_v5, 5  ;;  %v8009_v62 = vsel %vm6785_vm7, %v4424_v24, %v4425_v63  ;;  %v5505_v46 = vcombine.low %v3967_v4, %v3977_v34  ;;  %v5555_v17 = vcombine.low %v4339_v43, %v4342_v23  ;;  %v5525_v24 = vld [vmem:[%s6533_s25 + $0x3c] sm:$0xe] }
 0x122   : > { %v5567_v56 = vcombine.low %v7998_v48, %v8009_v62  ;;  %v4355_v6 = vrot.slane %v8486_v41, 5  ;;  %v4346_v35 = vsel %vm6785_vm7, %v5539_v51, %v4345_v61  ;;  %v5552_v5 = vrot.slane %v5536_v50, 9 }
 0x123   : > { %v4354_v19 = vrot.slane %v4352_v16, 4  ;;  %v4353_v23 = vsel %vm6785_vm7, %v5540_v18, %v4352_v16  ;;  %v4439_v51 = vrot.slane %v7900_v52, 5  ;;  %v2419_v57 = vshll.u32 %v6469_v31, 16 }
 0x124   : > { %6010 = vmatmul.mubr.msk.bf16.gmra.mrb[24].mxu0 %vm669_vm3, %v5503_v7  ;;  %v5551_v7 = vrot.slane %v5535_v49, 9 }
 0x125   : > { %5858 = vmatmul.mubr.msk.bf16.gmra.mrb[8].mxu1 %vm669_vm3, %v6402_v47  ;;  %6013 = vmatprep.mubr.msk.bf16.mxu0 %vm669_vm3, %v5504_v29  ;;  %v4348_v47 = vrot.slane %v6455_v28, 5  ;;  %v4429_v29 = vrot.slane %v7758_v39, 5  ;;  %v8487_v39 = vld [vmem:[#allocation7_spill] sm:$0xff]  ;;  %v4356_v25 = vsel %vm6785_vm7, %v4354_v19, %v4355_v6  ;;  %v5541_v28 = vrot.slane %v5525_v24, 9 }
 0x126   : > { %5861 = vmatprep.mubr.msk.bf16.mxu1 %vm669_vm3, %v6403_v30  ;;  %v4347_v30 = vrot.slane %v4345_v61, 4  ;;  %v4359_v49 = vrot.slane %v8487_v39, 5  ;;  %v4436_v61 = vrot.slane %v7810_v58, 5  ;;  %v6456_v39 = vld [vmem:[%s6533_s25 + $0x70] sm:$0xf]  ;;  %v4443_v24 = vrot.slane %v7886_v55, 5 }
 0x127   : > { %v8021_v63 = vsel %vm6785_vm7, %v5551_v7, %v4429_v29  ;;  %v4431_v2 = vrot.slane %v4429_v29, 4  ;;  %v5254_v7 = vld [vmem:[%s6533_s25 + $0x6c] sm:$0xf]  ;;  %v8488_v29 = vld [vmem:[#allocation8_spill] sm:$0xff] }
 0x128   : > { %v4349_v34 = vsel %vm6785_vm7, %v4347_v30, %v4348_v47  ;;  %v4361_v47 = vrot.slane %v4359_v49, 4  ;;  %v6406_v30 = vld [vmem:[%s6533_s25 + $0x78] sm:$0xff]   ;;  %v8052_v16 = vsel %vm6785_vm7, %v5552_v5, %v4436_v61  ;;  %v4438_v18 = vrot.slane %v4436_v61, 4 }
 0x129   : > { %v8028_v4 = vsel %vm6785_vm7, %v4431_v2, %v4432_v9  ;;  %v5557_v9 = vcombine.low %v4353_v23, %v4356_v25  ;;  %v2232_v19 = vshrl.u32 %v5254_v7, 16  ;;  %v2235_v41 = vshll.u32 %v5254_v7, 16 }
 0x12a   : > { %v5568_v43 = vcombine.low %v8021_v63, %v8028_v4  ;;  %v8057_v58 = vsel %vm6785_vm7, %v4438_v18, %v4439_v51  ;;  %v4360_v6 = vsel %vm6785_vm7, %v5541_v28, %v4359_v49  ;;  %v4446_v49 = vrot.slane %v7931_v21, 5  ;;  %v6408_v51 = vld [vmem:[%s6533_s25 + $0x90] sm:$0xff]   ;;  %v6409_v21 = vld [vmem:[%s6533_s25 + $0x9c] sm:$0xff]  }
 0x12b   : > { %v5569_v50 = vcombine.low %v8052_v16, %v8057_v58  ;;  %v2234_v23 = vrot.slane %v2232_v19, 4  ;;  %v2237_v25 = vrot.slane %v2235_v41, 5  ;;  %v4445_v7 = vrot.slane %v4443_v24, 4 }
 0x12c   : > { %6014 = vmatmul.mubr.msk.bf16.gmra.mrb[28].mxu0 %vm669_vm3, %v5505_v46  ;;  %v5556_v46 = vcombine.low %v4346_v35, %v4349_v34  ;;  %v2241_v35 = vshll.u32 %v6456_v39, 16  ;;  %v2245_v34 = vshrl.u32 %v6456_v39, 16 }
 0x12d   : > { %5862 = vmatmul.mubr.msk.bf16.gmra.mrb[12].mxu1 %vm669_vm3, %v6404_v12  ;;  %6019 = vmatprep.mubr.msk.bf16.mxu0 %vm669_vm3, %v5555_v17  ;;  %v4362_v12 = vrot.slane %v8488_v29, 5  ;;  %v5537_v17 = vld [vmem:[%s6533_s25 + $0xcc] sm:$0xe]  ;;  %v8079_v55 = vsel %vm6785_vm7, %v4445_v7, %v4446_v49 }
 0x12e   : > { %5865 = vmatprep.mubr.msk.bf16.mxu1 %vm669_vm3, %v6405_v11  ;;  %v6407_v11 = vld [vmem:[%s6533_s25 + $0x84] sm:$0xff]   ;;  %v5553_v52 = vrot.slane %v5537_v17, 9  ;;  %v2247_v28 = vrot.slane %v2245_v34, 4  ;;  %v6457_v17 = vld [vmem:[%s6533_s25 + $0x74] sm:$0x1] }
 0x12f   : > { %v4363_v2 = vsel %vm6785_vm7, %v4361_v47, %v4362_v12  ;;  %v5260_v47 = vld [vmem:[%s6533_s25 + $0x84] sm:$0xf]  ;;  %v2238_v12 = vor.u32 %v2237_v25, %v2234_v23  ;;  %v6411_v34 = vld [vmem:[%s6533_s25 + $0xb4] sm:$0xff]  }
 0x130   : > { %v8074_v5 = vsel %vm6785_vm7, %v5553_v52, %v4443_v24  ;;  %v5558_v61 = vcombine.low %v4360_v6, %v4363_v2  ;;  %v2283_v18 = vshll.u32 %v5260_v47, 16  ;;  %v5263_v6 = vld [vmem:[%s6533_s25 + $0x90] sm:$0xf]  ;;  %v6410_v2 = vld [vmem:[%s6533_s25 + $0xa8] sm:$0xff]  }
 0x131   : > { %v5570_v29 = vcombine.low %v8074_v5, %v8079_v55  ;;  %v2239_v52 = vrot.slane %v2238_v12, 4  ;;  %v2304_v23 = vshrl.u32 %v5263_v6, 16  ;;  %v2307_v25 = vshll.u32 %v5263_v6, 16 }
 0x132   : > { %v2337_v12 = vshll.u32 %v6460_v60, 16 }
 0x133   : > { %v2309_v14 = vrot.slane %v2307_v25, 5  ;;  %v6463_v25 = vld [vmem:[%s6533_s25 + $0xa4] sm:$0x1] }
 0x134   : > { %6020 = vmatmul.mubr.msk.bf16.vlgmr.msra.gmra.mrb[0].mxu0 %vm669_vm3, %v5556_v46  ;;  %v2243_v46 = vrot.slane %v2241_v35, 5  ;;  %v5266_v35 = vld [vmem:[%s6533_s25 + $0x9c] sm:$0xf]  ;;  %v8121_v6 = vrot.slane %v2337_v12, 5 }
 0x135   : > { %5866 = vmatmul.mubr.msk.bf16.gmra.mrb[16].mxu1 %vm669_vm3, %v6406_v30  ;;  %6023 = vmatprep.mubr.msk.bf16.mxu0 %vm669_vm3, %v5557_v9  ;;  %v2251_v30 = vshll.u32 %v6457_v17, 16  ;;  %v2280_v9 = vshrl.u32 %v5260_v47, 16  ;;  %v2331_v47 = vshll.u32 %v5266_v35, 16  ;;  %v6461_v17 = vld [vmem:[%s6533_s25 + $0x8c] sm:$0x1] }
 0x136   : > { %5869 = vmatprep.mubr.msk.bf16.mxu1 %vm669_vm3, %v6407_v11  ;;  %v2248_v13 = vor.u32 %v2247_v28, %v2243_v46  ;;  %v6458_v11 = vld [vmem:[%s6533_s25 + $0x88] sm:$0xf]  ;;  %v2244_v7 = vsel %vm6559_vm4, %v2239_v52, %v2243_v46 }
 0x137   : > { %v2289_v19 = vshll.u32 %v6458_v11, 16  ;;  %v2293_v41 = vshrl.u32 %v6458_v11, 16  ;;  %v2253_v0 = vrot.slane %v2251_v30, 5  ;;  %v2282_v36 = vrot.slane %v2280_v9, 4 }
 0x138   : > { %v2249_v39 = vrot.slane %v2248_v13, 4  ;;  %v2299_v30 = vshll.u32 %v6461_v17, 16  ;;  %v2306_v9 = vrot.slane %v2304_v23, 4  ;;  %v2333_v11 = vrot.slane %v2331_v47, 5 }
 0x139   : > { %v8098_v24 = vrot.slane %v2289_v19, 5  ;;  %v2295_v49 = vrot.slane %v2293_v41, 4  ;;  %v6412_v19 = vld [vmem:[%s6533_s25 + $0xc0] sm:$0xff]  }
 0x13a   : > { %v2254_v46 = vsel %vm6559_vm4, %v2249_v39, %v2253_v0  ;;  %v5269_v39 = vld [vmem:[%s6533_s25 + $0xa8] sm:$0xf] }
 0x13b   : > { %v2296_v13 = vor.u32 %v2295_v49, %v8098_v24  ;;  %v5287_v41 = vcombine.low %v2244_v7, %v2254_v46  ;;  %v2347_v7 = vshll.u32 %v6463_v25, 16  ;;  %v2355_v45 = vshll.u32 %v5269_v39, 16 }
 0x13c   : > { %6024 = vmatmul.mubr.msk.bf16.gmra.mrb[4].mxu0 %vm669_vm3, %v5558_v61  ;;  %v6459_v61 = vld [vmem:[%s6533_s25 + $0x94] sm:$0xf] }
 0x13d   : > { %5870 = vmatmul.mubr.msk.bf16.gmra.mrb[20].mxu1 %vm669_vm3, %v6408_v51  ;;  %6027 = vmatprep.mubr.msk.bf16.mxu0 %vm669_vm3, %v5559_v10  ;;  %v2285_v10 = vrot.slane %v2283_v18, 5  ;;  %v2313_v51 = vshll.u32 %v6459_v61, 16  ;;  %v2317_v28 = vshrl.u32 %v6459_v61, 16  ;;  %v2297_v0 = vrot.slane %v2296_v13, 4 }
 0x13e   : > { %5873 = vmatprep.mubr.msk.bf16.mxu1 %vm669_vm3, %v6409_v21  ;;  %v2328_v21 = vshrl.u32 %v5266_v35, 16  ;;  %v6462_v35 = vld [vmem:[%s6533_s25 + $0x98] sm:$0x1]  ;;  %v2352_v61 = vshrl.u32 %v5269_v39, 16  ;;  %v5275_v39 = vld [vmem:[%s6533_s25 + $0xc0] sm:$0xf] }
 0x13f   : > { %v2286_v15 = vor.u32 %v2285_v10, %v2282_v36  ;;  %v8118_v26 = vrot.slane %v2313_v51, 5  ;;  %v2301_v36 = vrot.slane %v2299_v30, 5  ;;  %v2310_v10 = vor.u32 %v2309_v14, %v2306_v9  ;;  %v5272_v51 = vld [vmem:[%s6533_s25 + $0xb4] sm:$0xf] }
 0x140   : > { %v2330_v18 = vrot.slane %v2328_v21, 4  ;;  %v2365_v21 = vshrl.u32 %v6464_v27, 16  ;;  %v2376_v20 = vshrl.u32 %v5272_v51, 16  ;;  %v2379_v42 = vshll.u32 %v5272_v51, 16 }
 0x141   : > { %v2287_v52 = vrot.slane %v2286_v15, 4  ;;  %v2302_v46 = vsel %vm6559_vm4, %v2297_v0, %v2301_v36  ;;  %v2311_v15 = vrot.slane %v2310_v10, 4  ;;  %v2349_v30 = vrot.slane %v2347_v7, 5 }
 0x142   : > { %v2334_v23 = vor.u32 %v2333_v11, %v2330_v18  ;;  %v2354_v9 = vrot.slane %v2352_v61, 4  ;;  %v2367_v11 = vrot.slane %v2365_v21, 4  ;;  %v6468_v61 = vld [vmem:[%s6533_s25 + $0xbc] sm:$0x1] }
 0x143   : > { %v2292_v47 = vsel %vm6559_vm4, %v2287_v52, %v8098_v24  ;;  %v2316_v0 = vsel %vm6559_vm4, %v2311_v15, %v8118_v26  ;;  %v2395_v22 = vshll.u32 %v6468_v61, 16 }
 0x144   : > { %6028 = vmatmul.mubr.msk.bf16.gmra.mrb[8].mxu0 %vm669_vm3, %v5560_v40  ;;  %v2341_v40 = vshrl.u32 %v6460_v60, 16  ;;  %v2335_v17 = vrot.slane %v2334_v23, 4  ;;  %v5289_v24 = vcombine.low %v2292_v47, %v2302_v46 }
 0x145   : > { %5874 = vmatmul.mubr.msk.bf16.gmra.mrb[24].mxu1 %vm669_vm3, %v6410_v2  ;;  %6031 = vmatprep.mubr.msk.bf16.mxu0 %vm669_vm3, %v5561_v54  ;;  %v2319_v54 = vrot.slane %v2317_v28, 4 }
 0x146   : > { %5877 = vmatprep.mubr.msk.bf16.mxu1 %vm669_vm3, %v6411_v34  ;;  %v2343_v2 = vrot.slane %v2341_v40, 4  ;;  %v2323_v34 = vshll.u32 %v6462_v35, 16  ;;  %v2340_v10 = vsel %vm6559_vm4, %v2335_v17, %v8121_v6  ;;  %v2421_v17 = vrot.slane %v2419_v57, 5 }
 0x147   : > { %v2320_v49 = vor.u32 %v2319_v54, %v8118_v26  ;;  %v2357_v54 = vrot.slane %v2355_v45, 5  ;;  %v6466_v26 = vld [vmem:[%s6533_s25 + $0xb0] sm:$0x1] }
 0x148   : > { %v2344_v28 = vor.u32 %v2343_v2, %v8121_v6  ;;  %v2325_v60 = vrot.slane %v2323_v34, 5  ;;  %v2371_v35 = vshll.u32 %v6466_v26, 16  ;;  %v2400_v34 = vshrl.u32 %v5275_v39, 16 }
 0x149   : > { %v2321_v13 = vrot.slane %v2320_v49, 4  ;;  %v2358_v38 = vor.u32 %v2357_v54, %v2354_v9  ;;  %v2403_v6 = vshll.u32 %v5275_v39, 16  ;;  %v6467_v49 = vld [vmem:[%s6533_s25 + $0xc4] sm:$0xf] }
 0x14a   : > { %v2345_v14 = vrot.slane %v2344_v28, 4  ;;  %v2409_v23 = vshll.u32 %v6467_v49, 16  ;;  %v2413_v25 = vshrl.u32 %v6467_v49, 16  ;;  %v2373_v45 = vrot.slane %v2371_v35, 5 }
 0x14b   : > { %v2326_v36 = vsel %vm6559_vm4, %v2321_v13, %v2325_v60  ;;  %v2359_v51 = vrot.slane %v2358_v38, 4  ;;  %v2397_v60 = vrot.slane %v2395_v22, 5 }
 0x14c   : > { %6032 = vmatmul.mubr.msk.bf16.gmra.mrb[12].mxu0 %vm669_vm3, %v5562_v53  ;;  %v2361_v53 = vshll.u32 %v6464_v27, 16  ;;  %v2350_v59 = vsel %vm6559_vm4, %v2345_v14, %v2349_v30  ;;  %v5290_v44 = vcombine.low %v2316_v0, %v2326_v36  ;;  %v2402_v27 = vrot.slane %v2400_v34, 4 }
 0x14d   : > { %5878 = vmatmul.mubr.msk.bf16.gmra.mrb[28].mxu1 %vm669_vm3, %v6412_v19  ;;  %6035 = vmatprep.mubr.msk.bf16.mxu0 %vm669_vm3, %v5563_v33  ;;  %v6465_v33 = vld [vmem:[%s6533_s25 + $0xb8] sm:$0xf]  ;;  %v2378_v19 = vrot.slane %v2376_v20, 4  ;;  %v2411_v21 = vrot.slane %v2409_v23, 5  ;;  %v2415_v47 = vrot.slane %v2413_v25, 4 }
 0x14e   : > { %5899 = vmatprep.mubr.msk.bf16.mxu1 %vm669_vm3, %v5287_v41  ;;  %v2385_v12 = vshll.u32 %v6465_v33, 16  ;;  %v2389_v40 = vshrl.u32 %v6465_v33, 16  ;;  %v2363_v18 = vrot.slane %v2361_v53, 5  ;;  %v2381_v41 = vrot.slane %v2379_v42, 5 }
 0x14f   : > { %v2405_v53 = vrot.slane %v2403_v6, 5 }
 0x150   : > { %v2387_v52 = vrot.slane %v2385_v12, 5  ;;  %v2391_v2 = vrot.slane %v2389_v40, 4  ;;  %v2364_v20 = vsel %vm6559_vm4, %v2359_v51, %v2363_v18  ;;  %v2416_v12 = vor.u32 %v2415_v47, %v2411_v21 }
 0x151   : > { %v2406_v33 = vor.u32 %v2405_v53, %v2402_v27 }
 0x152   : > { %v2392_v7 = vor.u32 %v2391_v2, %v2387_v52  ;;  %v2417_v13 = vrot.slane %v2416_v12, 4 }
 0x153   : > { %v2407_v40 = vrot.slane %v2406_v33, 4 }
 0x154   : > { %6036 = vmatmul.mubr.msk.bf16.gmra.mrb[16].mxu0 %vm669_vm3, %v5564_v37  ;;  %v2368_v37 = vor.u32 %v2367_v11, %v2363_v18  ;;  %v2393_v15 = vrot.slane %v2392_v7, 4  ;;  %v2422_v9 = vsel %vm6559_vm4, %v2417_v13, %v2421_v17 }
 0x155   : > { %5900 = vmatmul.mubr.msk.bf16.vlgmr.msra.gmra.mrb[16].mxu1 %vm669_vm3, %v7927_v1  ;;  %6039 = vmatprep.mubr.msk.bf16.mxu0 %vm669_vm3, %v5565_v3  ;;  %v2382_v1 = vor.u32 %v2381_v41, %v2378_v19  ;;  %v5291_v3 = vcombine.low %v2340_v10, %v2350_v59  ;;  %v2412_v30 = vsel %vm6559_vm4, %v2407_v40, %v2411_v21 }
 0x156   : > { %5903 = vmatprep.mubr.msk.bf16.mxu1 %vm669_vm3, %v5289_v24  ;;  %v2369_v28 = vrot.slane %v2368_v37, 4  ;;  %v2398_v48 = vsel %vm6559_vm4, %v2393_v15, %v2397_v60  ;;  %v5294_v14 = vcombine.low %v2412_v30, %v2422_v9 }
 0x157   : > { %v2383_v46 = vrot.slane %v2382_v1, 4 }
 0x158   : > { %v2374_v42 = vsel %vm6559_vm4, %v2369_v28, %v2373_v45 }
 0x159   : > { %v5292_v62 = vcombine.low %v2364_v20, %v2374_v42 }
 0x15c   : > { %6040 = vmatmul.mubr.msk.bf16.gmra.mrb[20].mxu0 %vm669_vm3, %v5566_v8  ;;  %v2388_v8 = vsel %vm6559_vm4, %v2383_v46, %v2387_v52 }
 0x15d   : > { %5904 = vmatmul.mubr.msk.bf16.gmra.mrb[20].mxu1 %vm669_vm3, %v5290_v44  ;;  %6043 = vmatprep.mubr.msk.bf16.mxu0 %vm669_vm3, %v5567_v56  ;;  %v5293_v56 = vcombine.low %v2388_v8, %v2398_v48 }
 0x15e   : > { %5907 = vmatprep.mubr.msk.bf16.mxu1 %vm669_vm3, %v5291_v3 }
 0x164   : > { %6044 = vmatmul.mubr.msk.bf16.gmra.mrb[24].mxu0 %vm669_vm3, %v5568_v43 }
 0x165   : > { %5908 = vmatmul.mubr.msk.bf16.gmra.mrb[24].mxu1 %vm669_vm3, %v5292_v62  ;;  %6047 = vmatprep.mubr.msk.bf16.mxu0 %vm669_vm3, %v5569_v50 }
 0x166   : > { %5911 = vmatprep.mubr.msk.bf16.mxu1 %vm669_vm3, %v5293_v56 }
 0x16c   : > { %6048 = vmatmul.mubr.msk.bf16.gmra.mrb[28].mxu0 %vm669_vm3, %v5570_v29 }
 0x16d   : > { %5912 = vmatmul.mubr.msk.bf16.gmra.mrb[28].mxu1 %vm669_vm3, %v5294_v14 }
 0x1e8   : > { %v5851_v63 = vpop.f32.mrb[0].mxu1 }
 0x1e9   : > { %v1832_v4 = vpop.f32.mrb[1].mxu1 }
 0x1ea   : > { %v5852_v43 = vpop.f32.mrb[2].mxu1 }
 0x1eb   : > { %v1835_v16 = vpop.f32.mrb[3].mxu1 }
 0x1f0   : > { %v5855_v58 = vpop.f32.mrb[4].mxu1 }
 0x1f1   : > { %v1848_v50 = vpop.f32.mrb[5].mxu1 }
 0x1f2   : > { %v5856_v54 = vpop.f32.mrb[6].mxu1 }
 0x1f3   : > { %v1851_v18 = vpop.f32.mrb[7].mxu1 }
 0x1f8   : > { %v5859_v11 = vpop.f32.mrb[8].mxu1 }
 0x1f9   : > { %v1864_v24 = vpop.f32.mrb[9].mxu1 }
 0x1fa   : > { %v5860_v32 = vpop.f32.mrb[10].mxu1 }
 0x1fb   : > { %v1867_v19 = vpop.f32.mrb[11].mxu1 }
 0x200   : > { %v5863_v41 = vpop.f32.mrb[12].mxu1 }
 0x201   : > { %v1880_v52 = vpop.f32.mrb[13].mxu1 }
 0x202   : > { %v5864_v2 = vpop.f32.mrb[14].mxu1 }
 0x203   : > { %v1883_v5 = vpop.f32.mrb[15].mxu1 }
 0x207   : > { %v6021_v55 = vpop.f32.mrb[0].mxu0 }
 0x208   : > { %v8209_v29 = vadd.f32 %v6021_v55, %v5851_v63  ;;  %v4583_v39 = vpop.f32.mrb[1].mxu0 }
 0x209   : > { %v8211_v0 = vadd.f32 %v4583_v39, %v1832_v4  ;;  %v6022_v36 = vpop.f32.mrb[2].mxu0 }
 0x20a   : > { %v8213_v10 = vadd.f32 %v6022_v36, %v5852_v43  ;;  %v4586_v59 = vpop.f32.mrb[3].mxu0 }
 0x20b   : > { %v8215_v38 = vadd.f32 %v4586_v59, %v1835_v16 }
 0x20d   : > { %v4742_v37 = vadd.f32 %v8215_v38, %v8211_v0 }
 0x20f   : > { %v4743_v26 = vadd.f32 %v8209_v29, %v4742_v37  ;;  %v6025_v35 = vpop.f32.mrb[4].mxu0 }
 0x210   : > { %v8220_v34 = vadd.f32 %v6025_v35, %v5855_v58  ;;  %v4599_v6 = vpop.f32.mrb[5].mxu0 }
 0x211   : > { %v8222_v49 = vadd.f32 %v4599_v6, %v1848_v50  ;;  %v4744_v23 = vadd.f32 %v8213_v10, %v4743_v26  ;;  %v6026_v25 = vpop.f32.mrb[6].mxu0 }
 0x212   : > { %v8225_v1 = vadd.f32 %v6026_v25, %v5856_v54  ;;  %v4602_v7 = vpop.f32.mrb[7].mxu0 }
 0x213   : > { %v4745_v61 = vadd.f32 %v8222_v49, %v4744_v23  ;;  %v8228_v22 = vadd.f32 %v4602_v7, %v1851_v18 }
 0x215   : > { %v4746_v44 = vadd.f32 %v8228_v22, %v4745_v61 }
 0x217   : > { %v4747_v3 = vadd.f32 %v8220_v34, %v4746_v44  ;;  %v6029_v51 = vpop.f32.mrb[8].mxu0 }
 0x218   : > { %v8232_v28 = vadd.f32 %v6029_v51, %v5859_v11  ;;  %v4615_v45 = vpop.f32.mrb[9].mxu0 }
 0x219   : > { %v8234_v27 = vadd.f32 %v4615_v45, %v1864_v24  ;;  %v4748_v53 = vadd.f32 %v8225_v1, %v4747_v3  ;;  %v6030_v21 = vpop.f32.mrb[10].mxu0 }
 0x21a   : > { %v8237_v47 = vadd.f32 %v6030_v21, %v5860_v32  ;;  %v4618_v46 = vpop.f32.mrb[11].mxu0 }
 0x21b   : > { %v4749_v15 = vadd.f32 %v8234_v27, %v4748_v53  ;;  %v8240_v60 = vadd.f32 %v4618_v46, %v1867_v19 }
 0x21d   : > { %v4750_v20 = vadd.f32 %v8240_v60, %v4749_v15 }
 0x21f   : > { %v4751_v42 = vadd.f32 %v8232_v28, %v4750_v20  ;;  %v6033_v33 = vpop.f32.mrb[12].mxu0 }
 0x220   : > { %v8244_v12 = vadd.f32 %v6033_v33, %v5863_v41  ;;  %v4631_v31 = vpop.f32.mrb[13].mxu0 }
 0x221   : > { %v8246_v57 = vadd.f32 %v4631_v31, %v1880_v52  ;;  %v4752_v8 = vadd.f32 %v8237_v47, %v4751_v42  ;;  %v6034_v48 = vpop.f32.mrb[14].mxu0 }
 0x222   : > { %v8249_v62 = vadd.f32 %v6034_v48, %v5864_v2  ;;  %v4634_v56 = vpop.f32.mrb[15].mxu0 }
 0x223   : > { %v4753_v40 = vadd.f32 %v8246_v57, %v4752_v8  ;;  %v8252_v13 = vadd.f32 %v4634_v56, %v1883_v5 }
 0x225   : > { %v4754_v17 = vadd.f32 %v8252_v13, %v4753_v40 }
 0x227   : > { %v4755_v30 = vadd.f32 %v8244_v12, %v4754_v17  ;;  %v6037_v9 = vpop.f32.mrb[16].mxu0 }
 0x228   : > { %v5901_v14 = vpop.f32.mrb[16].mxu1  ;;  %v4647_v63 = vpop.f32.mrb[17].mxu0 }
 0x229   : > { %v8256_v4 = vadd.f32 %v6037_v9, %v5901_v14  ;;  %v2622_v43 = vpop.f32.mrb[17].mxu1  ;;  %v4756_v16 = vadd.f32 %v8249_v62, %v4755_v30  ;;  %v6038_v58 = vpop.f32.mrb[18].mxu0 }
 0x22a   : > { %v8259_v50 = vadd.f32 %v4647_v63, %v2622_v43  ;;  %v5902_v54 = vpop.f32.mrb[18].mxu1  ;;  %v4650_v18 = vpop.f32.mrb[19].mxu0 }
 0x22b   : > { %v8261_v11 = vadd.f32 %v6038_v58, %v5902_v54  ;;  %v2625_v24 = vpop.f32.mrb[19].mxu1  ;;  %v6332_v51 = vpack.i.bf16 %v8256_v4, %v8209_v29 }
 0x22c   : > { %v4757_v32 = vadd.f32 %v8259_v50, %v4756_v16  ;;  %v8264_v19 = vadd.f32 %v4650_v18, %v2625_v24  ;;  %v6328_v41 = vpack.i.bf16 %v8259_v50, %v8211_v0 }
 0x22d   : > { %v6334_v20 = vpack.i.bf16 %v8261_v11, %v8213_v10 }
 0x22e   : > { %v4758_v52 = vadd.f32 %v8264_v19, %v4757_v32  ;;  %6329 = vxpose.xlu0.b32.start [1/16] (narrow) %v6328_v41, 8  ;;  %v6330_v36 = vpack.i.bf16 %v8264_v19, %v8215_v38 }
 0x22f   : > { %v6041_v2 = vpop.f32.mrb[20].mxu0 }
 0x230   : > { %v4759_v5 = vadd.f32 %v8256_v4, %v4758_v52  ;;  %v5905_v55 = vpop.f32.mrb[20].mxu1  ;;  %v4663_v39 = vpop.f32.mrb[21].mxu0 }
 0x231   : > { %v8272_v59 = vadd.f32 %v6041_v2, %v5905_v55  ;;  %v2638_v37 = vpop.f32.mrb[21].mxu1  ;;  %v6042_v26 = vpop.f32.mrb[22].mxu0 }
 0x232   : > { %v8274_v35 = vadd.f32 %v4663_v39, %v2638_v37  ;;  %v4760_v6 = vadd.f32 %v8261_v11, %v4759_v5  ;;  %6331 = vxpose.xlu0.b32.cont [2/16] (narrow) %v6330_v36, 8  ;;  %v5906_v23 = vpop.f32.mrb[22].mxu1  ;;  %v4666_v25 = vpop.f32.mrb[23].mxu0 }
 0x233   : > { %v8277_v7 = vadd.f32 %v6042_v26, %v5906_v23  ;;  %v2641_v61 = vpop.f32.mrb[23].mxu1 }
 0x234   : > { %v4761_v44 = vadd.f32 %v8274_v35, %v4760_v6  ;;  %v8280_v3 = vadd.f32 %v4666_v25, %v2641_v61  ;;  %v6336_v43 = vpack.i.bf16 %v8274_v35, %v8222_v49 }
 0x236   : > { %v4762_v45 = vadd.f32 %v8280_v3, %v4761_v44  ;;  %6333 = vxpose.xlu0.b32.cont [3/16] (narrow) %v6332_v51, 8  ;;  %v6338_v52 = vpack.i.bf16 %v8280_v3, %v8228_v22  ;;  %v6340_v51 = vpack.i.bf16 %v8272_v59, %v8220_v34 }
 0x237   : > { %v6045_v53 = vpop.f32.mrb[24].mxu0 }
 0x238   : > { %v4763_v21 = vadd.f32 %v8272_v59, %v4762_v45  ;;  %v5909_v46 = vpop.f32.mrb[24].mxu1  ;;  %v4679_v15 = vpop.f32.mrb[25].mxu0 }
 0x239   : > { %v8288_v42 = vadd.f32 %v6045_v53, %v5909_v46  ;;  %v2654_v33 = vpop.f32.mrb[25].mxu1  ;;  %v6046_v31 = vpop.f32.mrb[26].mxu0 }
 0x23a   : > { %v8290_v8 = vadd.f32 %v4679_v15, %v2654_v33  ;;  %v4764_v48 = vadd.f32 %v8277_v7, %v4763_v21  ;;  %6335 = vxpose.xlu0.b32.cont [4/16] (narrow) %v6334_v20, 8  ;;  %v5910_v56 = vpop.f32.mrb[26].mxu1  ;;  %v4682_v40 = vpop.f32.mrb[27].mxu0  ;;  %v6342_v20 = vpack.i.bf16 %v8277_v7, %v8225_v1 }
 0x23b   : > { %v8293_v17 = vadd.f32 %v6046_v31, %v5910_v56  ;;  %v2657_v30 = vpop.f32.mrb[27].mxu1  ;;  %v6348_v9 = vpack.i.bf16 %v8288_v42, %v8232_v28 }
 0x23c   : > { %v4765_v14 = vadd.f32 %v8290_v8, %v4764_v48  ;;  %v8298_v63 = vadd.f32 %v4682_v40, %v2657_v30  ;;  %v6344_v48 = vpack.i.bf16 %v8290_v8, %v8234_v27 }
 0x23d   : > { %v6350_v16 = vpack.i.bf16 %v8293_v17, %v8237_v47 }
 0x23e   : > { %v4766_v58 = vadd.f32 %v8298_v63, %v4765_v14  ;;  %6337 = vxpose.xlu0.b32.cont [5/16] (narrow) %v6336_v43, 8  ;;  %v6346_v54 = vpack.i.bf16 %v8298_v63, %v8240_v60 }
 0x23f   : > { %v6049_v18 = vpop.f32.mrb[28].mxu0 }
 0x240   : > { %v4767_v24 = vadd.f32 %v8288_v42, %v4766_v58  ;;  %v5913_v32 = vpop.f32.mrb[28].mxu1  ;;  %v4695_v41 = vpop.f32.mrb[29].mxu0 }
 0x241   : > { %v8310_v2 = vadd.f32 %v6049_v18, %v5913_v32  ;;  %v2670_v5 = vpop.f32.mrb[29].mxu1  ;;  %v6050_v55 = vpop.f32.mrb[30].mxu0 }
 0x242   : > { %v6082_v39 = vadd.f32 %v4695_v41, %v2670_v5  ;;  %v4768_v36 = vadd.f32 %v8293_v17, %v4767_v24  ;;  %6339 = vxpose.xlu0.b32.cont [6/16] (narrow) %v6338_v52, 8  ;;  %v5914_v37 = vpop.f32.mrb[30].mxu1  ;;  %v4698_v26 = vpop.f32.mrb[31].mxu0 }
 0x243   : > { %v8313_v6 = vadd.f32 %v6050_v55, %v5914_v37  ;;  %v2673_v23 = vpop.f32.mrb[31].mxu1  ;;  %v6356_v25 = vpack.i.bf16 %v8310_v2, %v8244_v12 }
 0x244   : > { %v4769_v61 = vadd.f32 %v6082_v39, %v4768_v36  ;;  %v6084_v44 = vadd.f32 %v4698_v26, %v2673_v23  ;;  %v6352_v45 = vpack.i.bf16 %v6082_v39, %v8246_v57 }
 0x245   : > { %v6358_v53 = vpack.i.bf16 %v8313_v6, %v8249_v62 }
 0x246   : > { %v4770_v21 = vadd.f32 %v6084_v44, %v4769_v61  ;;  %6341 = vxpose.xlu0.b32.cont [7/16] (narrow) %v6340_v51, 8  ;;  %v6354_v46 = vpack.i.bf16 %v6084_v44, %v8252_v13 }
 0x248   : > { %v4771_v15 = vadd.f32 %v8310_v2, %v4770_v21 }
 0x24a   : > { %v4772_v33 = vadd.f32 %v8313_v6, %v4771_v15  ;;  %6343 = vxpose.xlu0.b32.cont [8/16] (narrow) %v6342_v20, 8 }
 0x24c   : > { %v4773_v31 = vrot.slane %v4772_v33, 4 }
 0x24e   : > { %v4774_v56 = vadd.f32 %v4773_v31, %v4772_v33  ;;  %6345 = vxpose.xlu0.b32.cont [9/16] (narrow) %v6344_v48, 8 }
 0x250   : > { %v4775_v40 = vrot.slane %v4774_v56, 2 }
 0x252   : > { %v4776_v30 = vadd.f32 %v4775_v40, %v4774_v56  ;;  %6347 = vxpose.xlu0.b32.cont [10/16] (narrow) %v6346_v54, 8 }
 0x254   : > { %v4777_v14 = vrot.slane %v4776_v30, 1 }
 0x256   : > { %v4778_v43 = vadd.f32 %v4777_v14, %v4776_v30  ;;  %6349 = vxpose.xlu0.b32.cont [11/16] (narrow) %v6348_v9, 8 }
 0x258   : > { %v4779_v58 = vmul.f32 0.00390625, %v4778_v43  ;;  %4881 = vst [vmem:[%s8333_s18] sm:$0x1] %v4778_v43 }
 0x25a   : > { %6351 = vxpose.xlu0.b32.cont [12/16] (narrow) %v6350_v16, 8  ;;  %v4789_v18 = vsub.f32 %v8240_v60, %v4779_v58  ;;  %v4790_v24 = vsub.f32 %v8232_v28, %v4779_v58  ;;  %v4791_v32 = vsub.f32 %v8237_v47, %v4779_v58  ;;  %v4792_v54 = vsub.f32 %v8246_v57, %v4779_v58 }
 0x25b   : > { %v4793_v41 = vsub.f32 %v8252_v13, %v4779_v58  ;;  %v4794_v52 = vsub.f32 %v8244_v12, %v4779_v58  ;;  %v4795_v5 = vsub.f32 %v8249_v62, %v4779_v58  ;;  %v4796_v55 = vsub.f32 %v8259_v50, %v4779_v58 }
 0x25c   : > { %v4797_v9 = vsub.f32 %v8264_v19, %v4779_v58  ;;  %v4798_v16 = vsub.f32 %v8256_v4, %v4779_v58  ;;  %v4799_v60 = vsub.f32 %v8261_v11, %v4779_v58  ;;  %v4800_v28 = vsub.f32 %v8274_v35, %v4779_v58 }
 0x25d   : > { %v8349_v47 = vsub.f32 %v8280_v3, %v4779_v58  ;;  %v8352_v57 = vsub.f32 %v8272_v59, %v4779_v58  ;;  %v8355_v12 = vsub.f32 %v8277_v7, %v4779_v58  ;;  %v8358_v62 = vsub.f32 %v8290_v8, %v4779_v58 }
 0x25e   : > { %6353 = vxpose.xlu0.b32.cont [13/16] (narrow) %v6352_v45, 8  ;;  %v8361_v13 = vsub.f32 %v8298_v63, %v4779_v58  ;;  %v8364_v4 = vsub.f32 %v8288_v42, %v4779_v58  ;;  %v8367_v50 = vsub.f32 %v8293_v17, %v4779_v58  ;;  %v8369_v11 = vsub.f32 %v6082_v39, %v4779_v58 }
 0x25f   : > { %v8371_v19 = vsub.f32 %v6084_v44, %v4779_v58  ;;  %v8374_v59 = vsub.f32 %v8310_v2, %v4779_v58  ;;  %v8377_v35 = vsub.f32 %v8313_v6, %v4779_v58  ;;  %v4780_v7 = vsub.f32 %v8211_v0, %v4779_v58 }
 0x260   : > { %v4781_v3 = vsub.f32 %v8215_v38, %v4779_v58  ;;  %v4782_v42 = vsub.f32 %v8209_v29, %v4779_v58  ;;  %v4783_v63 = vsub.f32 %v8213_v10, %v4779_v58  ;;  %v4784_v39 = vsub.f32 %v8222_v49, %v4779_v58 }
 0x261   : > { %v4812_v8 = vmul.f32 %v4780_v7, %v4780_v7  ;;  %v4785_v37 = vsub.f32 %v8228_v22, %v4779_v58  ;;  %v4786_v0 = vsub.f32 %v8220_v34, %v4779_v58  ;;  %v4787_v29 = vsub.f32 %v8225_v1, %v4779_v58 }
 0x262   : > { %6355 = vxpose.xlu0.b32.cont [14/16] (narrow) %v6354_v46, 8  ;;  %v4813_v17 = vmul.f32 %v4781_v3, %v4781_v3  ;;  %v4814_v36 = vmul.f32 %v4782_v42, %v4782_v42  ;;  %v4815_v26 = vmul.f32 %v4783_v63, %v4783_v63  ;;  %v4816_v38 = vmul.f32 %v4784_v39, %v4784_v39 }
 0x263   : > { %v4817_v61 = vmul.f32 %v4785_v37, %v4785_v37  ;;  %v4818_v10 = vmul.f32 %v4786_v0, %v4786_v0  ;;  %v4819_v49 = vmul.f32 %v4787_v29, %v4787_v29  ;;  %v4821_v46 = vmul.f32 %v4789_v18, %v4789_v18 }
 0x264   : > { %v4844_v2 = vadd.f32 %v4813_v17, %v4812_v8  ;;  %v4822_v15 = vmul.f32 %v4790_v24, %v4790_v24  ;;  %v4823_v33 = vmul.f32 %v4791_v32, %v4791_v32  ;;  %v4824_v31 = vmul.f32 %v4792_v54, %v4792_v54 }
 0x265   : > { %v4825_v56 = vmul.f32 %v4793_v41, %v4793_v41  ;;  %v4826_v40 = vmul.f32 %v4794_v52, %v4794_v52  ;;  %v4827_v14 = vmul.f32 %v4795_v5, %v4795_v5  ;;  %v4828_v43 = vmul.f32 %v4796_v55, %v4796_v55 }
 0x266   : > { %6357 = vxpose.xlu0.b32.cont [15/16] (narrow) %v6356_v25, 8  ;;  %v4845_v6 = vadd.f32 %v4844_v2, %v4814_v36  ;;  %v4788_v25 = vsub.f32 %v8234_v27, %v4779_v58  ;;  %v4829_v7 = vmul.f32 %v4797_v9, %v4797_v9  ;;  %v4830_v42 = vmul.f32 %v4798_v16, %v4798_v16 }
 0x267   : > { %v4831_v18 = vmul.f32 %v4799_v60, %v4799_v60  ;;  %v4832_v24 = vmul.f32 %v4800_v28, %v4800_v28  ;;  %v4833_v32 = vmul.f32 %v8349_v47, %v8349_v47  ;;  %v4834_v41 = vmul.f32 %v8352_v57, %v8352_v57 }
 0x268   : > { %v4846_v23 = vadd.f32 %v4845_v6, %v4815_v26  ;;  %v4820_v21 = vmul.f32 %v4788_v25, %v4788_v25  ;;  %v4835_v5 = vmul.f32 %v8355_v12, %v8355_v12  ;;  %v4836_v9 = vmul.f32 %v8358_v62, %v8358_v62 }
 0x269   : > { %v4837_v60 = vmul.f32 %v8361_v13, %v8361_v13  ;;  %v4838_v47 = vmul.f32 %v8364_v4, %v8364_v4  ;;  %v4839_v57 = vmul.f32 %v8367_v50, %v8367_v50  ;;  %v4840_v12 = vmul.f32 %v8369_v11, %v8369_v11 }
 0x26a   : > { %6359 = vxpose.xlu0.b32.end [16/16] (narrow) %v6358_v53, 8  ;;  %v4847_v44 = vadd.f32 %v4846_v23, %v4816_v38  ;;  %v4841_v62 = vmul.f32 %v8371_v19, %v8371_v19  ;;  %v4842_v13 = vmul.f32 %v8374_v59, %v8374_v59  ;;  %v4843_v4 = vmul.f32 %v8377_v35, %v8377_v35 }
 0x26c   : > { %v4848_v51 = vadd.f32 %v4847_v44, %v4817_v61 }
 0x26e   : > { %v4849_v45 = vadd.f32 %v4848_v51, %v4818_v10 }
 0x270   : > { %v4850_v53 = vadd.f32 %v4849_v45, %v4819_v49 }
 0x272   : > { %v4851_v22 = vadd.f32 %v4850_v53, %v4820_v21 }
 0x274   : > { %v4852_v20 = vadd.f32 %v4851_v22, %v4821_v46 }
 0x276   : > { %v4853_v34 = vadd.f32 %v4852_v20, %v4822_v15 }
 0x278   : > { %v4854_v48 = vadd.f32 %v4853_v34, %v4823_v33 }
 0x27a   : > { %v4855_v1 = vadd.f32 %v4854_v48, %v4824_v31 }
 0x27c   : > { %v4856_v30 = vadd.f32 %v4855_v1, %v4825_v56 }
 0x27e   : > { %v4857_v27 = vadd.f32 %v4856_v30, %v4826_v40 }
 0x280   : > { %v4858_v58 = vadd.f32 %v4857_v27, %v4827_v14 }
 0x282   : > { %v4859_v3 = vadd.f32 %v4858_v58, %v4828_v43 }
 0x284   : > { %v4860_v8 = vadd.f32 %v4859_v3, %v4829_v7 }
 0x286   : > { %v4861_v17 = vadd.f32 %v4860_v8, %v4830_v42 }
 0x288   : > { %v4862_v63 = vadd.f32 %v4861_v17, %v4831_v18 }
 0x28a   : > { %v4863_v54 = vadd.f32 %v4862_v63, %v4832_v24 }
 0x28c   : > { %v4864_v52 = vadd.f32 %v4863_v54, %v4833_v32 }
 0x28e   : > { %v4865_v55 = vadd.f32 %v4864_v52, %v4834_v41 }
 0x290   : > { %v4866_v16 = vadd.f32 %v4865_v55, %v4835_v5 }
 0x292   : > { %v4867_v28 = vadd.f32 %v4866_v16, %v4836_v9 }
 0x294   : > { %v4868_v39 = vadd.f32 %v4867_v28, %v4837_v60 }
 0x296   : > { %v4869_v36 = vadd.f32 %v4868_v39, %v4838_v47 }
 0x298   : > { %v4870_v2 = vadd.f32 %v4869_v36, %v4839_v57 }
 0x29a   : > { %v4871_v37 = vadd.f32 %v4870_v2, %v4840_v12 }
 0x29c   : > { %v4872_v26 = vadd.f32 %v4871_v37, %v4841_v62 }
 0x29e   : > { %v4873_v6 = vadd.f32 %v4872_v26, %v4842_v13 }
 0x2a0   : > { %v4874_v0 = vadd.f32 %v4873_v6, %v4843_v4 }
 0x2a2   : > { %v4875_v50 = vrot.slane %v4874_v0, 4 }
 0x2a4   : > { %v4876_v38 = vadd.f32 %v4875_v50, %v4874_v0 }
 0x2a6   : > { %v4877_v23 = vrot.slane %v4876_v38, 2 }
 0x2a8   : > { %v4878_v11 = vadd.f32 %v4877_v23, %v4876_v38 }
 0x2aa   : > { %v4879_v19 = vrot.slane %v4878_v11, 1 }
 0x2ac   : > { %v4880_v25 = vadd.f32 %v4879_v19, %v4878_v11 }
 0x2ae   : > { %v6360_v29 = vpop.trf.xlu0  ;;  %4882 = vst [vmem:[%s8333_s18 + $0x1] sm:$0x1] %v4880_v25 }
 0x2af   : > { %v6364_v61 = vunpack.i.h.bf16 %v6360_v29  ;;  %v6361_v44 = vunpack.i.l.bf16 %v6360_v29 }
 0x2b1   : > { %v5591_v59 = vpack.c.bf16 %v6364_v61, %v6361_v44 }
 0x2b3   : > { %4955 = vst [vmem:[%s177_s22] sm:$0xff] %v5591_v59 }
 0x2b4 PF: > { %s14_s12 = sadd.s32 1, %s6476_s12  }
 0x2b5   : > { %p11_p4 = scmp.ge.s32.totalorder %s14_s12, 4  }
 0x2b7   :  { %13 = sbr.rel (!%p11_p4) target bundleno = 1 (0x1), region = 80 }

</bundles_post_ra>
